<compile_context>
chip_gen: v6e
topology: v6e:2x2x1
jax: 0.10.0
libtpu: 0.0.40
codegen_flags: <defaults>
</compile_context>

<pallas_src>
import numpy as np

import jax
import jax.numpy as jnp
from jax.experimental import pallas as pl
from jax.experimental.pallas import tpu as pltpu

GEMM_DTYPE = jnp.bfloat16   # MXU operand dtype (accumulation stays f32)

# Static network geometry (the module requires 28x28 inputs: fc1 expects 3*3*64).
IMG = 28
C1, C2 = 32, 64
OH1 = 26          # conv1 output spatial
PH1 = 13          # after 2x2 pool
OH2 = 11          # conv2 output spatial
PH2 = 5           # after 2x2 pool (floor: row/col 10 dropped)
NP1 = 512         # one w-parity column block after conv1: 13*32=416 -> pad 512 (4*128)
NP2 = 384         # one w-parity column block after conv2:  5*64=320 -> pad 384 (3*128)


# ----------------------------------------------------------------------------
# The fused kernel (one image per grid step; everything stays in VMEM/vregs)
# ----------------------------------------------------------------------------
def _net_fused_kernel(x_ref, a1_ref, b1_ref, s1_ref, a2_ref, b2_ref, s2_ref,
                      wt_ref, bt1_ref, wfc2_ref, bfc2_ref, o_ref,
                      pool1_s, pool2_s):
    f32 = jnp.float32
    bf16 = GEMM_DTYPE

    # ---- conv1 (C_in=1): 3 per-tap matmuls; output columns = (w_parity, w//2, c),
    #      each parity block zero-padded to NP1 lanes (128-aligned slicing). ----
    y1 = jnp.zeros((OH1, 2 * NP1), f32)
    for ki in range(3):
        lhs = x_ref[ki:ki + OH1, :].astype(bf16)                      # [26, 28]
        y1 = y1 + jnp.dot(lhs, a1_ref[ki], preferred_element_type=f32)
    z1 = jnp.maximum(y1 + b1_ref[...], 0.0)                           # bias + ReLU (f32)
    wmax1 = jnp.maximum(z1[:, :NP1], z1[:, NP1:]).astype(bf16)        # max over w-parity
    # h-pooling: select even / odd rows with 0/1 matrices on the MXU, then max.
    p1 = jnp.maximum(jnp.dot(s1_ref[0], wmax1, preferred_element_type=f32),
                     jnp.dot(s1_ref[1], wmax1, preferred_element_type=f32))
    pool1_s[...] = p1                                                 # [13, 512] f32

    # ---- conv2: 3 per-tap matmuls on the pooled map (pad columns are exactly 0). ----
    y2 = jnp.zeros((OH2, 2 * NP2), f32)
    for ki in range(3):
        lhs = pool1_s[ki:ki + OH2, :].astype(bf16)                    # [11, 512]
        y2 = y2 + jnp.dot(lhs, a2_ref[ki], preferred_element_type=f32)
    z2 = jnp.maximum(y2 + b2_ref[...], 0.0)
    wmax2 = jnp.maximum(z2[:, :NP2], z2[:, NP2:]).astype(bf16)        # [11, 384]
    p2 = jnp.maximum(jnp.dot(s2_ref[0], wmax2, preferred_element_type=f32),
                     jnp.dot(s2_ref[1], wmax2, preferred_element_type=f32))
    pool2_s[...] = p2                                                 # [5, 384] f32

    # ---- tail: (conv3 ∘ CHW-flatten ∘ fc1) pre-folded into wt_ref, + ReLU + fc2. ----
    hidden = bt1_ref[...]                                             # [1, 64] f32
    for h in range(PH2):
        row = pool2_s[h:h + 1, :].astype(bf16)                        # [1, 384]
        hidden = hidden + jnp.dot(row, wt_ref[h], preferred_element_type=f32)
    hrelu = jnp.maximum(hidden, 0.0).astype(bf16)                     # [1, 64]
    logits = jnp.dot(hrelu, wfc2_ref[...], preferred_element_type=f32) + bfc2_ref[...]
    o_ref[...] = logits                                               # [1, 10] f32


def net_forward(kp, x_nchw):
    """Forward pass. x_nchw: [B, 1, 28, 28] f32 -> logits [B, 10] f32."""
    B, C, H, W = x_nchw.shape
    assert (C, H, W) == (1, IMG, IMG), "Net requires 1x28x28 inputs"
    x = x_nchw.reshape(B, IMG, IMG).astype(jnp.float32)

    const3 = lambda b: (0, 0, 0)
    const2 = lambda b: (0, 0)
    # TODO(synk): for large batches, process several images per grid step to
    # amortize the ~0.35us per-step overhead (the per-image compute is tiny).
    out = pl.pallas_call(
        _net_fused_kernel,
        out_shape=jax.ShapeDtypeStruct((B, 1, 10), jnp.float32),
        grid=(B,),
        in_specs=[
            pl.BlockSpec((None, IMG, IMG), lambda b: (b, 0, 0)),      # image
            pl.BlockSpec((3, IMG, 2 * NP1), const3),                  # conv1 tap mats
            pl.BlockSpec((1, 2 * NP1), const2),                       # conv1 bias row
            pl.BlockSpec((2, PH1, OH1), const3),                      # h-pool select (26->13)
            pl.BlockSpec((3, NP1, 2 * NP2), const3),                  # conv2 tap mats
            pl.BlockSpec((1, 2 * NP2), const2),                       # conv2 bias row
            pl.BlockSpec((2, PH2, OH2), const3),                      # h-pool select (11->5)
            pl.BlockSpec((PH2, NP2, 64), const3),                     # folded conv3+fc1
            pl.BlockSpec((1, 64), const2),                            # folded bias
            pl.BlockSpec((64, 10), const2),                           # fc2 weight
            pl.BlockSpec((1, 10), const2),                            # fc2 bias
        ],
        out_specs=pl.BlockSpec((None, 1, 10), lambda b: (b, 0, 0)),
        scratch_shapes=[
            pltpu.VMEM((PH1, NP1), jnp.float32),                      # pool1
            pltpu.VMEM((PH2, NP2), jnp.float32),                      # pool2
        ],
        compiler_params=pltpu.CompilerParams(dimension_semantics=("parallel",)),
    )(x, kp["A1"], kp["b1_row"], kp["S1"], kp["A2"], kp["b2_row"], kp["S2"],
      kp["Wt"], kp["bt1"], kp["Wfc2"], kp["bfc2"])
    return out.reshape(B, 10)


# ----------------------------------------------------------------------------
# Parameters: PyTorch-style init, then one-time kernel-ready re-layout
# ----------------------------------------------------------------------------
def init_params(key):
    ks = jax.random.split(key, 10)

    def conv_init(kw_, kb_, cout, cin, k):
        bound = 1.0 / jnp.sqrt(cin * k * k)
        w = jax.random.uniform(kw_, (cout, cin, k, k), jnp.float32, -bound, bound)
        b = jax.random.uniform(kb_, (cout,), jnp.float32, -bound, bound)
        return w, b

    def fc_init(kw_, kb_, cout, cin):
        bound = 1.0 / jnp.sqrt(cin)
        w = jax.random.uniform(kw_, (cout, cin), jnp.float32, -bound, bound)
        b = jax.random.uniform(kb_, (cout,), jnp.float32, -bound, bound)
        return w, b

    p = {}
    p["conv1_w"], p["conv1_b"] = conv_init(ks[0], ks[1], 32, 1, 3)
    p["conv2_w"], p["conv2_b"] = conv_init(ks[2], ks[3], 64, 32, 3)
    p["conv3_w"], p["conv3_b"] = conv_init(ks[4], ks[5], 64, 64, 3)
    p["fc1_w"], p["fc1_b"] = fc_init(ks[6], ks[7], 64, 3 * 3 * 64)
    p["fc2_w"], p["fc2_b"] = fc_init(ks[8], ks[9], 10, 64)
    return p


def prepare_params(p):
    """One-time host-side re-layout of PyTorch-format weights into kernel matrices."""
    w1 = np.asarray(p["conv1_w"], np.float32); b1 = np.asarray(p["conv1_b"], np.float32)
    w2 = np.asarray(p["conv2_w"], np.float32); b2 = np.asarray(p["conv2_b"], np.float32)
    w3 = np.asarray(p["conv3_w"], np.float32); b3 = np.asarray(p["conv3_b"], np.float32)
    fc1w = np.asarray(p["fc1_w"], np.float32); fc1b = np.asarray(p["fc1_b"], np.float32)
    fc2w = np.asarray(p["fc2_w"], np.float32); fc2b = np.asarray(p["fc2_b"], np.float32)

    # conv1 per-tap matrices A1[ki][j, m]: j = input column, m = wp*NP1 + wq*32 + c
    # (output w = 2*wq + wp); value = w1[c, 0, ki, j - w] for 0 <= j-w <= 2.
    A1 = np.zeros((3, IMG, 2 * NP1), np.float32)
    b1_row = np.zeros((1, 2 * NP1), np.float32)
    for wp in range(2):
        for wq in range(PH1):
            w = 2 * wq + wp
            col = wp * NP1 + wq * C1
            b1_row[0, col:col + C1] = b1
            for ki in range(3):
                for kj in range(3):
                    A1[ki, w + kj, col:col + C1] = w1[:, 0, ki, kj]

    # Row-parity selection matrices for h-pooling (0/1, exact in bf16).
    S1 = np.zeros((2, PH1, OH1), np.float32)
    for i in range(PH1):
        S1[0, i, 2 * i] = 1.0
        S1[1, i, 2 * i + 1] = 1.0
    S2 = np.zeros((2, PH2, OH2), np.float32)
    for i in range(PH2):
        S2[0, i, 2 * i] = 1.0
        S2[1, i, 2 * i + 1] = 1.0

    # conv2 per-tap matrices A2[ki][j, m]: j = w1*32 + c1 (pool1 columns, pad rows 0),
    # m = wp*NP2 + wq2*64 + c2 (output w2 = 2*wq2 + wp; w2 = 10 never needed: pooled away).
    A2 = np.zeros((3, NP1, 2 * NP2), np.float32)
    b2_row = np.zeros((1, 2 * NP2), np.float32)
    for wp in range(2):
        for wq2 in range(PH2):
            wo = 2 * wq2 + wp
            col = wp * NP2 + wq2 * C2
            b2_row[0, col:col + C2] = b2
            for ki in range(3):
                for kj in range(3):
                    wi = wo + kj
                    A2[ki, wi * C1:(wi + 1) * C1, col:col + C2] = w2[:, :, ki, kj].T

    # Fold conv3 (valid 3x3 on the 5x5x64 pooled map) + PyTorch CHW flatten + fc1
    # into Wt[hi][j = wi*64 + c2, n] (exact: no nonlinearity between conv3 and fc1).
    fc1w_r = fc1w.reshape(64, C2, 3, 3)                      # (n, c3, ho, wo)
    Wt = np.zeros((PH2, NP2, 64), np.float32)
    for hi in range(PH2):
        for wi in range(PH2):
            acc = np.zeros((C2, 64), np.float32)             # (c2, n)
            for ho in range(3):
                ki = hi - ho
                if ki < 0 or ki > 2:
                    continue
                for wo in range(3):
                    kj = wi - wo
                    if kj < 0 or kj > 2:
                        continue
                    acc += np.einsum("ab,na->bn", w3[:, :, ki, kj], fc1w_r[:, :, ho, wo])
            Wt[hi, wi * C2:(wi + 1) * C2, :] = acc
    bt1 = (fc1b + np.einsum("c,ncxy->n", b3, fc1w_r)).reshape(1, 64)

    return {
        "A1": jnp.asarray(A1, GEMM_DTYPE),
        "b1_row": jnp.asarray(b1_row, jnp.float32),
        "S1": jnp.asarray(S1, GEMM_DTYPE),
        "A2": jnp.asarray(A2, GEMM_DTYPE),
        "b2_row": jnp.asarray(b2_row, jnp.float32),
        "S2": jnp.asarray(S2, GEMM_DTYPE),
        "Wt": jnp.asarray(Wt, GEMM_DTYPE),
        "bt1": jnp.asarray(bt1, jnp.float32),
        "Wfc2": jnp.asarray(fc2w.T, GEMM_DTYPE),
        "bfc2": jnp.asarray(fc2b.reshape(1, 10), jnp.float32),
    }


if __name__ == "__main__":
    key = jax.random.PRNGKey(0)
    k_params, k_x = jax.random.split(key)
    params = init_params(k_params)
    kparams = prepare_params(params)
    # Spatial size must be 28x28 so fc1's 3*3*64 input lines up (as in the module).
    x = jax.random.normal(k_x, (2, 1, 28, 28), dtype=jnp.float32)
    fwd = jax.jit(net_forward)
    out = jax.block_until_ready(fwd(kparams, x))
    assert out.shape == (2, 10), out.shape
    assert bool(jnp.all(jnp.isfinite(out))), "non-finite logits"
    print("KERNEL_OK")
</pallas_src>

<mosaic_0001>
module attributes {stable_mosaic.version = 11 : i64} {
  func.func @_net_fused_kernel(%arg0: i32, %arg1: memref<1x28x28xf32, #tpu.memory_space<vmem>>, %arg2: memref<3x28x1024xbf16, #tpu.memory_space<vmem>>, %arg3: memref<1x1024xf32, #tpu.memory_space<vmem>>, %arg4: memref<2x13x26xbf16, #tpu.memory_space<vmem>>, %arg5: memref<3x512x768xbf16, #tpu.memory_space<vmem>>, %arg6: memref<1x768xf32, #tpu.memory_space<vmem>>, %arg7: memref<2x5x11xbf16, #tpu.memory_space<vmem>>, %arg8: memref<5x384x64xbf16, #tpu.memory_space<vmem>>, %arg9: memref<1x64xf32, #tpu.memory_space<vmem>>, %arg10: memref<64x10xbf16, #tpu.memory_space<vmem>>, %arg11: memref<1x10xf32, #tpu.memory_space<vmem>>, %arg12: memref<1x1x10xf32, #tpu.memory_space<vmem>>, %arg13: memref<13x512xf32, #tpu.memory_space<vmem>>, %arg14: memref<5x384xf32, #tpu.memory_space<vmem>>) attributes {dimension_semantics = [#tpu.dimension_semantics<parallel>], iteration_bounds = array<i64: 2>, scalar_prefetch = 0 : i64, scratch_operands = 2 : i64, tpu.core_type = #tpu.core_type<tc>, window_params = [{transform_indices = @transform_0, window_bounds = array<i64: 1, 28, 28>}, {pipeline_mode = #tpu.pipeline_mode<synchronous>, transform_indices = @transform_1, window_bounds = array<i64: 3, 28, 1024>}, {pipeline_mode = #tpu.pipeline_mode<synchronous>, transform_indices = @transform_2, window_bounds = array<i64: 1, 1024>}, {pipeline_mode = #tpu.pipeline_mode<synchronous>, transform_indices = @transform_3, window_bounds = array<i64: 2, 13, 26>}, {pipeline_mode = #tpu.pipeline_mode<synchronous>, transform_indices = @transform_4, window_bounds = array<i64: 3, 512, 768>}, {pipeline_mode = #tpu.pipeline_mode<synchronous>, transform_indices = @transform_5, window_bounds = array<i64: 1, 768>}, {pipeline_mode = #tpu.pipeline_mode<synchronous>, transform_indices = @transform_6, window_bounds = array<i64: 2, 5, 11>}, {pipeline_mode = #tpu.pipeline_mode<synchronous>, transform_indices = @transform_7, window_bounds = array<i64: 5, 384, 64>}, {pipeline_mode = #tpu.pipeline_mode<synchronous>, transform_indices = @transform_8, window_bounds = array<i64: 1, 64>}, {pipeline_mode = #tpu.pipeline_mode<synchronous>, transform_indices = @transform_9, window_bounds = array<i64: 64, 10>}, {pipeline_mode = #tpu.pipeline_mode<synchronous>, transform_indices = @transform_10, window_bounds = array<i64: 1, 10>}, {transform_indices = @transform_11, window_bounds = array<i64: 1, 1, 10>}]} {
    %cst = arith.constant 0.000000e+00 : f32
    %0 = vector.broadcast %cst : f32 to vector<26x1024xf32>
    %c0 = arith.constant 0 : index
    %c0_0 = arith.constant 0 : index
    %c0_1 = arith.constant 0 : index
    %1 = vector.load %arg1[%c0, %c0_0, %c0_1] : memref<1x28x28xf32, #tpu.memory_space<vmem>>, vector<1x26x28xf32>
    %2 = vector.shape_cast %1 : vector<1x26x28xf32> to vector<26x28xf32>
    %3 = arith.truncf %2 : vector<26x28xf32> to vector<26x28xbf16>
    %c0_2 = arith.constant 0 : index
    %c0_3 = arith.constant 0 : index
    %c0_4 = arith.constant 0 : index
    %4 = vector.load %arg2[%c0_2, %c0_3, %c0_4] : memref<3x28x1024xbf16, #tpu.memory_space<vmem>>, vector<1x28x1024xbf16>
    %5 = vector.shape_cast %4 : vector<1x28x1024xbf16> to vector<28x1024xbf16>
    %cst_5 = arith.constant dense<0.000000e+00> : vector<26x1024xf32>
    %6 = tpu.matmul %3, %5, %cst_5 {dimension_numbers = #tpu.dot_dimension_numbers<[1], [0], [0], [1], [0, 0, 1, 1], [], []>} : vector<26x28xbf16>, vector<28x1024xbf16>, vector<26x1024xf32> -> vector<26x1024xf32>
    %7 = arith.addf %0, %6 : vector<26x1024xf32>
    %c0_6 = arith.constant 0 : index
    %c1 = arith.constant 1 : index
    %c0_7 = arith.constant 0 : index
    %8 = vector.load %arg1[%c0_6, %c1, %c0_7] : memref<1x28x28xf32, #tpu.memory_space<vmem>>, vector<1x26x28xf32>
    %9 = vector.shape_cast %8 : vector<1x26x28xf32> to vector<26x28xf32>
    %10 = arith.truncf %9 : vector<26x28xf32> to vector<26x28xbf16>
    %c1_8 = arith.constant 1 : index
    %c0_9 = arith.constant 0 : index
    %c0_10 = arith.constant 0 : index
    %11 = vector.load %arg2[%c1_8, %c0_9, %c0_10] : memref<3x28x1024xbf16, #tpu.memory_space<vmem>>, vector<1x28x1024xbf16>
    %12 = vector.shape_cast %11 : vector<1x28x1024xbf16> to vector<28x1024xbf16>
    %cst_11 = arith.constant dense<0.000000e+00> : vector<26x1024xf32>
    %13 = tpu.matmul %10, %12, %cst_11 {dimension_numbers = #tpu.dot_dimension_numbers<[1], [0], [0], [1], [0, 0, 1, 1], [], []>} : vector<26x28xbf16>, vector<28x1024xbf16>, vector<26x1024xf32> -> vector<26x1024xf32>
    %14 = arith.addf %7, %13 : vector<26x1024xf32>
    %c0_12 = arith.constant 0 : index
    %c2 = arith.constant 2 : index
    %c0_13 = arith.constant 0 : index
    %15 = vector.load %arg1[%c0_12, %c2, %c0_13] : memref<1x28x28xf32, #tpu.memory_space<vmem>>, vector<1x26x28xf32>
    %16 = vector.shape_cast %15 : vector<1x26x28xf32> to vector<26x28xf32>
    %17 = arith.truncf %16 : vector<26x28xf32> to vector<26x28xbf16>
    %c2_14 = arith.constant 2 : index
    %c0_15 = arith.constant 0 : index
    %c0_16 = arith.constant 0 : index
    %18 = vector.load %arg2[%c2_14, %c0_15, %c0_16] : memref<3x28x1024xbf16, #tpu.memory_space<vmem>>, vector<1x28x1024xbf16>
    %19 = vector.shape_cast %18 : vector<1x28x1024xbf16> to vector<28x1024xbf16>
    %cst_17 = arith.constant dense<0.000000e+00> : vector<26x1024xf32>
    %20 = tpu.matmul %17, %19, %cst_17 {dimension_numbers = #tpu.dot_dimension_numbers<[1], [0], [0], [1], [0, 0, 1, 1], [], []>} : vector<26x28xbf16>, vector<28x1024xbf16>, vector<26x1024xf32> -> vector<26x1024xf32>
    %21 = arith.addf %14, %20 : vector<26x1024xf32>
    %c0_18 = arith.constant 0 : index
    %c0_19 = arith.constant 0 : index
    %22 = vector.load %arg3[%c0_18, %c0_19] : memref<1x1024xf32, #tpu.memory_space<vmem>>, vector<1x1024xf32>
    %23 = vector.broadcast %22 : vector<1x1024xf32> to vector<26x1024xf32>
    %24 = arith.addf %21, %23 : vector<26x1024xf32>
    %cst_20 = arith.constant 0.000000e+00 : f32
    %25 = vector.broadcast %cst_20 : f32 to vector<26x1024xf32>
    %26 = arith.maximumf %24, %25 : vector<26x1024xf32>
    %27 = vector.extract_strided_slice %26 {offsets = [0, 0], sizes = [26, 512], strides = [1, 1]} : vector<26x1024xf32> to vector<26x512xf32>
    %28 = vector.extract_strided_slice %26 {offsets = [0, 512], sizes = [26, 512], strides = [1, 1]} : vector<26x1024xf32> to vector<26x512xf32>
    %29 = arith.maximumf %27, %28 : vector<26x512xf32>
    %30 = arith.truncf %29 : vector<26x512xf32> to vector<26x512xbf16>
    %c0_21 = arith.constant 0 : index
    %c0_22 = arith.constant 0 : index
    %c0_23 = arith.constant 0 : index
    %31 = vector.load %arg4[%c0_21, %c0_22, %c0_23] : memref<2x13x26xbf16, #tpu.memory_space<vmem>>, vector<1x13x26xbf16>
    %32 = vector.shape_cast %31 : vector<1x13x26xbf16> to vector<13x26xbf16>
    %cst_24 = arith.constant dense<0.000000e+00> : vector<13x512xf32>
    %33 = tpu.matmul %32, %30, %cst_24 {dimension_numbers = #tpu.dot_dimension_numbers<[1], [0], [0], [1], [0, 0, 1, 1], [], []>} : vector<13x26xbf16>, vector<26x512xbf16>, vector<13x512xf32> -> vector<13x512xf32>
    %c1_25 = arith.constant 1 : index
    %c0_26 = arith.constant 0 : index
    %c0_27 = arith.constant 0 : index
    %34 = vector.load %arg4[%c1_25, %c0_26, %c0_27] : memref<2x13x26xbf16, #tpu.memory_space<vmem>>, vector<1x13x26xbf16>
    %35 = vector.shape_cast %34 : vector<1x13x26xbf16> to vector<13x26xbf16>
    %cst_28 = arith.constant dense<0.000000e+00> : vector<13x512xf32>
    %36 = tpu.matmul %35, %30, %cst_28 {dimension_numbers = #tpu.dot_dimension_numbers<[1], [0], [0], [1], [0, 0, 1, 1], [], []>} : vector<13x26xbf16>, vector<26x512xbf16>, vector<13x512xf32> -> vector<13x512xf32>
    %37 = arith.maximumf %33, %36 : vector<13x512xf32>
    %c0_29 = arith.constant 0 : index
    %c0_30 = arith.constant 0 : index
    %38 = vector.load %arg13[%c0_29, %c0_30] : memref<13x512xf32, #tpu.memory_space<vmem>>, vector<13x512xf32>
    tpu.vector_store %arg13[%c0_29, %c0_30], %37 {strides = array<i32>} : memref<13x512xf32, #tpu.memory_space<vmem>>, vector<13x512xf32>,
    %cst_31 = arith.constant 0.000000e+00 : f32
    %39 = vector.broadcast %cst_31 : f32 to vector<11x768xf32>
    %c0_32 = arith.constant 0 : index
    %c0_33 = arith.constant 0 : index
    %40 = vector.load %arg13[%c0_32, %c0_33] : memref<13x512xf32, #tpu.memory_space<vmem>>, vector<11x512xf32>
    %41 = arith.truncf %40 : vector<11x512xf32> to vector<11x512xbf16>
    %c0_34 = arith.constant 0 : index
    %c0_35 = arith.constant 0 : index
    %c0_36 = arith.constant 0 : index
    %42 = vector.load %arg5[%c0_34, %c0_35, %c0_36] : memref<3x512x768xbf16, #tpu.memory_space<vmem>>, vector<1x512x768xbf16>
    %43 = vector.shape_cast %42 : vector<1x512x768xbf16> to vector<512x768xbf16>
    %cst_37 = arith.constant dense<0.000000e+00> : vector<11x768xf32>
    %44 = tpu.matmul %41, %43, %cst_37 {dimension_numbers = #tpu.dot_dimension_numbers<[1], [0], [0], [1], [0, 0, 1, 1], [], []>} : vector<11x512xbf16>, vector<512x768xbf16>, vector<11x768xf32> -> vector<11x768xf32>
    %45 = arith.addf %39, %44 : vector<11x768xf32>
    %c1_38 = arith.constant 1 : index
    %c0_39 = arith.constant 0 : index
    %46 = vector.load %arg13[%c1_38, %c0_39] : memref<13x512xf32, #tpu.memory_space<vmem>>, vector<11x512xf32>
    %47 = arith.truncf %46 : vector<11x512xf32> to vector<11x512xbf16>
    %c1_40 = arith.constant 1 : index
    %c0_41 = arith.constant 0 : index
    %c0_42 = arith.constant 0 : index
    %48 = vector.load %arg5[%c1_40, %c0_41, %c0_42] : memref<3x512x768xbf16, #tpu.memory_space<vmem>>, vector<1x512x768xbf16>
    %49 = vector.shape_cast %48 : vector<1x512x768xbf16> to vector<512x768xbf16>
    %cst_43 = arith.constant dense<0.000000e+00> : vector<11x768xf32>
    %50 = tpu.matmul %47, %49, %cst_43 {dimension_numbers = #tpu.dot_dimension_numbers<[1], [0], [0], [1], [0, 0, 1, 1], [], []>} : vector<11x512xbf16>, vector<512x768xbf16>, vector<11x768xf32> -> vector<11x768xf32>
    %51 = arith.addf %45, %50 : vector<11x768xf32>
    %c2_44 = arith.constant 2 : index
    %c0_45 = arith.constant 0 : index
    %52 = vector.load %arg13[%c2_44, %c0_45] : memref<13x512xf32, #tpu.memory_space<vmem>>, vector<11x512xf32>
    %53 = arith.truncf %52 : vector<11x512xf32> to vector<11x512xbf16>
    %c2_46 = arith.constant 2 : index
    %c0_47 = arith.constant 0 : index
    %c0_48 = arith.constant 0 : index
    %54 = vector.load %arg5[%c2_46, %c0_47, %c0_48] : memref<3x512x768xbf16, #tpu.memory_space<vmem>>, vector<1x512x768xbf16>
    %55 = vector.shape_cast %54 : vector<1x512x768xbf16> to vector<512x768xbf16>
    %cst_49 = arith.constant dense<0.000000e+00> : vector<11x768xf32>
    %56 = tpu.matmul %53, %55, %cst_49 {dimension_numbers = #tpu.dot_dimension_numbers<[1], [0], [0], [1], [0, 0, 1, 1], [], []>} : vector<11x512xbf16>, vector<512x768xbf16>, vector<11x768xf32> -> vector<11x768xf32>
    %57 = arith.addf %51, %56 : vector<11x768xf32>
    %c0_50 = arith.constant 0 : index
    %c0_51 = arith.constant 0 : index
    %58 = vector.load %arg6[%c0_50, %c0_51] : memref<1x768xf32, #tpu.memory_space<vmem>>, vector<1x768xf32>
    %59 = vector.broadcast %58 : vector<1x768xf32> to vector<11x768xf32>
    %60 = arith.addf %57, %59 : vector<11x768xf32>
    %cst_52 = arith.constant 0.000000e+00 : f32
    %61 = vector.broadcast %cst_52 : f32 to vector<11x768xf32>
    %62 = arith.maximumf %60, %61 : vector<11x768xf32>
    %63 = vector.extract_strided_slice %62 {offsets = [0, 0], sizes = [11, 384], strides = [1, 1]} : vector<11x768xf32> to vector<11x384xf32>
    %64 = vector.extract_strided_slice %62 {offsets = [0, 384], sizes = [11, 384], strides = [1, 1]} : vector<11x768xf32> to vector<11x384xf32>
    %65 = arith.maximumf %63, %64 : vector<11x384xf32>
    %66 = arith.truncf %65 : vector<11x384xf32> to vector<11x384xbf16>
    %c0_53 = arith.constant 0 : index
    %c0_54 = arith.constant 0 : index
    %c0_55 = arith.constant 0 : index
    %67 = vector.load %arg7[%c0_53, %c0_54, %c0_55] : memref<2x5x11xbf16, #tpu.memory_space<vmem>>, vector<1x5x11xbf16>
    %68 = vector.shape_cast %67 : vector<1x5x11xbf16> to vector<5x11xbf16>
    %cst_56 = arith.constant dense<0.000000e+00> : vector<5x384xf32>
    %69 = tpu.matmul %68, %66, %cst_56 {dimension_numbers = #tpu.dot_dimension_numbers<[1], [0], [0], [1], [0, 0, 1, 1], [], []>} : vector<5x11xbf16>, vector<11x384xbf16>, vector<5x384xf32> -> vector<5x384xf32>
    %c1_57 = arith.constant 1 : index
    %c0_58 = arith.constant 0 : index
    %c0_59 = arith.constant 0 : index
    %70 = vector.load %arg7[%c1_57, %c0_58, %c0_59] : memref<2x5x11xbf16, #tpu.memory_space<vmem>>, vector<1x5x11xbf16>
    %71 = vector.shape_cast %70 : vector<1x5x11xbf16> to vector<5x11xbf16>
    %cst_60 = arith.constant dense<0.000000e+00> : vector<5x384xf32>
    %72 = tpu.matmul %71, %66, %cst_60 {dimension_numbers = #tpu.dot_dimension_numbers<[1], [0], [0], [1], [0, 0, 1, 1], [], []>} : vector<5x11xbf16>, vector<11x384xbf16>, vector<5x384xf32> -> vector<5x384xf32>
    %73 = arith.maximumf %69, %72 : vector<5x384xf32>
    %c0_61 = arith.constant 0 : index
    %c0_62 = arith.constant 0 : index
    %74 = vector.load %arg14[%c0_61, %c0_62] : memref<5x384xf32, #tpu.memory_space<vmem>>, vector<5x384xf32>
    tpu.vector_store %arg14[%c0_61, %c0_62], %73 {strides = array<i32>} : memref<5x384xf32, #tpu.memory_space<vmem>>, vector<5x384xf32>,
    %c0_63 = arith.constant 0 : index
    %c0_64 = arith.constant 0 : index
    %75 = vector.load %arg9[%c0_63, %c0_64] : memref<1x64xf32, #tpu.memory_space<vmem>>, vector<1x64xf32>
    %c0_65 = arith.constant 0 : index
    %c0_66 = arith.constant 0 : index
    %76 = vector.load %arg14[%c0_65, %c0_66] : memref<5x384xf32, #tpu.memory_space<vmem>>, vector<1x384xf32>
    %77 = arith.truncf %76 : vector<1x384xf32> to vector<1x384xbf16>
    %c0_67 = arith.constant 0 : index
    %c0_68 = arith.constant 0 : index
    %c0_69 = arith.constant 0 : index
    %78 = vector.load %arg8[%c0_67, %c0_68, %c0_69] : memref<5x384x64xbf16, #tpu.memory_space<vmem>>, vector<1x384x64xbf16>
    %79 = vector.shape_cast %78 : vector<1x384x64xbf16> to vector<384x64xbf16>
    %cst_70 = arith.constant dense<0.000000e+00> : vector<1x64xf32>
    %80 = tpu.matmul %77, %79, %cst_70 {dimension_numbers = #tpu.dot_dimension_numbers<[1], [0], [0], [1], [0, 0, 1, 1], [], []>} : vector<1x384xbf16>, vector<384x64xbf16>, vector<1x64xf32> -> vector<1x64xf32>
    %81 = arith.addf %75, %80 : vector<1x64xf32>
    %c1_71 = arith.constant 1 : index
    %c0_72 = arith.constant 0 : index
    %82 = vector.load %arg14[%c1_71, %c0_72] : memref<5x384xf32, #tpu.memory_space<vmem>>, vector<1x384xf32>
    %83 = arith.truncf %82 : vector<1x384xf32> to vector<1x384xbf16>
    %c1_73 = arith.constant 1 : index
    %c0_74 = arith.constant 0 : index
    %c0_75 = arith.constant 0 : index
    %84 = vector.load %arg8[%c1_73, %c0_74, %c0_75] : memref<5x384x64xbf16, #tpu.memory_space<vmem>>, vector<1x384x64xbf16>
    %85 = vector.shape_cast %84 : vector<1x384x64xbf16> to vector<384x64xbf16>
    %cst_76 = arith.constant dense<0.000000e+00> : vector<1x64xf32>
    %86 = tpu.matmul %83, %85, %cst_76 {dimension_numbers = #tpu.dot_dimension_numbers<[1], [0], [0], [1], [0, 0, 1, 1], [], []>} : vector<1x384xbf16>, vector<384x64xbf16>, vector<1x64xf32> -> vector<1x64xf32>
    %87 = arith.addf %81, %86 : vector<1x64xf32>
    %c2_77 = arith.constant 2 : index
    %c0_78 = arith.constant 0 : index
    %88 = vector.load %arg14[%c2_77, %c0_78] : memref<5x384xf32, #tpu.memory_space<vmem>>, vector<1x384xf32>
    %89 = arith.truncf %88 : vector<1x384xf32> to vector<1x384xbf16>
    %c2_79 = arith.constant 2 : index
    %c0_80 = arith.constant 0 : index
    %c0_81 = arith.constant 0 : index
    %90 = vector.load %arg8[%c2_79, %c0_80, %c0_81] : memref<5x384x64xbf16, #tpu.memory_space<vmem>>, vector<1x384x64xbf16>
    %91 = vector.shape_cast %90 : vector<1x384x64xbf16> to vector<384x64xbf16>
    %cst_82 = arith.constant dense<0.000000e+00> : vector<1x64xf32>
    %92 = tpu.matmul %89, %91, %cst_82 {dimension_numbers = #tpu.dot_dimension_numbers<[1], [0], [0], [1], [0, 0, 1, 1], [], []>} : vector<1x384xbf16>, vector<384x64xbf16>, vector<1x64xf32> -> vector<1x64xf32>
    %93 = arith.addf %87, %92 : vector<1x64xf32>
    %c3 = arith.constant 3 : index
    %c0_83 = arith.constant 0 : index
    %94 = vector.load %arg14[%c3, %c0_83] : memref<5x384xf32, #tpu.memory_space<vmem>>, vector<1x384xf32>
    %95 = arith.truncf %94 : vector<1x384xf32> to vector<1x384xbf16>
    %c3_84 = arith.constant 3 : index
    %c0_85 = arith.constant 0 : index
    %c0_86 = arith.constant 0 : index
    %96 = vector.load %arg8[%c3_84, %c0_85, %c0_86] : memref<5x384x64xbf16, #tpu.memory_space<vmem>>, vector<1x384x64xbf16>
    %97 = vector.shape_cast %96 : vector<1x384x64xbf16> to vector<384x64xbf16>
    %cst_87 = arith.constant dense<0.000000e+00> : vector<1x64xf32>
    %98 = tpu.matmul %95, %97, %cst_87 {dimension_numbers = #tpu.dot_dimension_numbers<[1], [0], [0], [1], [0, 0, 1, 1], [], []>} : vector<1x384xbf16>, vector<384x64xbf16>, vector<1x64xf32> -> vector<1x64xf32>
    %99 = arith.addf %93, %98 : vector<1x64xf32>
    %c4 = arith.constant 4 : index
    %c0_88 = arith.constant 0 : index
    %100 = vector.load %arg14[%c4, %c0_88] : memref<5x384xf32, #tpu.memory_space<vmem>>, vector<1x384xf32>
    %101 = arith.truncf %100 : vector<1x384xf32> to vector<1x384xbf16>
    %c4_89 = arith.constant 4 : index
    %c0_90 = arith.constant 0 : index
    %c0_91 = arith.constant 0 : index
    %102 = vector.load %arg8[%c4_89, %c0_90, %c0_91] : memref<5x384x64xbf16, #tpu.memory_space<vmem>>, vector<1x384x64xbf16>
    %103 = vector.shape_cast %102 : vector<1x384x64xbf16> to vector<384x64xbf16>
    %cst_92 = arith.constant dense<0.000000e+00> : vector<1x64xf32>
    %104 = tpu.matmul %101, %103, %cst_92 {dimension_numbers = #tpu.dot_dimension_numbers<[1], [0], [0], [1], [0, 0, 1, 1], [], []>} : vector<1x384xbf16>, vector<384x64xbf16>, vector<1x64xf32> -> vector<1x64xf32>
    %105 = arith.addf %99, %104 : vector<1x64xf32>
    %cst_93 = arith.constant 0.000000e+00 : f32
    %106 = vector.broadcast %cst_93 : f32 to vector<1x64xf32>
    %107 = arith.maximumf %105, %106 : vector<1x64xf32>
    %108 = arith.truncf %107 : vector<1x64xf32> to vector<1x64xbf16>
    %c0_94 = arith.constant 0 : index
    %c0_95 = arith.constant 0 : index
    %109 = vector.load %arg10[%c0_94, %c0_95] : memref<64x10xbf16, #tpu.memory_space<vmem>>, vector<64x10xbf16>
    %cst_96 = arith.constant dense<0.000000e+00> : vector<1x10xf32>
    %110 = tpu.matmul %108, %109, %cst_96 {dimension_numbers = #tpu.dot_dimension_numbers<[1], [0], [0], [1], [0, 0, 1, 1], [], []>} : vector<1x64xbf16>, vector<64x10xbf16>, vector<1x10xf32> -> vector<1x10xf32>
    %c0_97 = arith.constant 0 : index
    %c0_98 = arith.constant 0 : index
    %111 = vector.load %arg11[%c0_97, %c0_98] : memref<1x10xf32, #tpu.memory_space<vmem>>, vector<1x10xf32>
    %112 = arith.addf %110, %111 : vector<1x10xf32>
    %c0_99 = arith.constant 0 : index
    %c0_100 = arith.constant 0 : index
    %c0_101 = arith.constant 0 : index
    %113 = vector.load %arg12[%c0_99, %c0_100, %c0_101] : memref<1x1x10xf32, #tpu.memory_space<vmem>>, vector<1x1x10xf32>
    %114 = vector.shape_cast %113 : vector<1x1x10xf32> to vector<1x10xf32>
    %115 = vector.shape_cast %112 : vector<1x10xf32> to vector<1x1x10xf32>
    tpu.vector_store %arg12[%c0_99, %c0_100, %c0_101], %115 {strides = array<i32>} : memref<1x1x10xf32, #tpu.memory_space<vmem>>, vector<1x1x10xf32>,
    return
  }
  func.func @transform_0(%arg0: i32) -> (i32, i32, i32) {
    %c0_i32 = arith.constant 0 : i32
    %c0_i32_0 = arith.constant 0 : i32
    %c0_i32_1 = arith.constant 0 : i32
    return %arg0, %c0_i32, %c0_i32_0 : i32, i32, i32
  }
  func.func @transform_1(%arg0: i32) -> (i32, i32, i32) {
    %c0_i32 = arith.constant 0 : i32
    %c0_i32_0 = arith.constant 0 : i32
    %c0_i32_1 = arith.constant 0 : i32
    %c0_i32_2 = arith.constant 0 : i32
    return %c0_i32, %c0_i32_0, %c0_i32_1 : i32, i32, i32
  }
  func.func @transform_2(%arg0: i32) -> (i32, i32) {
    %c0_i32 = arith.constant 0 : i32
    %c0_i32_0 = arith.constant 0 : i32
    %c0_i32_1 = arith.constant 0 : i32
    return %c0_i32, %c0_i32_0 : i32, i32
  }
  func.func @transform_3(%arg0: i32) -> (i32, i32, i32) {
    %c0_i32 = arith.constant 0 : i32
    %c0_i32_0 = arith.constant 0 : i32
    %c0_i32_1 = arith.constant 0 : i32
    %c0_i32_2 = arith.constant 0 : i32
    return %c0_i32, %c0_i32_0, %c0_i32_1 : i32, i32, i32
  }
  func.func @transform_4(%arg0: i32) -> (i32, i32, i32) {
    %c0_i32 = arith.constant 0 : i32
    %c0_i32_0 = arith.constant 0 : i32
    %c0_i32_1 = arith.constant 0 : i32
    %c0_i32_2 = arith.constant 0 : i32
    return %c0_i32, %c0_i32_0, %c0_i32_1 : i32, i32, i32
  }
  func.func @transform_5(%arg0: i32) -> (i32, i32) {
    %c0_i32 = arith.constant 0 : i32
    %c0_i32_0 = arith.constant 0 : i32
    %c0_i32_1 = arith.constant 0 : i32
    return %c0_i32, %c0_i32_0 : i32, i32
  }
  func.func @transform_6(%arg0: i32) -> (i32, i32, i32) {
    %c0_i32 = arith.constant 0 : i32
    %c0_i32_0 = arith.constant 0 : i32
    %c0_i32_1 = arith.constant 0 : i32
    %c0_i32_2 = arith.constant 0 : i32
    return %c0_i32, %c0_i32_0, %c0_i32_1 : i32, i32, i32
  }
  func.func @transform_7(%arg0: i32) -> (i32, i32, i32) {
    %c0_i32 = arith.constant 0 : i32
    %c0_i32_0 = arith.constant 0 : i32
    %c0_i32_1 = arith.constant 0 : i32
    %c0_i32_2 = arith.constant 0 : i32
    return %c0_i32, %c0_i32_0, %c0_i32_1 : i32, i32, i32
  }
  func.func @transform_8(%arg0: i32) -> (i32, i32) {
    %c0_i32 = arith.constant 0 : i32
    %c0_i32_0 = arith.constant 0 : i32
    %c0_i32_1 = arith.constant 0 : i32
    return %c0_i32, %c0_i32_0 : i32, i32
  }
  func.func @transform_9(%arg0: i32) -> (i32, i32) {
    %c0_i32 = arith.constant 0 : i32
    %c0_i32_0 = arith.constant 0 : i32
    %c0_i32_1 = arith.constant 0 : i32
    return %c0_i32, %c0_i32_0 : i32, i32
  }
  func.func @transform_10(%arg0: i32) -> (i32, i32) {
    %c0_i32 = arith.constant 0 : i32
    %c0_i32_0 = arith.constant 0 : i32
    %c0_i32_1 = arith.constant 0 : i32
    return %c0_i32, %c0_i32_0 : i32, i32
  }
  func.func @transform_11(%arg0: i32) -> (i32, i32, i32) {
    %c0_i32 = arith.constant 0 : i32
    %c0_i32_0 = arith.constant 0 : i32
    %c0_i32_1 = arith.constant 0 : i32
    return %arg0, %c0_i32, %c0_i32_0 : i32, i32, i32
  }
}

</mosaic_0001>

<bundles_post_ra>
// kernel: net_forward.1
= control target key start
LH: loop header
LB: loop body
LE: loop exit
PB: predicated region body
PF: predicated region fallthrough
CT: control target
= control target key end

     0   :  { %s11984_s0 = inlined_call_operand.vmem [shape: f32[2,28,28], index: 0, kind: input, shape index: {}]   ;;  %s11985_s1 = inlined_call_operand.hbm [shape: bf16[3,28,1024], index: 1, kind: input, shape index: {}]   ;;  %s11986_s2 = inlined_call_operand.hbm [shape: f32[1,1024], index: 2, kind: input, shape index: {}]   ;;  %s11987_s3 = inlined_call_operand.vmem [shape: bf16[2,13,26], index: 3, kind: input, shape index: {}]   ;;  %s11988_s4 = inlined_call_operand.hbm [shape: bf16[3,512,768], index: 4, kind: input, shape index: {}]   ;;  %s11989_s5 = inlined_call_operand.hbm [shape: f32[1,768], index: 5, kind: input, shape index: {}]   ;;  %s11990_s6 = inlined_call_operand.vmem [shape: bf16[2,5,11], index: 6, kind: input, shape index: {}]   ;;  %s11991_s7 = inlined_call_operand.vmem [shape: bf16[5,384,64], index: 7, kind: input, shape index: {}]   ;;  %s11992_s8 = inlined_call_operand.hbm [shape: f32[1,64], index: 8, kind: input, shape index: {}]   ;;  %s11993_s9 = inlined_call_operand.vmem [shape: bf16[64,10], index: 9, kind: input, shape index: {}]   ;;  %s11994_s10 = inlined_call_operand.hbm [shape: f32[1,10], index: 10, kind: input, shape index: {}]   ;;  %s11995_s11 = inlined_call_operand.hbm [shape: f32[2,1,10], index: 11, kind: output, shape index: {}]  }
   0x1   :  { %12016 = sst [smem:[#allocation48_spill]] %s11985_s1 }
   0x2   :  { %12017 = sst [smem:[#allocation49_spill]] %s11986_s2 }
   0x3   :  { %12018 = sst [smem:[#allocation50_spill]] %s11989_s5 }
   0x4   :  { %16 = vsyncpa [#allocation5], 0 }
   0x5   :  { %17 = vsyncpa [#allocation8], 0 }
   0x6   :  { %18 = vsyncpa [#allocation11], 0 }
   0x7   :  { %19 = vsyncpa [#allocation14], 0 }
   0x8   :  { %20 = vsyncpa [#allocation6], 0 }
   0x9   :  { %22 = vsyncpa [#allocation6 + $0x1], 0  ;;  %s10838_s17 = smov 0   ;;  %s10840_s18 = smov 0  }
   0xa   :  { %s10842_s19 = smov 0   ;;  %s10844_s20 = smov 0  }
   0xb LB: > { %s10859_s21 = sadd.s32 4294967295, %s10761_s20   ;;  %s8123_s22 = sadd.s32 4294967294, %s10761_s20   ;;  %s10761_s20 = sphi %s10844_s20, %s12114_s20   ;;  %s10757_s19 = sphi %s10842_s19, %s12113_s19   ;;  %s10753_s18 = sphi %s10840_s18, %s12112_s18   ;;  %s10749_s17 = sphi %s10838_s17, %s12111_s17  }
   0xc   : > { %s10863_s23 = sadd.s32 1, %s10761_s20   ;;  %s271_s24 = sadd.s32 1, %s10757_s19 }
   0xd   : > { %s268_s25 = ssub.s32 %s10761_s20, %s10863_s23  ;;  %p281_p0 = scmp.ne.s32.totalorder %s10757_s19, %s10753_s18 }
   0xe   : > { %p269_p1 = scmp.eq.s32.totalorder %s268_s25, 0  ;;  %p282_p2 = scmp.eq.s32.totalorder %s10859_s21, 1 }
   0xf   : > { %p287_p3 = scmp.ne.s32.totalorder %s10753_s18, %s10749_s17  ;;  %p288_p4 = scmp.eq.s32.totalorder %s8123_s22, 1 }
  0x10   : > { %s10874_s26 = scalar_select %p269_p1, %s10757_s19, %s271_s24  }
  0x11   : > { %p10876_p5 = por %p282_p2, %p281_p0  ;;  %p10880_p6 = por %p288_p4, %p287_p3 }
  0x12   : > { %12019 = sst [smem:[#allocation21_spill]] %s10874_s26  ;;  %p8124_p7 = scmp.ge.s32.totalorder %s10761_s20, 1 }
  0x13   : > { %s12020_s27 = scalar_select %p10876_p5, 1, 0 }
  0x14   : > { %s12021_s28 = scalar_select %p10880_p6, 1, 0 }
  0x15   : > { %p295_p8 = scmp.lt.s32.totalorder %s10761_s20, 3  ;;  %p11996_p9 = scmp.eq.s32.totalorder %s10859_s21, 0 }
  0x16   : > { %s10763_s30 = smov [#allocation7]   ;;  %s10764_s13 = smov [#allocation10]  }
  0x17   : > { %p10887_p10 = pnand %p8124_p7, %p295_p8  ;;  %s321_s12 = sshll.u32 %s10763_s30, 4  ;;  %s322_s12 = int_to_ptr.vmem [resolvable:$true] %s321_s12 }
  0x18   : > { %s348_s14 = sshll.u32 %s10764_s13, 4  ;;  %s10765_s16 = smov [#allocation4]   ;;  %s349_s14 = int_to_ptr.vmem [resolvable:$true] %s348_s14 }
  0x19   : > { %s12022_s29 = scalar_select %p10887_p10, 1, 0 }
  0x1a   : > { %p9457_p11 = pneg %p10887_p10  ;;  %s307_s22 = sshll.u32 %s10765_s16, 4  ;;  %s10899_s22 = int_to_ptr.vmem [resolvable:$true] %s307_s22 }
  0x1b   : > { %s10540_s25 = scalar_lea.vmem %s322_s12, 128  ;;  %p10548_p3 = scmp.lt.s32.totalorder %s322_s12, %s322_s12 }
  0x1c   : > { %p10895_p12 = pnand %p11996_p9, %p9457_p11  ;;  %p10541_p0 = scmp.ne.s32.totalorder %s322_s12, %s10540_s25 }
  0x1d   : > { %p10549_p4 = scmp.lt.s32.totalorder %s10540_s25, %s10540_s25 }
  0x1e   : > { %p10903_p13 = pneg %p10895_p12 }
  0x1f   : > { %p10550_p7 = por %p10549_p4, %p10548_p3 }
  0x20   : > { %p10543_p1 = pnand %p10541_p0, %p10903_p13 }
  0x22   : > { %p10544_p2 = pneg %p10543_p1 }
  0x24   : > { %p10551_p8 = pnand %p10550_p7, %p10544_p2 }
  0x26   : > { %10554 = shalt.err (!%p10551_p8)
}
  0x27   : > { %s12025_s2 = sld [smem:[#allocation49_spill]]  ;;  %s10566_s16 = scalar_lea.vmem %s349_s14, 96 }
  0x28   : > { %p10567_p11 = scmp.ne.s32.totalorder %s349_s14, %s10566_s16  ;;  %p10574_p5 = scmp.lt.s32.totalorder %s349_s14, %s349_s14 }
  0x29   : > { %p10575_p0 = scmp.lt.s32.totalorder %s10566_s16, %s10566_s16 }
  0x2a   : > { %p10569_p9 = pnand %p10567_p11, %p10903_p13 }
  0x2b   : > { %p10576_p1 = por %p10575_p0, %p10574_p5 }
  0x2c   : > { %p10570_p6 = pneg %p10569_p9 }
  0x2d   : > { %9463 = dma.hbm_to_vmem [thread:$0]  (!%p10895_p12), %s12025_s2, 128, %s322_s12, [#allocation8]  }
  0x2e   : > { %p10577_p10 = pnand %p10576_p1, %p10570_p6 }
  0x30   : > { %10580 = shalt.err (!%p10577_p10)
}
  0x31   : > { %s12026_s5 = sld [smem:[#allocation50_spill]]  ;;  %s10592_s12 = scalar_lea.vmem %s10899_s22, 6144 }
  0x32   : > { %p10593_p2 = scmp.ne.s32.totalorder %s10899_s22, %s10592_s12  ;;  %p10600_p4 = scmp.lt.s32.totalorder %s10899_s22, %s10899_s22 }
  0x33   : > { %p10601_p5 = scmp.lt.s32.totalorder %s10592_s12, %s10592_s12 }
  0x34   : > { %p10595_p3 = pnand %p10593_p2, %p10903_p13 }
  0x35   : > { %p10602_p6 = por %p10601_p5, %p10600_p4 }
  0x36   : > { %p10596_p9 = pneg %p10595_p3 }
  0x37   : > { %9469 = dma.hbm_to_vmem [thread:$0]  (!%p10895_p12), %s12026_s5, 96, %s349_s14, [#allocation11]  }
  0x38   : > { %p10603_p10 = pnand %p10602_p6, %p10596_p9 }
  0x3a   : > { %10606 = shalt.err (!%p10603_p10)
}
  0x3b   : > { %s10766_s30 = smov 512   ;;  %s10767_s26 = smov 32  }
  0x3c   : > { %s12027_s1 = sld [smem:[#allocation48_spill]]  ;;  %s10768_s14 = smov [#allocation9]  }
  0x3d   : > { %s334_s25 = sshll.u32 %s10768_s14, 4  ;;  %s335_s25 = int_to_ptr.vmem [resolvable:$true] %s334_s25 }
  0x3e   : > { %s10618_s2 = scalar_lea.vmem %s335_s25, 73728  ;;  %p10626_p0 = scmp.lt.s32.totalorder %s335_s25, %s335_s25 }
  0x3f   : > { %p10619_p7 = scmp.ne.s32.totalorder %s335_s25, %s10618_s2  ;;  %p10627_p1 = scmp.lt.s32.totalorder %s10618_s2, %s10618_s2 }
  0x41   : > { %p10621_p8 = pnand %p10619_p7, %p10903_p13  ;;  %p10628_p2 = por %p10627_p1, %p10626_p0 }
  0x42   : > { %9460 = dma.hbm_to_vmem [thread:$0]  (!%p10895_p12), %s12027_s1, 6144, %s10899_s22, [#allocation5], %s10766_s30, %s10766_s30, %s10767_s26  }
  0x43   : > { %p10622_p11 = pneg %p10621_p8 }
  0x45   : > { %p10629_p3 = pnand %p10628_p2, %p10622_p11 }
  0x47   : > { %10632 = shalt.err (!%p10629_p3)
}
  0x48   : > { %s10769_s12 = smov 384   ;;  %s10770_s5 = smov 24  }
  0x49   : > { %9466 = dma.hbm_to_vmem [thread:$0]  (!%p10895_p12), %s11988_s4, 73728, %s335_s25, [#allocation8], %s10769_s12, %s10769_s12, %s10770_s5  }
  0x4a   : > { %s10771_s30 = smov [#allocation12]   ;;  %s10772_s16 = smov [#allocation13]  }
  0x4b   : > { %s365_s26 = sshll.u32 %s10771_s30, 4  ;;  %s379_s14 = sshll.u32 %s10772_s16, 4  ;;  %s366_s26 = int_to_ptr.vmem [resolvable:$true] %s365_s26  ;;  %s380_s14 = int_to_ptr.vmem [resolvable:$true] %s379_s14 }
  0x4c   : > { %s10644_s1 = scalar_lea.vmem %s366_s26, 16  ;;  %s10651_s2 = scalar_lea.vmem %s366_s26, 32 }
  0x4d   : > { %p10645_p9 = scmp.ne.s32.totalorder %s366_s26, %s10644_s1  ;;  %p10652_p6 = scmp.lt.s32.totalorder %s366_s26, %s366_s26 }
  0x4e   : > { %p10653_p10 = scmp.lt.s32.totalorder %s10651_s2, %s10644_s1 }
  0x4f   : > { %p10647_p4 = pnand %p10645_p9, %p10903_p13 }
  0x50   : > { %p10654_p7 = por %p10653_p10, %p10652_p6 }
  0x51   : > { %p10648_p5 = pneg %p10647_p4 }
  0x53   : > { %p10655_p8 = pnand %p10654_p7, %p10648_p5 }
  0x55   : > { %10658 = shalt.err (!%p10655_p8)
}
  0x56   : > { %9472 = dma.hbm_to_vmem [thread:$0]  (!%p10895_p12), %s11992_s8, 16, %s366_s26, [#allocation11]  }
  0x57   : > { %s10670_s12 = scalar_lea.vmem %s380_s14, 16  ;;  %s10677_s13 = scalar_lea.vmem %s380_s14, 32 }
  0x58   : > { %p10671_p11 = scmp.ne.s32.totalorder %s380_s14, %s10670_s12  ;;  %p10678_p2 = scmp.lt.s32.totalorder %s380_s14, %s380_s14 }
  0x59   : > { %p10679_p3 = scmp.lt.s32.totalorder %s10677_s13, %s10670_s12 }
  0x5a   : > { %p10673_p0 = pnand %p10671_p11, %p10903_p13 }
  0x5b   : > { %p10680_p9 = por %p10679_p3, %p10678_p2 }
  0x5c   : > { %p10674_p1 = pneg %p10673_p0 }
  0x5e   : > { %p10681_p4 = pnand %p10680_p9, %p10674_p1 }
  0x60   : > { %10684 = shalt.err (!%p10681_p4)
}
  0x61   : > { %9475 = dma.hbm_to_vmem [thread:$0]  (!%p10895_p12), %s11994_s10, 16, %s380_s14, [#allocation14]  }
  0x62   : > { %p12028_p5 = scmp.ne.s32.totalorder %s12022_s29, 0 }
  0x64   : > { %400 = sbr.rel (%p12028_p5) target bundleno = 2155 (0x86b), region = 64 }
  0x69   : > { %p12029_p6 = scmp.eq.s32.totalorder %s10859_s21, 0 }
  0x6b   : > { %10728 = dma.done.wait (%p12029_p6), [#allocation5], 6144   ;;  %p12030_p13 = pmov %p12029_p6 }
  0x6c   : > { %p12031_p10 = pmov %p12029_p6 }
  0x6d   : > { %10730 = vsyncadd (%p12030_p13), [#allocation5], 4294961152 }
  0x6e   : > { %10732 = dma.done.wait (%p12031_p10), [#allocation8], 73856   ;;  %p12032_p7 = pmov %p12029_p6 }
  0x6f   : > { %p12033_p8 = pmov %p12029_p6 }
  0x70   : > { %10734 = vsyncadd (%p12032_p7), [#allocation8], 4294893440 }
  0x71   : > { %10736 = dma.done.wait (%p12033_p8), [#allocation11], 112   ;;  %p12034_p12 = pmov %p12029_p6 }
  0x72   : > { %p12035_p11 = pmov %p12029_p6 }
  0x73   : > { %10738 = vsyncadd (%p12034_p12), [#allocation11], 4294967184 }
  0x74   : > { %10740 = dma.done.wait (%p12035_p11), [#allocation14], 16   ;;  %p12036_p0 = pmov %p12029_p6 }
  0x75   : > { %p459_p1 = scmp.lt.s32.totalorder %s10859_s21, 1  ;;  %v11999_v0 = vmov 0   ;;  %v502_v1 = vld [vmem:[#allocation4 + $0xc0] sm:$0xff]  ;;  %vm589_vm0 = vcmask 1045504   ;;  %v503_v9 = vld [vmem:[#allocation4 + $0xc8] sm:$0xff]  ;;  %v504_v12 = vld [vmem:[#allocation4 + $0xd0] sm:$0xff] }
  0x76   : > { %10742 = vsyncadd (%p12036_p0), [#allocation14], 4294967280  ;;  %646 = vmatprep.mubr.bf16.mxu0 %v11999_v0  ;;  %656 = vmatprep.mubr.bf16.mxu1 %v11999_v0  ;;  %v506_v2 = vld [vmem:[#allocation4 + $0xe0] sm:$0x33]  ;;  %v507_v11 = vld [vmem:[#allocation4 + $0xe8] sm:$0x33] }
  0x77   : > { %s460_s29 = scalar_select %p459_p1, %s10859_s21, 1  ;;  %v494_v3 = vld [vmem:[#allocation4 + $0x80] sm:$0xff]  ;;  %v8150_v4 = vcombine.high %v502_v1, %v506_v2  ;;  %v8149_v5 = vcombine.low %v502_v1, %v506_v2  ;;  %v508_v13 = vld [vmem:[#allocation4 + $0xf0] sm:$0x33]  ;;  %v8152_v18 = vcombine.high %v503_v9, %v507_v11  ;;  %v8151_v20 = vcombine.low %v503_v9, %v507_v11  ;;  %v495_v22 = vld [vmem:[#allocation4 + $0x88] sm:$0xff] }
  0x78   : > { %v498_v6 = vld [vmem:[#allocation4 + $0xa0] sm:$0xff]  ;;  %v8154_v19 = vcombine.high %v504_v12, %v508_v13  ;;  %v8153_v21 = vcombine.low %v504_v12, %v508_v13  ;;  %v499_v23 = vld [vmem:[#allocation4 + $0xa8] sm:$0xff]  ;;  %v496_v24 = vld [vmem:[#allocation4 + $0x90] sm:$0xff]  ;;  %vm582_vm1 = vcmask 228352   ;;  %vm1650_vm2 = vcmask 1044480   ;;  %s457_s25 = sand.u32 1, %s10753_s18  }
  0x79   : > { %s9138_s15 = sshll.u32 %s460_s29, 5  ;;  %v8142_v7 = vcombine.high %v494_v3, %v498_v6  ;;  %8157 = vmatprep.subr.msk.bf16.mxu0 %vm589_vm0, %v8150_v4  ;;  %9427 = vmatprep.subr.msk.bf16.mxu1 %vm589_vm0, %v8150_v4  ;;  %v591_v10 = vsel %vm589_vm0, %v8149_v5, 0  ;;  %v8141_v14 = vcombine.low %v494_v3, %v498_v6  ;;  %v500_v25 = vld [vmem:[#allocation4 + $0xb0] sm:$0xff]  ;;  %v597_v28 = vsel %vm589_vm0, %v8151_v20, 0  ;;  %v505_v32 = vld [vmem:[#allocation4 + $0xd8] sm:$0xff]  ;;  %v479_v34 = vld [vmem:[#allocation4 + $0x40] sm:$0xff] }
  0x7a   : > { %s10979_s26 = scalar_lea.vmem %s11984_s0, %s9138_s15  ;;  %627 = vmatpush1.bf16.msra.mxu0 %v591_v10  ;;  %9429 = vmatpush1.bf16.msra.mxu1 %v591_v10  ;;  %v603_v29 = vsel %vm589_vm0, %v8153_v21, 0  ;;  %v8144_v30 = vcombine.high %v495_v22, %v499_v23  ;;  %v8146_v31 = vcombine.high %v496_v24, %v500_v25  ;;  %v509_v33 = vld [vmem:[#allocation4 + $0xf8] sm:$0x33]  ;;  %v483_v35 = vld [vmem:[#allocation4 + $0x60] sm:$0x33]  ;;  %v8143_v36 = vcombine.low %v495_v22, %v499_v23  ;;  %v480_v50 = vld [vmem:[#allocation4 + $0x48] sm:$0xff] }
  0x7b   : > { %v487_v8 = vld [vmem:[%s10979_s26 + $0x1] sm:$0xff]  ;;  %v488_v15 = vld [vmem:[%s10979_s26 + $0x9] sm:$0xff]  ;;  %v489_v16 = vld [vmem:[%s10979_s26 + $0x11] sm:$0xff]  ;;  %628 = vmatprep.subr.bf16.mxu0 %v8142_v7  ;;  %9428 = vmatprep.subr.bf16.mxu1 %v8142_v7  ;;  %v8145_v37 = vcombine.low %v496_v24, %v500_v25  ;;  %v8156_v38 = vcombine.high %v505_v32, %v509_v33  ;;  %v8178_v39 = vcombine.high %v479_v34, %v483_v35  ;;  %vm1646_vm3 = vcmask 211968   ;;  %s9135_s12 = sshll.u32 %s10859_s21, 4  ;;  %s458_s13 = scalar_lea.vmem [#allocation15], %s457_s25 }
  0x7c   : > { %v490_v17 = vld [vmem:[%s10979_s26 + $0x19] sm:$0x3]  ;;  %v10988_v26 = vpack.c.bf16 %v488_v15, %v487_v8  ;;  %v8155_v40 = vcombine.low %v505_v32, %v509_v33  ;;  %v8177_v41 = vcombine.low %v479_v34, %v483_v35  ;;  %v497_v42 = vld [vmem:[#allocation4 + $0x98] sm:$0xff]  ;;  %v484_v51 = vld [vmem:[#allocation4 + $0x68] sm:$0x33]  ;;  %vm10775_vm4 = vmmov 0   ;;  %s11943_s15 = scalar_lea.hbm %s11995_s11, %s9135_s12 }
  0x7d   : > { %v10990_v27 = vpack.c.bf16 %v490_v17, %v489_v16  ;;  %v501_v43 = vld [vmem:[#allocation4 + $0xb8] sm:$0xff]  ;;  %v471_v44 = vld [vmem:[#allocation4] sm:$0xff]  ;;  %v481_v52 = vld [vmem:[#allocation4 + $0x50] sm:$0xff]  ;;  %v8180_v56 = vcombine.high %v480_v50, %v484_v51  ;;  %v8179_v1 = vcombine.low %v480_v50, %v484_v51  ;;  %vm6252_vm5 = vcmask 89088   ;;  %s8008_s1 = sshll.u32 %s458_s13, 4  ;;  %s7996_s24 = scalar_lea.sflag [#allocation6], %s457_s25  ;;  %s11945_s1 = int_to_ptr.vmem [resolvable:$true] %s8008_s1 }
  0x7e   : > { %629 = vmatpush1.bf16.msra.mxu0 %v8141_v14  ;;  %9430 = vmatpush1.bf16.msra.mxu1 %v8141_v14  ;;  %v475_v45 = vld [vmem:[#allocation4 + $0x20] sm:$0xff]  ;;  %v609_v46 = vsel %vm589_vm0, %v8155_v40, 0  ;;  %v905_v47 = vsel %vm589_vm0, %v8177_v41, 0  ;;  %v8148_v48 = vcombine.high %v497_v42, %v501_v43  ;;  %v485_v53 = vld [vmem:[#allocation4 + $0x70] sm:$0x33]  ;;  %v8147_v54 = vcombine.low %v497_v42, %v501_v43  ;;  %v465_v58 = vld [vmem:[%s10979_s26] sm:$0xff] }
  0x7f   : > { %8160 = vmatprep.subr.msk.bf16.mxu1 %vm589_vm0, %v8152_v18  ;;  %8163 = vmatprep.subr.msk.bf16.mxu0 %vm589_vm0, %v8154_v19  ;;  %v8170_v49 = vcombine.high %v471_v44, %v475_v45  ;;  %v8169_v55 = vcombine.low %v471_v44, %v475_v45  ;;  %v8182_v57 = vcombine.high %v481_v52, %v485_v53  ;;  %v466_v59 = vld [vmem:[%s10979_s26 + $0x8] sm:$0xff]  ;;  %v472_v60 = vld [vmem:[#allocation4 + $0x8] sm:$0xff]  ;;  %v482_v4 = vld [vmem:[#allocation4 + $0x58] sm:$0xff]  ;;  %v911_v10 = vsel %vm589_vm0, %v8179_v1, 0  ;;  %s10685_s21 = scalar_lea.vmem %s11945_s1, 16  ;;  %p12108_p3 = scmp.ne.s32.totalorder %s12020_s27, 0 }
  0x80   : > { %v476_v61 = vld [vmem:[#allocation4 + $0x28] sm:$0xff]  ;;  %v473_v62 = vld [vmem:[#allocation4 + $0x10] sm:$0xff]  ;;  %v8181_v2 = vcombine.low %v481_v52, %v485_v53  ;;  %v11022_v3 = vpack.c.bf16 %v466_v59, %v465_v58  ;;  %v486_v5 = vld [vmem:[#allocation4 + $0x78] sm:$0x33]  ;;  %vm7949_vm6 = vcmask 523264   ;;  %vm7993_vm7 = vcmask 73728   ;;  %p10686_p2 = scmp.ne.s32.totalorder %s11945_s1, %s10685_s21 }
  0x81   : > { %8158 = vmatmul.mubr.msk.bf16.vlgmr.msra.gmra.mxu0 %vm582_vm1, %v10988_v26  ;;  %8159 = vmatmul.mubr.msk.bf16.vlgmr.msra.gmra.mxu1 %vm582_vm1, %v10990_v27  ;;  %v477_v63 = vld [vmem:[#allocation4 + $0x30] sm:$0xff]  ;;  %v1155_v6 = vld [vmem:[#allocation4 + $0x140] sm:$0xff]  ;;  %v467_v8 = vld [vmem:[%s10979_s26 + $0x10] sm:$0xff]  ;;  %v8172_v12 = vcombine.high %v472_v60, %v476_v61  ;;  %v8171_v14 = vcombine.low %v472_v60, %v476_v61  ;;  %v8184_v16 = vcombine.high %v482_v4, %v486_v5  ;;  %s10777_s30 = smov [#allocation15]  }
  0x82   : > { %680 = vmatpush1.bf16.msra.mxu1 %v597_v28  ;;  %733 = vmatpush1.bf16.msra.mxu0 %v603_v29  ;;  %v1159_v7 = vld [vmem:[#allocation4 + $0x160] sm:$0x33]  ;;  %v917_v11 = vsel %vm589_vm0, %v8181_v2, 0  ;;  %v8174_v13 = vcombine.high %v473_v62, %v477_v63  ;;  %v8173_v15 = vcombine.low %v473_v62, %v477_v63  ;;  %v474_v19 = vld [vmem:[#allocation4 + $0x18] sm:$0xff]  ;;  %v8183_v23 = vcombine.low %v482_v4, %v486_v5  ;;  %v1156_v25 = vld [vmem:[#allocation4 + $0x148] sm:$0xff]  ;;  %p10687_p9 = pnand %p10686_p2, %p12108_p3 }
  0x83   : > { %681 = vmatprep.subr.bf16.mxu1 %v8144_v30  ;;  %734 = vmatprep.subr.bf16.mxu0 %v8146_v31  ;;  %v468_v9 = vld [vmem:[%s10979_s26 + $0x18] sm:$0x3]  ;;  %v8206_v17 = vcombine.high %v1155_v6, %v1159_v7  ;;  %v478_v20 = vld [vmem:[#allocation4 + $0x38] sm:$0xff]  ;;  %v8205_v24 = vcombine.low %v1155_v6, %v1159_v7  ;;  %v1157_v28 = vld [vmem:[#allocation4 + $0x150] sm:$0xff] }
  0x84   : > { %699 = vmatprep.mubr.bf16.mxu1 %v11999_v0  ;;  %752 = vmatprep.mubr.bf16.mxu0 %v11999_v0  ;;  %v11034_v18 = vpack.c.bf16 %v468_v9, %v467_v8  ;;  %v1147_v21 = vld [vmem:[#allocation4 + $0x100] sm:$0xff]  ;;  %v1161_v29 = vld [vmem:[#allocation4 + $0x170] sm:$0x33]  ;;  %v923_v30 = vsel %vm589_vm0, %v8183_v23, 0  ;;  %v8176_v31 = vcombine.high %v474_v19, %v478_v20  ;;  %v8175_v33 = vcombine.low %v474_v19, %v478_v20  ;;  %v1152_v40 = vld [vmem:[#allocation4 + $0x128] sm:$0xff]  ;;  %p10688_p4 = pneg %p10687_p9 }
  0x85   : > { %v1151_v22 = vld [vmem:[#allocation4 + $0x120] sm:$0xff]  ;;  %v1149_v41 = vld [vmem:[#allocation4 + $0x110] sm:$0xff]  ;;  %v8209_v44 = vcombine.low %v1157_v28, %v1161_v29  ;;  %v1150_v58 = vld [vmem:[#allocation4 + $0x118] sm:$0xff] }
  0x86   : > { %682 = vmatpush1.bf16.msra.mxu1 %v8143_v36  ;;  %735 = vmatpush1.bf16.msra.mxu0 %v8145_v37  ;;  %v8198_v32 = vcombine.high %v1147_v21, %v1151_v22  ;;  %v8197_v34 = vcombine.low %v1147_v21, %v1151_v22  ;;  %v8210_v36 = vcombine.high %v1157_v28, %v1161_v29  ;;  %v1140_v37 = vld [vmem:[%s10979_s26 + $0x2] sm:$0xff]  ;;  %v1154_v59 = vld [vmem:[#allocation4 + $0x138] sm:$0xff] }
  0x87   : > { %8166 = vmatprep.subr.msk.bf16.mxu1 %vm589_vm0, %v8156_v38  ;;  %8185 = vmatprep.subr.msk.bf16.mxu0 %vm589_vm0, %v8178_v39  ;;  %v1141_v38 = vld [vmem:[%s10979_s26 + $0xa] sm:$0xff]  ;;  %v1148_v39 = vld [vmem:[#allocation4 + $0x108] sm:$0xff]  ;;  %v1254_v51 = vsel %vm589_vm0, %v8209_v44, 0  ;;  %v8204_v62 = vcombine.high %v1150_v58, %v1154_v59  ;;  %v8203_v63 = vcombine.low %v1150_v58, %v1154_v59 }
  0x88   : > { %v1153_v42 = vld [vmem:[#allocation4 + $0x130] sm:$0xff]  ;;  %v1144_v45 = vpack.c.bf16 %v1141_v38, %v1140_v37  ;;  %v8200_v52 = vcombine.high %v1148_v39, %v1152_v40 }
  0x89   : > { %8161 = vmatmul.mubr.msk.bf16.vlgmr.msra.gmra.mxu1 %vm582_vm1, %v10988_v26  ;;  %8164 = vmatmul.mubr.msk.bf16.vlgmr.msra.gmra.mxu0 %vm582_vm1, %v10988_v26  ;;  %v8202_v53 = vcombine.high %v1149_v41, %v1153_v42 }
  0x8a   : > { %709 = vmatprep.mubr.bf16.mxu1 %v11999_v0  ;;  %762 = vmatprep.mubr.bf16.mxu0 %v11999_v0 }
  0x8b   : > { %786 = vmatpush1.bf16.msra.mxu1 %v609_v46  ;;  %941 = vmatpush1.bf16.msra.mxu0 %v905_v47  ;;  %v1158_v46 = vld [vmem:[#allocation4 + $0x158] sm:$0xff] }
  0x8c   : > { %787 = vmatprep.subr.bf16.mxu1 %v8148_v48  ;;  %942 = vmatprep.subr.bf16.mxu0 %v8170_v49  ;;  %v1162_v47 = vld [vmem:[#allocation4 + $0x178] sm:$0x33]  ;;  %v1143_v49 = vld [vmem:[%s10979_s26 + $0x1a] sm:$0x3] }
  0x8d   : > { %v1142_v48 = vld [vmem:[%s10979_s26 + $0x12] sm:$0xff]  ;;  %v8211_v60 = vcombine.low %v1158_v46, %v1162_v47  ;;  %s10689_s26 = sshll.u32 %s10777_s30, 4  ;;  %s10690_s26 = int_to_ptr.vmem [resolvable:$false] %s10689_s26 }
  0x8e   : > { %s10691_s16 = scalar_lea.vmem %s10690_s26, 32  ;;  %p10692_p5 = scmp.lt.s32.totalorder %s11945_s1, %s10690_s26 }
  0x8f   : > { %788 = vmatpush1.bf16.msra.mxu1 %v8147_v54  ;;  %943 = vmatpush1.bf16.msra.mxu0 %v8169_v55  ;;  %v8199_v54 = vcombine.low %v1148_v39, %v1152_v40  ;;  %v8201_v55 = vcombine.low %v1149_v41, %v1153_v42  ;;  %v1260_v61 = vsel %vm589_vm0, %v8211_v60, 0  ;;  %p10693_p6 = scmp.lt.s32.totalorder %s10691_s16, %s10685_s21 }
  0x90   : > { %8188 = vmatprep.subr.msk.bf16.mxu1 %vm589_vm0, %v8180_v56  ;;  %8191 = vmatprep.subr.msk.bf16.mxu0 %vm589_vm0, %v8182_v57  ;;  %v8212_v56 = vcombine.high %v1158_v46, %v1162_v47  ;;  %v1145_v57 = vpack.c.bf16 %v1143_v49, %v1142_v48 }
  0x91   : > { %8162 = vmatmul.mubr.msk.bf16.gmra.mxu1 %vm582_vm1, %v10990_v27  ;;  %8165 = vmatmul.mubr.msk.bf16.gmra.mxu0 %vm582_vm1, %v10990_v27  ;;  %p10694_p13 = por %p10693_p6, %p10692_p5 }
  0x92   : > { %805 = vmatprep.mubr.bf16.mxu1 %v11999_v0  ;;  %960 = vmatprep.mubr.bf16.mxu0 %v11999_v0 }
  0x93   : > { %p10695_p10 = pnand %p10694_p13, %p10688_p4 }
  0x99   : > { %8167 = vmatmul.mubr.msk.bf16.vlgmr.msra.gmra.mxu1 %vm582_vm1, %v10988_v26  ;;  %8186 = vmatmul.mubr.msk.bf16.vlgmr.msra.gmra.mxu0 %vm582_vm1, %v11022_v3  ;;  %v1160_v26 = vld [vmem:[#allocation4 + $0x168] sm:$0x33] }
  0x9a   : > { %815 = vmatprep.mubr.bf16.mxu1 %v11999_v0  ;;  %970 = vmatprep.mubr.bf16.mxu0 %v11999_v0  ;;  %v8208_v35 = vcombine.high %v1156_v25, %v1160_v26  ;;  %v8207_v43 = vcombine.low %v1156_v25, %v1160_v26 }
  0x9b   : > { %994 = vmatpush1.bf16.msra.mxu1 %v911_v10  ;;  %1047 = vmatpush1.bf16.msra.mxu0 %v917_v11 }
  0x9c   : > { %995 = vmatprep.subr.bf16.mxu1 %v8172_v12  ;;  %1048 = vmatprep.subr.bf16.mxu0 %v8174_v13  ;;  %v1248_v50 = vsel %vm589_vm0, %v8207_v43, 0  ;;  %v1511_v13 = vlaneseq }
  0x9f   : > { %996 = vmatpush1.bf16.msra.mxu1 %v8171_v14  ;;  %1049 = vmatpush1.bf16.msra.mxu0 %v8173_v15 }
  0xa0   : > { %8194 = vmatprep.subr.msk.bf16.mxu1 %vm589_vm0, %v8184_v16  ;;  %8213 = vmatprep.subr.msk.bf16.mxu0 %vm589_vm0, %v8206_v17 }
  0xa1   : > { %8168 = vmatmul.mubr.msk.bf16.gmra.mxu1 %vm582_vm1, %v10990_v27  ;;  %8187 = vmatmul.mubr.msk.bf16.gmra.mxu0 %vm582_vm1, %v11034_v18  ;;  %v1242_v27 = vsel %vm589_vm0, %v8205_v24, 0 }
  0xa2   : > { %1013 = vmatprep.mubr.bf16.mxu1 %v11999_v0  ;;  %1066 = vmatprep.mubr.bf16.mxu0 %v11999_v0 }
  0xa9   : > { %8189 = vmatmul.mubr.msk.bf16.vlgmr.msra.gmra.mxu1 %vm582_vm1, %v11022_v3  ;;  %8192 = vmatmul.mubr.msk.bf16.vlgmr.msra.gmra.mxu0 %vm582_vm1, %v11022_v3 }
  0xaa   : > { %1023 = vmatprep.mubr.bf16.mxu1 %v11999_v0  ;;  %1076 = vmatprep.mubr.bf16.mxu0 %v11999_v0 }
  0xab   : > { %1100 = vmatpush1.bf16.msra.mxu1 %v923_v30  ;;  %1278 = vmatpush1.bf16.msra.mxu0 %v1242_v27 }
  0xac   : > { %1101 = vmatprep.subr.bf16.mxu1 %v8176_v31  ;;  %1279 = vmatprep.subr.bf16.mxu0 %v8198_v32 }
  0xaf   : > { %1102 = vmatpush1.bf16.msra.mxu1 %v8175_v33  ;;  %1280 = vmatpush1.bf16.msra.mxu0 %v8197_v34 }
  0xb0   : > { %8216 = vmatprep.subr.msk.bf16.mxu1 %vm589_vm0, %v8208_v35  ;;  %8219 = vmatprep.subr.msk.bf16.mxu0 %vm589_vm0, %v8210_v36 }
  0xb1   : > { %8190 = vmatmul.mubr.msk.bf16.gmra.mxu1 %vm582_vm1, %v11034_v18  ;;  %8193 = vmatmul.mubr.msk.bf16.gmra.mxu0 %vm582_vm1, %v11034_v18 }
  0xb2   : > { %1119 = vmatprep.mubr.bf16.mxu1 %v11999_v0  ;;  %1297 = vmatprep.mubr.bf16.mxu0 %v11999_v0 }
  0xb9   : > { %8195 = vmatmul.mubr.msk.bf16.vlgmr.msra.gmra.mxu1 %vm582_vm1, %v11022_v3  ;;  %8214 = vmatmul.mubr.msk.bf16.vlgmr.msra.gmra.mxu0 %vm582_vm1, %v1144_v45 }
  0xba   : > { %1129 = vmatprep.mubr.bf16.mxu1 %v11999_v0  ;;  %1307 = vmatprep.mubr.bf16.mxu0 %v11999_v0 }
  0xbb   : > { %1331 = vmatpush1.bf16.msra.mxu1 %v1248_v50  ;;  %1384 = vmatpush1.bf16.msra.mxu0 %v1254_v51 }
  0xbc   : > { %1332 = vmatprep.subr.bf16.mxu1 %v8200_v52  ;;  %1385 = vmatprep.subr.bf16.mxu0 %v8202_v53 }
  0xbf   : > { %1333 = vmatpush1.bf16.msra.mxu1 %v8199_v54  ;;  %1386 = vmatpush1.bf16.msra.mxu0 %v8201_v55 }
  0xc0   : > { %8222 = vmatprep.subr.msk.bf16.mxu1 %vm589_vm0, %v8212_v56 }
  0xc1   : > { %8196 = vmatmul.mubr.msk.bf16.gmra.mxu1 %vm582_vm1, %v11034_v18  ;;  %8215 = vmatmul.mubr.msk.bf16.gmra.mxu0 %vm582_vm1, %v1145_v57  ;;  %v11118_v18 = vshrl.u32 %v1511_v13, 7 }
  0xc2   : > { %1350 = vmatprep.mubr.bf16.mxu1 %v11999_v0  ;;  %1403 = vmatprep.mubr.bf16.mxu0 %v11999_v0 }
  0xc3   : > { %12037 = vst [vmem:[#allocation22_spill] sm:$0xff] %v11118_v18  ;;  %v11129_v23 = vsub.s32 0, %v11118_v18  ;;  %v11132_v24 = vsub.s32 1, %v11118_v18  ;;  %v11135_v25 = vsub.s32 2, %v11118_v18 }
  0xc5   : > { %12038 = vst [vmem:[#allocation23_spill] sm:$0xff] %v11129_v23  ;;  %12039 = vst [vmem:[#allocation24_spill] sm:$0xff] %v11132_v24 }
  0xc6   : > { %12040 = vst [vmem:[#allocation25_spill] sm:$0xff] %v11135_v25 }
  0xc9   : > { %8217 = vmatmul.mubr.msk.bf16.vlgmr.msra.gmra.mxu1 %vm582_vm1, %v1144_v45  ;;  %8220 = vmatmul.mubr.msk.bf16.vlgmr.msra.gmra.mxu0 %vm582_vm1, %v1144_v45 }
  0xca   : > { %1360 = vmatprep.mubr.bf16.mxu1 %v11999_v0  ;;  %1413 = vmatprep.mubr.bf16.mxu0 %v11999_v0 }
  0xcb   : > { %1437 = vmatpush1.bf16.msra.mxu1 %v1260_v61 }
  0xcc   : > { %1438 = vmatprep.subr.bf16.mxu1 %v8204_v62 }
  0xcf   : > { %1439 = vmatpush1.bf16.msra.mxu1 %v8203_v63 }
  0xd1   : > { %8218 = vmatmul.mubr.msk.bf16.gmra.mxu1 %vm582_vm1, %v1145_v57  ;;  %8221 = vmatmul.mubr.msk.bf16.gmra.mxu0 %vm582_vm1, %v1145_v57 }
  0xd2   : > { %1456 = vmatprep.mubr.bf16.mxu1 %v11999_v0  ;;  %1695 = vmatprep.mubr.bf16.mxu0 %v11999_v0 }
  0xd9   : > { %8223 = vmatmul.mubr.msk.bf16.vlgmr.msra.gmra.mxu1 %vm582_vm1, %v1144_v45 }
  0xda   : > { %1466 = vmatprep.mubr.bf16.mxu1 %v11999_v0 }
  0xe1   : > { %8224 = vmatmul.mubr.msk.bf16.gmra.mxu1 %vm582_vm1, %v1145_v57 }
  0xe2   : > { %1738 = vmatprep.mubr.bf16.mxu1 %v11999_v0 }
 0x141   : > { %v648_v1 = vpop.f32.mrf.mxu0  ;;  %v11090_v2 = vpop.f32.mrf.mxu1 }
 0x143   : > { %v11092_v3 = vpop.f32.mrf.mxu0  ;;  %v11094_v4 = vpop.f32.mrf.mxu1 }
 0x145   : > { %v11096_v5 = vpop.f32.mrf.mxu0  ;;  %v11098_v6 = vpop.f32.mrf.mxu1 }
 0x147   : > { %v11100_v7 = vpop.f32.mrf.mxu0  ;;  %v11102_v8 = vpop.f32.mrf.mxu1 }
 0x149   : > { %v701_v9 = vpop.f32.mrf.mxu1  ;;  %v11104_v10 = vpop.f32.mrf.mxu0 }
 0x14b   : > { %v11106_v11 = vpop.f32.mrf.mxu1  ;;  %v11108_v12 = vpop.f32.mrf.mxu0 }
 0x14d   : > { %v11110_v14 = vpop.f32.mrf.mxu1  ;;  %v11112_v15 = vpop.f32.mrf.mxu0 }
 0x14f   : > { %v11114_v16 = vpop.f32.mrf.mxu1  ;;  %v11116_v17 = vpop.f32.mrf.mxu0 }
 0x151   : > { %v11120_v19 = vpop.f32.mrf.mxu1  ;;  %v11122_v20 = vpop.f32.mrf.mxu0 }
 0x153   : > { %v11124_v21 = vpop.f32.mrf.mxu1  ;;  %v11126_v22 = vpop.f32.mrf.mxu0 }
 0x155   : > { %v11138_v28 = vpop.f32.mrf.mxu1  ;;  %v11140_v29 = vpop.f32.mrf.mxu0 }
 0x156   : > { %12041 = vst [vmem:[#allocation26_spill] sm:$0xff] %v11140_v29 }
 0x157   : > { %v11142_v30 = vpop.f32.mrf.mxu1  ;;  %v11144_v27 = vpop.f32.mrf.mxu0 }
 0x158   : > { %12042 = vst [vmem:[#allocation27_spill] sm:$0xff] %v11142_v30  ;;  %12043 = vst [vmem:[#allocation28_spill] sm:$0xff] %v11144_v27  ;;  %v12063_v30 = vsub.s32 3, %v11118_v18 }
 0x159   : > { %v11146_v31 = vpop.f32.mrf.mxu1  ;;  %v962_v32 = vpop.f32.mrf.mxu0 }
 0x15a   : > { %12044 = vst [vmem:[#allocation29_spill] sm:$0xff] %v11146_v31  ;;  %v11148_v33 = vadd.f32 %v962_v32, %v648_v1 }
 0x15b   : > { %v11150_v34 = vpop.f32.mrf.mxu1  ;;  %v964_v35 = vpop.f32.mrf.mxu0 }
 0x15c   : > { %12045 = vst [vmem:[#allocation30_spill] sm:$0xff] %v11150_v34 }
 0x15d   : > { %v11152_v36 = vpop.f32.mrf.mxu1  ;;  %v966_v37 = vpop.f32.mrf.mxu0 }
 0x15e   : > { %12046 = vst [vmem:[#allocation31_spill] sm:$0xff] %v11152_v36  ;;  %v1541_v36 = vsub.s32 7, %v11118_v18 }
 0x15f   : > { %v11154_v38 = vpop.f32.mrf.mxu1  ;;  %v968_v39 = vpop.f32.mrf.mxu0 }
 0x160   : > { %12047 = vst [vmem:[#allocation32_spill] sm:$0xff] %v11154_v38  ;;  %v1537_v38 = vsub.s32 6, %v11118_v18 }
 0x161   : > { %v11156_v40 = vpop.f32.mrf.mxu1  ;;  %v972_v41 = vpop.f32.mrf.mxu0 }
 0x162   : > { %12048 = vst [vmem:[#allocation33_spill] sm:$0xff] %v11156_v40 }
 0x163   : > { %v11158_v42 = vpop.f32.mrf.mxu1  ;;  %v974_v43 = vpop.f32.mrf.mxu0 }
 0x164   : > { %12049 = vst [vmem:[#allocation34_spill] sm:$0xff] %v11158_v42 }
 0x165   : > { %v11160_v44 = vpop.f32.mrf.mxu1  ;;  %v976_v45 = vpop.f32.mrf.mxu0 }
 0x166   : > { %12050 = vst [vmem:[#allocation35_spill] sm:$0xff] %v11160_v44 }
 0x167   : > { %v11162_v46 = vpop.f32.mrf.mxu1  ;;  %v978_v47 = vpop.f32.mrf.mxu0 }
 0x168   : > { %12051 = vst [vmem:[#allocation36_spill] sm:$0xff] %v11162_v46  ;;  %v1509_v46 = vld [vmem:[#allocation7] sm:$0xff] }
 0x169   : > { %v1015_v48 = vpop.f32.mrf.mxu1  ;;  %v1068_v49 = vpop.f32.mrf.mxu0  ;;  %v11189_v42 = vrot.slane %v1509_v46, %v11135_v25  ;;  %v967_v25 = vadd.f32 %v966_v37, %v11096_v5 }
 0x16a   : > { %v11164_v50 = vadd.f32 %v1015_v48, %v701_v9 }
 0x16b   : > { %v1017_v51 = vpop.f32.mrf.mxu1  ;;  %v1070_v52 = vpop.f32.mrf.mxu0  ;;  %12060 = vst [vmem:[#allocation45_spill] sm:$0xff] %v11189_v42  ;;  %v969_v42 = vadd.f32 %v968_v39, %v11100_v7 }
 0x16c   : > { %12052 = vst [vmem:[#allocation37_spill] sm:$0xff] %v11164_v50  ;;  %v1071_v5 = vadd.f32 %v1070_v52, %v11108_v12 }
 0x16d   : > { %v1019_v53 = vpop.f32.mrf.mxu1  ;;  %v1072_v54 = vpop.f32.mrf.mxu0 }
 0x16f   : > { %v1021_v55 = vpop.f32.mrf.mxu1  ;;  %v1074_v56 = vpop.f32.mrf.mxu0 }
 0x171   : > { %v1025_v57 = vpop.f32.mrf.mxu1  ;;  %v1078_v58 = vpop.f32.mrf.mxu0 }
 0x173   : > { %v1027_v59 = vpop.f32.mrf.mxu1  ;;  %v1080_v60 = vpop.f32.mrf.mxu0 }
 0x174   : > { %v11235_v12 = vadd.f32 %v1027_v59, %v11124_v21 }
 0x175   : > { %v1029_v61 = vpop.f32.mrf.mxu1  ;;  %v1082_v62 = vpop.f32.mrf.mxu0 }
 0x177   : > { %v1031_v63 = vpop.f32.mrf.mxu1  ;;  %v1084_v1 = vpop.f32.mrf.mxu0 }
 0x179   : > { %v11166_v13 = vpop.f32.mrf.mxu1  ;;  %v1299_v32 = vpop.f32.mrf.mxu0 }
 0x17a   : > { %12053 = vst [vmem:[#allocation38_spill] sm:$0xff] %v11166_v13 }
 0x17b   : > { %v11168_v0 = vpop.f32.mrf.mxu1  ;;  %v1301_v9 = vpop.f32.mrf.mxu0 }
 0x17c   : > { %12054 = vst [vmem:[#allocation39_spill] sm:$0xff] %v11168_v0  ;;  %v11181_v0 = vrot.slane %v1509_v46, %v11129_v23  ;;  %v12065_v23 = vsub.s32 5, %v11118_v18 }
 0x17d   : > { %v11170_v48 = vpop.f32.mrf.mxu1  ;;  %v1303_v26 = vpop.f32.mrf.mxu0 }
 0x17e   : > { %12055 = vst [vmem:[#allocation40_spill] sm:$0xff] %v11170_v48  ;;  %v11184_v48 = vrot.slane %v1509_v46, %v11132_v24  ;;  %v11201_v29 = vrot.slane %v1509_v46, %v12065_v23  ;;  %v11203_v24 = vrot.slane %v1509_v46, %v1537_v38  ;;  %v977_v23 = vadd.f32 %v976_v45, %v11098_v6 }
 0x17f   : > { %v11174_v40 = vpop.f32.mrf.mxu1  ;;  %v1305_v50 = vpop.f32.mrf.mxu0  ;;  %v979_v38 = vadd.f32 %v978_v47, %v11102_v8  ;;  %v1022_v6 = vadd.f32 %v1021_v55, %v11114_v16  ;;  %v1485_v37 = vadd.f32 %v1303_v26, %v967_v25  ;;  %v11240_v25 = vadd.f32 %v1029_v61, %v11138_v28  ;;  %v12068_v47 = vld [vmem:[#allocation28_spill] sm:$0xff]  ;;  %v12071_v28 = vld [vmem:[#allocation29_spill] sm:$0xff]  ;;  %v12073_v61 = vld [vmem:[#allocation30_spill] sm:$0xff] }
 0x180   : > { %12056 = vst [vmem:[#allocation41_spill] sm:$0xff] %v11174_v40  ;;  %12058 = vst [vmem:[#allocation43_spill] sm:$0xff] %v11184_v48  ;;  %v12061_v40 = vsub.s32 4, %v11118_v18  ;;  %v11205_v48 = vrot.slane %v1509_v46, %v1541_v36  ;;  %v1477_v36 = vadd.f32 %v1299_v32, %v11148_v33  ;;  %v1075_v33 = vadd.f32 %v1074_v56, %v11116_v17  ;;  %v12066_v17 = vld [vmem:[#allocation26_spill] sm:$0xff]  ;;  %v12075_v32 = vld [vmem:[#allocation31_spill] sm:$0xff] }
 0x181   : > { %v11178_v34 = vpop.f32.mrf.mxu1  ;;  %v1309_v13 = vpop.f32.mrf.mxu0  ;;  %v11243_v26 = vadd.f32 %v1082_v62, %v12066_v17 }
 0x182   : > { %12057 = vst [vmem:[#allocation42_spill] sm:$0xff] %v11178_v34  ;;  %v11193_v27 = vrot.slane %v1509_v46, %v12061_v40  ;;  %v11197_v34 = vrot.slane %v1509_v46, %v12063_v30  ;;  %v973_v40 = vadd.f32 %v972_v41, %v11090_v2  ;;  %v1069_v46 = vadd.f32 %v1068_v49, %v11104_v10 }
 0x183   : > { %v11186_v31 = vpop.f32.mrf.mxu1  ;;  %v1311_v44 = vpop.f32.mrf.mxu0  ;;  %v11223_v2 = vadd.f32 %v1019_v53, %v11110_v14  ;;  %v11231_v10 = vadd.f32 %v1025_v57, %v11120_v19  ;;  %v1081_v41 = vadd.f32 %v1080_v60, %v11126_v22  ;;  %v12067_v19 = vld [vmem:[#allocation27_spill] sm:$0xff]  ;;  %v11249_v49 = vadd.f32 %v1084_v1, %v12068_v47  ;;  %v12072_v53 = vld [vmem:[#allocation38_spill] sm:$0xff] }
 0x184   : > { %12059 = vst [vmem:[#allocation44_spill] sm:$0xff] %v11186_v31  ;;  %12062 = vst [vmem:[#allocation46_spill] sm:$0xff] %v11193_v27  ;;  %v965_v31 = vadd.f32 %v964_v35, %v11092_v3  ;;  %v11219_v3 = vadd.f32 %v1017_v51, %v11106_v11  ;;  %v1079_v11 = vadd.f32 %v1078_v58, %v11122_v20  ;;  %v12074_v62 = vld [vmem:[#allocation39_spill] sm:$0xff] }
 0x185   : > { %12064 = vst [vmem:[#allocation47_spill] sm:$0xff] %v11197_v34  ;;  %v11211_v27 = vpop.f32.mrf.mxu1  ;;  %v1313_v30 = vpop.f32.mrf.mxu0  ;;  %v975_v34 = vadd.f32 %v974_v43, %v11094_v4  ;;  %v1073_v4 = vadd.f32 %v1072_v54, %v11112_v15  ;;  %v1551_v15 = vadd.f32 %v11181_v0, %v1477_v36  ;;  %v1486_v43 = vadd.f32 %v1305_v50, %v969_v42 }
 0x186   : > { %v1478_v8 = vadd.f32 %v1301_v9, %v965_v31  ;;  %v11246_v31 = vadd.f32 %v1031_v63, %v12067_v19  ;;  %v1493_v20 = vadd.f32 %v1309_v13, %v973_v40  ;;  %v1559_v42 = vadd.f32 %v11181_v0, %v1485_v37  ;;  %v12076_v9 = vld [vmem:[#allocation40_spill] sm:$0xff] }
 0x187   : > { %v11225_v7 = vpop.f32.mrf.mxu1  ;;  %v1315_v35 = vpop.f32.mrf.mxu0  ;;  %v12069_v22 = vld [vmem:[#allocation43_spill] sm:$0xff]  ;;  %v11256_v54 = vadd.f32 %v12072_v53, %v12071_v28  ;;  %v1494_v55 = vadd.f32 %v1311_v44, %v975_v34  ;;  %v1501_v56 = vadd.f32 %v1313_v30, %v977_v23  ;;  %v1583_v60 = vmax.f32 %v1551_v15, 0.0  ;;  %v12078_v37 = vld [vmem:[#allocation41_spill] sm:$0xff] }
 0x188   : > { %v1552_v51 = vadd.f32 %v12069_v22, %v1478_v8  ;;  %v11260_v63 = vadd.f32 %v12074_v62, %v12073_v61  ;;  %v11263_v1 = vadd.f32 %v12069_v22, %v1486_v43  ;;  %v11267_v40 = vadd.f32 %v12076_v9, %v12075_v32  ;;  %v12077_v8 = vld [vmem:[#allocation32_spill] sm:$0xff] }
 0x189   : > { %v1352_v14 = vpop.f32.mrf.mxu1  ;;  %v1405_v39 = vpop.f32.mrf.mxu0  ;;  %v1567_v36 = vadd.f32 %v11181_v0, %v1493_v20  ;;  %v1568_v43 = vadd.f32 %v12069_v22, %v1494_v55  ;;  %v1502_v47 = vadd.f32 %v1315_v35, %v979_v38 }
 0x18a   : > { %v1481_v16 = vadd.f32 %v1405_v39, %v1069_v46  ;;  %v1584_v46 = vmax.f32 %v1552_v51, 0.0  ;;  %v11273_v39 = vadd.f32 %v12078_v37, %v12077_v8 }
 0x18b   : > { %v1354_v21 = vpop.f32.mrf.mxu1  ;;  %v1407_v45 = vpop.f32.mrf.mxu0  ;;  %v12070_v50 = vld [vmem:[#allocation46_spill] sm:$0xff]  ;;  %v1599_v28 = vmax.f32 %v1567_v36, 0.0  ;;  %v1576_v9 = vadd.f32 %v12069_v22, %v1502_v47  ;;  %v12080_v36 = vld [vmem:[#allocation45_spill] sm:$0xff] }
 0x18c   : > { %v1555_v52 = vadd.f32 %v12070_v50, %v1481_v16  ;;  %v1482_v57 = vadd.f32 %v1407_v45, %v1071_v5  ;;  %v1591_v5 = vmax.f32 %v1559_v42, 0.0  ;;  %v1575_v16 = vadd.f32 %v11181_v0, %v1501_v56 }
 0x18d   : > { %v1356_v58 = vpop.f32.mrf.mxu1  ;;  %v1409_v59 = vpop.f32.mrf.mxu0  ;;  %v1480_v0 = vadd.f32 %v1354_v21, %v11219_v3 }
 0x18e   : > { %v1587_v13 = vmax.f32 %v1555_v52, 0.0  ;;  %v1556_v34 = vadd.f32 %v11201_v29, %v1482_v57  ;;  %v1489_v44 = vadd.f32 %v1409_v59, %v1073_v4  ;;  %v1592_v4 = vmax.f32 %v11263_v1, 0.0  ;;  %v12079_v52 = vld [vmem:[#allocation37_spill] sm:$0xff] }
 0x18f   : > { %v1358_v30 = vpop.f32.mrf.mxu1  ;;  %v1411_v23 = vpop.f32.mrf.mxu0  ;;  %v1479_v51 = vadd.f32 %v1352_v14, %v12079_v52  ;;  %v1487_v56 = vadd.f32 %v1356_v58, %v11223_v2  ;;  %v1607_v32 = vmax.f32 %v1575_v16, 0.0  ;;  %v1608_v16 = vmax.f32 %v1576_v9, 0.0 }
 0x190   : > { %v1615_v15 = vmax.f32 %v1583_v60, %v1587_v13  ;;  %v1588_v17 = vmax.f32 %v1556_v34, 0.0  ;;  %v1563_v19 = vadd.f32 %v12070_v50, %v1489_v44  ;;  %v1490_v59 = vadd.f32 %v1411_v23, %v1075_v33 }
 0x191   : > { %v1362_v20 = vpop.f32.mrf.mxu1  ;;  %v1415_v45 = vpop.f32.mrf.mxu0  ;;  %v1488_v61 = vadd.f32 %v1358_v30, %v1022_v6  ;;  %v1600_v13 = vmax.f32 %v1568_v43, 0.0  ;;  %v1553_v33 = vadd.f32 %v12080_v36, %v1479_v51  ;;  %v12081_v30 = vld [vmem:[#allocation47_spill] sm:$0xff]  ;;  %v1561_v22 = vadd.f32 %v12080_v36, %v1487_v56 }
 0x192   : > { %v1497_v42 = vadd.f32 %v1415_v45, %v1079_v11  ;;  %v11280_v53 = vmax.f32 %v1584_v46, %v1588_v17  ;;  %v1595_v57 = vmax.f32 %v1563_v19, 0.0  ;;  %v1495_v34 = vadd.f32 %v1362_v20, %v11231_v10 }
 0x193   : > { %v1364_v60 = vpop.f32.mrf.mxu1  ;;  %v1417_v55 = vpop.f32.mrf.mxu0  ;;  %v1564_v2 = vadd.f32 %v11201_v29, %v1490_v59  ;;  %v1554_v23 = vadd.f32 %v12081_v30, %v1480_v0  ;;  %v11298_v46 = vadd.f32 %v12081_v30, %v1488_v61  ;;  %v12082_v61 = vld [vmem:[#allocation33_spill] sm:$0xff] }
 0x194   : > { %v1571_v62 = vadd.f32 %v12070_v50, %v1497_v42  ;;  %v1619_v38 = vmax.f32 %v1591_v5, %v1595_v57  ;;  %v1498_v35 = vadd.f32 %v1417_v55, %v1081_v41  ;;  %v1496_v5 = vadd.f32 %v1364_v60, %v11235_v12 }
 0x195   : > { %v11285_v14 = vpop.f32.mrf.mxu1  ;;  %v1419_v11 = vpop.f32.mrf.mxu0  ;;  %v11304_v17 = vadd.f32 %v12080_v36, %v1495_v34  ;;  %v1596_v20 = vmax.f32 %v1564_v2, 0.0  ;;  %v1586_v12 = vmax.f32 %v1554_v23, 0.0  ;;  %v1593_v42 = vmax.f32 %v1561_v22, 0.0  ;;  %v12085_v2 = vld [vmem:[#allocation44_spill] sm:$0xff] }
 0x196   : > { %v1603_v44 = vmax.f32 %v1571_v62, 0.0  ;;  %v11290_v3 = vpack.c.bf16 %v1619_v38, %v1615_v15  ;;  %v1572_v6 = vadd.f32 %v11201_v29, %v1498_v35  ;;  %v1505_v21 = vadd.f32 %v1419_v11, %v11243_v26  ;;  %v12083_v62 = vld [vmem:[#allocation42_spill] sm:$0xff] }
 0x197   : > { %v1368_v41 = vpop.f32.mrf.mxu1  ;;  %v1421_v58 = vpop.f32.mrf.mxu0  ;;  %v1585_v26 = vmax.f32 %v1553_v33, 0.0  ;;  %v1570_v57 = vadd.f32 %v12081_v30, %v1496_v5 }
 0x198   : > { %v1623_v10 = vmax.f32 %v1599_v28, %v1603_v44  ;;  %v1604_v8 = vmax.f32 %v1572_v6, 0.0  ;;  %v1579_v37 = vadd.f32 %v12070_v50, %v1505_v21  ;;  %v1506_v15 = vadd.f32 %v1421_v58, %v11249_v49  ;;  %v12084_v44 = vld [vmem:[#allocation34_spill] sm:$0xff] }
 0x199   : > { %v1458_v43 = vpop.f32.mrf.mxu1  ;;  %v1594_v28 = vmax.f32 %v11298_v46, 0.0  ;;  %v1134_v6 = vadd.f32 %v12085_v2, %v12084_v44  ;;  %v1504_v5 = vadd.f32 %v1368_v41, %v11246_v31  ;;  %v9539_v31 = vld [vmem:[%s11987_s3] sm:$0x7f]  }
 0x19a   : > { %v1483_v19 = vadd.f32 %v1458_v43, %v11256_v54  ;;  %v1624_v45 = vmax.f32 %v1600_v13, %v1604_v8  ;;  %v1611_v47 = vmax.f32 %v1579_v37, 0.0  ;;  %v1580_v52 = vadd.f32 %v11201_v29, %v1506_v15  ;;  %v9564_v44 = vld [vmem:[#allocation9 + $0xa24] ss:$24 sps:$4 sm:$0xff]  }
 0x19b   : > { %v1460_v51 = vpop.f32.mrf.mxu1  ;;  %v1601_v54 = vmax.f32 %v11304_v17, 0.0  ;;  %v1132_v13 = vadd.f32 %v12083_v62, %v12082_v61  ;;  %v9546_v62 = vld [vmem:[#allocation9 + $0x724] ss:$24 sps:$4 sm:$0xff]  }
 0x19c   : > { %v1557_v50 = vadd.f32 %v11203_v24, %v1483_v19  ;;  %v1484_v49 = vadd.f32 %v1460_v51, %v11260_v63  ;;  %v1627_v59 = vmax.f32 %v1607_v32, %v1611_v47  ;;  %v1612_v60 = vmax.f32 %v1580_v52, 0.0  ;;  %v12087_v19 = vld [vmem:[#allocation36_spill] sm:$0xff] }
 0x19d   : > { %v1462_v55 = vpop.f32.mrf.mxu1  ;;  %v1620_v63 = vmax.f32 %v1592_v4, %v1596_v20  ;;  %v1138_v20 = vadd.f32 %v11225_v7, %v12087_v19  ;;  %v1578_v52 = vadd.f32 %v12081_v30, %v1504_v5  ;;  %v9561_v2 = vld [vmem:[#allocation9 + $0x664] ss:$24 sps:$4 sm:$0xff]   ;;  %v9579_v5 = vld [vmem:[#allocation9 + $0x8d4] ss:$24 sps:$4 sm:$0xff]  }
 0x19e   : > { %v1589_v0 = vmax.f32 %v1557_v50, 0.0  ;;  %v1558_v56 = vadd.f32 %v11205_v48, %v1484_v49  ;;  %v1491_v29 = vadd.f32 %v1462_v55, %v11267_v40  ;;  %v1628_v38 = vmax.f32 %v1608_v16, %v1612_v60  ;;  %v9594_v19 = vld [vmem:[#allocation9 + $0x934] ss:$24 sps:$4 sm:$0xff]  }
 0x19f   : > { %v1464_v35 = vpop.f32.mrf.mxu1  ;;  %v1635_v11 = vpack.c.bf16 %v1627_v59, %v1623_v10  ;;  %v1602_v40 = vmax.f32 %v1570_v57, 0.0  ;;  %v1503_v10 = vadd.f32 %v11285_v14, %v11240_v25  ;;  %v1632_v8 = vpack.c.bf16 %v1620_v63, %v11280_v53  ;;  %v9544_v63 = vld [vmem:[#allocation9 + $0x720] ss:$24 sps:$4 sm:$0xff]  }
 0x1a0   : > { %v1617_v9 = vmax.f32 %v1585_v26, %v1589_v0  ;;  %v1590_v32 = vmax.f32 %v1558_v56, 0.0  ;;  %v1565_v33 = vadd.f32 %v11203_v24, %v1491_v29  ;;  %v1492_v34 = vadd.f32 %v1464_v35, %v11273_v39  ;;  %v12086_v26 = vld [vmem:[#allocation35_spill] sm:$0xff]  ;;  %v9541_v29 = vld [vmem:[#allocation9 + $0x750] ss:$24 sps:$4 sm:$0xff]  }
 0x1a1   : > { %v1636_v21 = vpack.c.bf16 %v1628_v38, %v1624_v45  ;;  %v1468_v58 = vpop.f32.mrf.mxu1  ;;  %v1652_v23 = vsel %vm1650_vm2, %v1635_v11, 0  ;;  %v1136_v17 = vadd.f32 %v11211_v27, %v12086_v26  ;;  %v1577_v47 = vadd.f32 %v12080_v36, %v1503_v10  ;;  %v9543_v36 = vld [vmem:[#allocation9 + $0x754] ss:$24 sps:$4 sm:$0xff]   ;;  %v9547_v35 = vld [vmem:[#allocation9 + $0x6f0] ss:$24 sps:$4 sm:$0xff]  }
 0x1a2   : > { %v1618_v1 = vmax.f32 %v1586_v12, %v1590_v32  ;;  %v1597_v4 = vmax.f32 %v1565_v33, 0.0  ;;  %v1566_v22 = vadd.f32 %v11205_v48, %v1492_v34  ;;  %v1499_v46 = vadd.f32 %v1468_v58, %v1132_v13  ;;  %v9549_v38 = vld [vmem:[#allocation9 + $0x6f4] ss:$24 sps:$4 sm:$0xff]   ;;  %v9550_v11 = vld [vmem:[#allocation9 + $0x6c0] ss:$24 sps:$4 sm:$0xff]  }
 0x1a3   : > { %8226 = vmatprep.subr.msk.bf16.mxu0 %vm1650_vm2, %v1636_v21  ;;  %v1470_v39 = vpop.f32.mrf.mxu1  ;;  %v1609_v59 = vmax.f32 %v1577_v47, 0.0  ;;  %v1610_v30 = vmax.f32 %v1578_v52, 0.0  ;;  %v9555_v32 = vld [vmem:[#allocation9 + $0x694] ss:$24 sps:$4 sm:$0xff]   ;;  %v9556_v33 = vld [vmem:[#allocation9 + $0xa50] ss:$24 sps:$4 sm:$0xff]  }
 0x1a4   : > { %v1621_v37 = vmax.f32 %v1593_v42, %v1597_v4  ;;  %v1598_v15 = vmax.f32 %v1566_v22, 0.0  ;;  %v1573_v43 = vadd.f32 %v11203_v24, %v1499_v46  ;;  %v1500_v16 = vadd.f32 %v1470_v39, %v1134_v6  ;;  %1676 = vmatpush1.bf16.msra.mxu0 %v1652_v23  ;;  %v9553_v34 = vld [vmem:[#allocation9 + $0x690] ss:$24 sps:$4 sm:$0xff]   ;;  %v9562_v6 = vld [vmem:[#allocation9 + $0xa20] ss:$24 sps:$4 sm:$0xff]  }
 0x1a5   : > { %1677 = vmatprep.subr.bf16.mxu0 %v1632_v8  ;;  %v1472_v25 = vpop.f32.mrf.mxu1  ;;  %v9567_v58 = vld [vmem:[#allocation9 + $0x634] ss:$24 sps:$4 sm:$0xff]   ;;  %v9576_v4 = vld [vmem:[#allocation9 + $0x9c4] ss:$24 sps:$4 sm:$0xff]   ;;  %v9574_v46 = vld [vmem:[#allocation9 + $0x9c0] ss:$24 sps:$4 sm:$0xff]  }
 0x1a6   : > { %v1633_v14 = vpack.c.bf16 %v1621_v37, %v1617_v9  ;;  %v1622_v53 = vmax.f32 %v1594_v28, %v1598_v15  ;;  %v1605_v41 = vmax.f32 %v1573_v43, 0.0  ;;  %v1574_v45 = vadd.f32 %v11205_v48, %v1500_v16  ;;  %v9558_v9 = vld [vmem:[#allocation9 + $0xa54] ss:$24 sps:$4 sm:$0xff]   ;;  %v9573_v22 = vld [vmem:[#allocation9 + $0x604] ss:$24 sps:$4 sm:$0xff]  }
 0x1a7   : > { %v1507_v51 = vadd.f32 %v1472_v25, %v1136_v17  ;;  %v1474_v27 = vpop.f32.mrf.mxu1  ;;  %v9571_v10 = vld [vmem:[#allocation9 + $0x600] ss:$24 sps:$4 sm:$0xff]   ;;  %v9582_v39 = vld [vmem:[#allocation9 + $0x994] ss:$24 sps:$4 sm:$0xff]   ;;  %v9580_v37 = vld [vmem:[#allocation9 + $0x990] ss:$24 sps:$4 sm:$0xff]  }
 0x1a8   : > { %v1625_v12 = vmax.f32 %v1601_v54, %v1605_v41  ;;  %v1606_v42 = vmax.f32 %v1574_v45, 0.0  ;;  %v1508_v7 = vadd.f32 %v1474_v27, %v1138_v20  ;;  %1678 = vmatpush1.bf16.msra.mxu0 %v11290_v3  ;;  %v1634_v50 = vpack.c.bf16 %v1622_v53, %v1618_v1  ;;  %v9565_v1 = vld [vmem:[#allocation9 + $0x630] ss:$24 sps:$4 sm:$0xff]   ;;  %v9585_v15 = vld [vmem:[#allocation9 + $0x8a4] ss:$24 sps:$4 sm:$0xff]  }
 0x1a9   : > { %v1581_v49 = vadd.f32 %v11203_v24, %v1507_v51  ;;  %8233 = vmatprep.subr.msk.bf16.mxu0 %vm1650_vm2, %v1636_v21  ;;  %v12088_v54 = vmov 0   ;;  %v9540_v24 = vld [vmem:[%s11987_s3 + $0x8] sm:$0x7f]   ;;  %v9588_v43 = vld [vmem:[#allocation9 + $0x964] ss:$24 sps:$4 sm:$0xff]  }
 0x1aa   : > { %v1626_v28 = vmax.f32 %v1602_v40, %v1606_v42  ;;  %v1582_v57 = vadd.f32 %v11205_v48, %v1508_v7  ;;  %v9559_v40 = vld [vmem:[#allocation9 + $0x660] ss:$24 sps:$4 sm:$0xff]   ;;  %v9570_v21 = vld [vmem:[#allocation9 + $0x9f4] ss:$24 sps:$4 sm:$0xff]   ;;  %v9589_v20 = vld [vmem:[#allocation9 + $0x870] ss:$24 sps:$4 sm:$0xff]  }
 0x1ab   : > { %v1613_v60 = vmax.f32 %v1581_v49, 0.0  ;;  %8227 = vmatmul.mubr.msk.bf16.vlgmr.msra.gmra.mxu0 %vm1646_vm3, %v9539_v31  ;;  %v9583_v16 = vld [vmem:[#allocation9 + $0x8a0] ss:$24 sps:$4 sm:$0xff]   ;;  %v9591_v17 = vld [vmem:[#allocation9 + $0x874] ss:$24 sps:$4 sm:$0xff]  }
 0x1ac   : > { %v1614_v55 = vmax.f32 %v1582_v57, 0.0  ;;  %1773 = vmatpush1.bf16.msra.mxu0 %v1652_v23  ;;  %1792 = vmatprep.mubr.bf16.mxu0 %v12088_v54  ;;  %v9568_v23 = vld [vmem:[#allocation9 + $0x9f0] ss:$24 sps:$4 sm:$0xff]   ;;  %v9586_v26 = vld [vmem:[#allocation9 + $0x960] ss:$24 sps:$4 sm:$0xff]  }
 0x1ad   : > { %v1629_v0 = vmax.f32 %v1609_v59, %v1613_v60  ;;  %1774 = vmatprep.subr.bf16.mxu0 %v1632_v8  ;;  %v9577_v8 = vld [vmem:[#allocation9 + $0x8d0] ss:$24 sps:$4 sm:$0xff]   ;;  %v9595_v53 = vld [vmem:[#allocation9 + $0x840] ss:$24 sps:$4 sm:$0xff]   ;;  %v9603_v45 = vld [vmem:[#allocation9 + $0x814] ss:$24 sps:$4 sm:$0xff]  }
 0x1ae   : > { %v1630_v56 = vmax.f32 %v1610_v30, %v1614_v55  ;;  %v9592_v25 = vld [vmem:[#allocation9 + $0x930] ss:$24 sps:$4 sm:$0xff]   ;;  %v9598_v41 = vld [vmem:[#allocation9 + $0x900] ss:$24 sps:$4 sm:$0xff]   ;;  %v9606_v47 = vld [vmem:[#allocation9 + $0xbd4] ss:$24 sps:$4 sm:$0xff]  }
 0x1af   : > { %v1637_v61 = vpack.c.bf16 %v1629_v0, %v1625_v12  ;;  %v9601_v52 = vld [vmem:[#allocation9 + $0x810] ss:$24 sps:$4 sm:$0xff]   ;;  %v9607_v27 = vld [vmem:[#allocation9 + $0x7e0] ss:$24 sps:$4 sm:$0xff]   ;;  %v9609_v12 = vld [vmem:[#allocation9 + $0x7e4] ss:$24 sps:$4 sm:$0xff]  }
 0x1b0   : > { %v1638_v48 = vpack.c.bf16 %v1630_v56, %v1626_v28  ;;  %1775 = vmatpush1.bf16.msra.mxu0 %v11290_v3  ;;  %v9552_v3 = vld [vmem:[#allocation9 + $0x6c4] ss:$24 sps:$4 sm:$0xff]   ;;  %v9604_v51 = vld [vmem:[#allocation9 + $0xbd0] ss:$24 sps:$4 sm:$0xff]   ;;  %v9610_v42 = vld [vmem:[#allocation9 + $0xba0] ss:$24 sps:$4 sm:$0xff]  }
 0x1b1   : > { %3263 = vmatprep.subr.bf16.mxu0 %v9543_v36  ;;  %v1658_v13 = vsel %vm1650_vm2, %v1637_v61, 0  ;;  %v9612_v7 = vld [vmem:[#allocation9 + $0xba4] ss:$24 sps:$4 sm:$0xff]   ;;  %v9618_v49 = vld [vmem:[#allocation9 + $0xb74] ss:$24 sps:$4 sm:$0xff]  }
 0x1b2   : > { %8228 = vmatprep.subr.msk.bf16.mxu1 %vm1650_vm2, %v1638_v48  ;;  %v9613_v28 = vld [vmem:[#allocation9 + $0x7b0] ss:$24 sps:$4 sm:$0xff]   ;;  %v9621_v59 = vld [vmem:[#allocation9 + $0x784] ss:$24 sps:$4 sm:$0xff]   ;;  %v9619_v36 = vld [vmem:[#allocation9 + $0x780] ss:$24 sps:$4 sm:$0xff]  }
 0x1b3   : > { %8234 = vmatmul.mubr.msk.bf16.vlgmr.msra.gmra.mxu0 %vm1646_vm3, %v9540_v24  ;;  %1719 = vmatpush1.bf16.msra.mxu1 %v1658_v13  ;;  %v9616_v57 = vld [vmem:[#allocation9 + $0xb70] ss:$24 sps:$4 sm:$0xff]   ;;  %v9624_v60 = vld [vmem:[#allocation9 + $0xb44] ss:$24 sps:$4 sm:$0xff]   ;;  %v9622_v30 = vld [vmem:[#allocation9 + $0xb40] ss:$24 sps:$4 sm:$0xff]  }
 0x1b4   : > { %1720 = vmatprep.subr.bf16.mxu1 %v1634_v50  ;;  %3264 = vmatpush1.bf16.msra.mxu0 %v9541_v29  ;;  %v9627_v55 = vld [vmem:[#allocation9 + $0xb14] ss:$24 sps:$4 sm:$0xff]   ;;  %v9631_v56 = vld [vmem:[#allocation9 + $0xae0] ss:$24 sps:$4 sm:$0xff]   ;;  %v9633_v29 = vld [vmem:[#allocation9 + $0xae4] ss:$24 sps:$4 sm:$0xff]  }
 0x1b5   : > { %3265 = vmatprep.subr.bf16.mxu0 %v9546_v62  ;;  %v9630_v0 = vld [vmem:[#allocation9 + $0x75c] ss:$24 sps:$4 sm:$0xff]   ;;  %v9637_v61 = vld [vmem:[#allocation9 + $0xab0] ss:$24 sps:$4 sm:$0xff]   ;;  %v9643_v62 = vld [vmem:[#allocation9 + $0xa80] ss:$24 sps:$4 sm:$0xff]  }
 0x1b7   : > { %1721 = vmatpush1.bf16.msra.mxu1 %v1633_v14 }
 0x1b8   : > { %8235 = vmatprep.subr.msk.bf16.mxu1 %vm1650_vm2, %v1638_v48  ;;  %3266 = vmatpush1.bf16.msra.mxu0 %v9544_v63  ;;  %v9639_v48 = vld [vmem:[#allocation9 + $0xab4] ss:$24 sps:$4 sm:$0xff]  }
 0x1b9   : > { %3267 = vmatprep.subr.bf16.mxu0 %v9549_v38  ;;  %v9654_v63 = vld [vmem:[#allocation9 + $0xa5c] ss:$24 sps:$4 sm:$0xff]  }
 0x1ba   : > { %8229 = vmatmul.mubr.msk.bf16.vlgmr.msra.gmra.mxu1 %vm1646_vm3, %v9539_v31  ;;  %v9597_v31 = vld [vmem:[#allocation9 + $0x844] ss:$24 sps:$4 sm:$0xff]  }
 0x1bb   : > { %1816 = vmatpush1.bf16.msra.mxu1 %v1658_v13  ;;  %1835 = vmatprep.mubr.bf16.mxu1 %v12088_v54  ;;  %v9645_v13 = vld [vmem:[#allocation9 + $0xa84] ss:$24 sps:$4 sm:$0xff]  }
 0x1bc   : > { %1817 = vmatprep.subr.bf16.mxu1 %v1634_v50  ;;  %3268 = vmatpush1.bf16.msra.mxu0 %v9547_v35  ;;  %v9615_v50 = vld [vmem:[#allocation9 + $0x7b4] ss:$24 sps:$4 sm:$0xff]  }
 0x1bd   : > { %3269 = vmatprep.subr.bf16.mxu0 %v9552_v3 }
 0x1bf   : > { %1818 = vmatpush1.bf16.msra.mxu1 %v1633_v14  ;;  %v9600_v14 = vld [vmem:[#allocation9 + $0x904] ss:$24 sps:$4 sm:$0xff]  }
 0x1c0   : > { %3270 = vmatpush1.bf16.msra.mxu0 %v9550_v11  ;;  %3306 = vmatprep.subr.bf16.mxu1 %v9558_v9 }
 0x1c1   : > { %3271 = vmatprep.subr.bf16.mxu0 %v9555_v32 }
 0x1c2   : > { %8236 = vmatmul.mubr.msk.bf16.vlgmr.msra.gmra.mxu1 %vm1646_vm3, %v9540_v24  ;;  %v9625_v24 = vld [vmem:[#allocation9 + $0xb10] ss:$24 sps:$4 sm:$0xff]  }
 0x1c3   : > { %3307 = vmatpush1.bf16.msra.mxu1 %v9556_v33 }
 0x1c4   : > { %3272 = vmatpush1.bf16.msra.mxu0 %v9553_v34  ;;  %3308 = vmatprep.subr.bf16.mxu1 %v9564_v44 }
 0x1c5   : > { %3273 = vmatprep.subr.bf16.mxu0 %v9561_v2 }
 0x1c7   : > { %3309 = vmatpush1.bf16.msra.mxu1 %v9562_v6 }
 0x1c8   : > { %3274 = vmatpush1.bf16.msra.mxu0 %v9559_v40  ;;  %3310 = vmatprep.subr.bf16.mxu1 %v9570_v21 }
 0x1c9   : > { %3275 = vmatprep.subr.bf16.mxu0 %v9567_v58 }
 0x1cb   : > { %3311 = vmatpush1.bf16.msra.mxu1 %v9568_v23 }
 0x1cc   : > { %3276 = vmatpush1.bf16.msra.mxu0 %v9565_v1  ;;  %3312 = vmatprep.subr.bf16.mxu1 %v9576_v4 }
 0x1cd   : > { %3277 = vmatprep.subr.bf16.mxu0 %v9573_v22 }
 0x1cf   : > { %3313 = vmatpush1.bf16.msra.mxu1 %v9574_v46 }
 0x1d0   : > { %3278 = vmatpush1.bf16.msra.mxu0 %v9571_v10  ;;  %3314 = vmatprep.subr.bf16.mxu1 %v9582_v39 }
 0x1d1   : > { %3279 = vmatprep.subr.bf16.mxu0 %v9579_v5 }
 0x1d3   : > { %3315 = vmatpush1.bf16.msra.mxu1 %v9580_v37 }
 0x1d4   : > { %3280 = vmatpush2.bf16.msra.mxu0 %v9577_v8  ;;  %3316 = vmatprep.subr.bf16.mxu1 %v9588_v43 }
 0x1d5   : > { %3281 = vmatprep.subr.bf16.mxu0 %v9585_v15 }
 0x1d7   : > { %3317 = vmatpush1.bf16.msra.mxu1 %v9586_v26 }
 0x1d8   : > { %3282 = vmatpush2.bf16.msra.mxu0 %v9583_v16  ;;  %3318 = vmatprep.subr.bf16.mxu1 %v9594_v19 }
 0x1d9   : > { %3283 = vmatprep.subr.bf16.mxu0 %v9591_v17 }
 0x1db   : > { %3319 = vmatpush1.bf16.msra.mxu1 %v9592_v25 }
 0x1dc   : > { %3284 = vmatpush2.bf16.msra.mxu0 %v9589_v20  ;;  %3320 = vmatprep.subr.bf16.mxu1 %v9600_v14 }
 0x1dd   : > { %3285 = vmatprep.subr.bf16.mxu0 %v9597_v31 }
 0x1df   : > { %3321 = vmatpush1.bf16.msra.mxu1 %v9598_v41 }
 0x1e0   : > { %3286 = vmatpush2.bf16.msra.mxu0 %v9595_v53  ;;  %3322 = vmatprep.subr.bf16.mxu1 %v9606_v47 }
 0x1e1   : > { %3287 = vmatprep.subr.bf16.mxu0 %v9603_v45 }
 0x1e3   : > { %3323 = vmatpush2.bf16.msra.mxu1 %v9604_v51  ;;  %v9636_v51 = vld [vmem:[#allocation9 + $0x72c] ss:$24 sps:$4 sm:$0xff]  }
 0x1e4   : > { %3288 = vmatpush2.bf16.msra.mxu0 %v9601_v52  ;;  %3324 = vmatprep.subr.bf16.mxu1 %v9612_v7  ;;  %v9628_v52 = vld [vmem:[#allocation9 + $0x758] ss:$24 sps:$4 sm:$0xff]  }
 0x1e5   : > { %3289 = vmatprep.subr.bf16.mxu0 %v9609_v12  ;;  %v9642_v12 = vld [vmem:[#allocation9 + $0x6fc] ss:$24 sps:$4 sm:$0xff]  }
 0x1e7   : > { %3325 = vmatpush2.bf16.msra.mxu1 %v9610_v42 }
 0x1e8   : > { %3290 = vmatpush2.bf16.msra.mxu0 %v9607_v27  ;;  %3326 = vmatprep.subr.bf16.mxu1 %v9618_v49  ;;  %v9634_v27 = vld [vmem:[#allocation9 + $0x728] ss:$24 sps:$4 sm:$0xff]   ;;  %v9640_v49 = vld [vmem:[#allocation9 + $0x6f8] ss:$24 sps:$4 sm:$0xff]  }
 0x1e9   : > { %3291 = vmatprep.subr.bf16.mxu0 %v9615_v50 }
 0x1eb   : > { %3327 = vmatpush2.bf16.msra.mxu1 %v9616_v57 }
 0x1ec   : > { %3292 = vmatpush2.bf16.msra.mxu0 %v9613_v28  ;;  %3328 = vmatprep.subr.bf16.mxu1 %v9624_v60 }
 0x1ed   : > { %3293 = vmatprep.subr.bf16.mxu0 %v9621_v59  ;;  %v9648_v59 = vld [vmem:[#allocation9 + $0x6cc] ss:$24 sps:$4 sm:$0xff]  }
 0x1ef   : > { %3329 = vmatpush2.bf16.msra.mxu1 %v9622_v30 }
 0x1f0   : > { %3294 = vmatpush2.bf16.msra.mxu0 %v9619_v36  ;;  %3330 = vmatprep.subr.bf16.mxu1 %v9627_v55  ;;  %v9646_v55 = vld [vmem:[#allocation9 + $0x6c8] ss:$24 sps:$4 sm:$0xff]  }
 0x1f1   : > { %3349 = vmatprep.subr.bf16.mxu0 %v9630_v0 }
 0x1f3   : > { %3331 = vmatpush2.bf16.msra.mxu1 %v9625_v24 }
 0x1f4   : > { %3332 = vmatprep.subr.bf16.mxu1 %v9633_v29  ;;  %v9651_v29 = vld [vmem:[#allocation9 + $0x69c] ss:$24 sps:$4 sm:$0xff]  }
 0x1f7   : > { %3333 = vmatpush2.bf16.msra.mxu1 %v9631_v56 }
 0x1f8   : > { %3334 = vmatprep.subr.bf16.mxu1 %v9639_v48 }
 0x1fb   : > { %3335 = vmatpush2.bf16.msra.mxu1 %v9637_v61 }
 0x1fc   : > { %3336 = vmatprep.subr.bf16.mxu1 %v9645_v13  ;;  %v9649_v13 = vld [vmem:[#allocation9 + $0x698] ss:$24 sps:$4 sm:$0xff]  }
 0x1ff   : > { %3337 = vmatpush2.bf16.msra.mxu1 %v9643_v62  ;;  %v9652_v62 = vld [vmem:[#allocation9 + $0xa58] ss:$24 sps:$4 sm:$0xff]  }
 0x200   : > { %3392 = vmatprep.subr.bf16.mxu1 %v9654_v63 }
 0x26b   : > { %v1697_v38 = vpop.f32.mrf.mxu0 }
 0x26d   : > { %v1699_v35 = vpop.f32.mrf.mxu0 }
 0x26f   : > { %v1701_v3 = vpop.f32.mrf.mxu0 }
 0x271   : > { %v1703_v11 = vpop.f32.mrf.mxu0 }
 0x273   : > { %v1794_v9 = vpop.f32.mrf.mxu0 }
 0x274   : > { %v1846_v32 = vmax.f32 %v1697_v38, %v1794_v9  ;;  %v9660_v38 = vld [vmem:[#allocation9 + $0xa2c] ss:$24 sps:$4 sm:$0xff]   ;;  %v9666_v9 = vld [vmem:[#allocation9 + $0x9fc] ss:$24 sps:$4 sm:$0xff]  }
 0x275   : > { %v1796_v33 = vpop.f32.mrf.mxu0 }
 0x276   : > { %1854 = vst [vmem:[#allocation2 + $0x30] sm:$0xff] %v1846_v32  ;;  %v1847_v34 = vmax.f32 %v1699_v35, %v1796_v33  ;;  %v9657_v35 = vld [vmem:[#allocation9 + $0x66c] ss:$24 sps:$4 sm:$0xff]   ;;  %v9663_v32 = vld [vmem:[#allocation9 + $0x63c] ss:$24 sps:$4 sm:$0xff]  }
 0x277   : > { %v1798_v44 = vpop.f32.mrf.mxu0  ;;  %v9664_v33 = vld [vmem:[#allocation9 + $0x9f8] ss:$24 sps:$4 sm:$0xff]  }
 0x278   : > { %1855 = vst [vmem:[#allocation2] sm:$0xff] %v1847_v34  ;;  %v1850_v2 = vmax.f32 %v1701_v3, %v1798_v44  ;;  %v9658_v3 = vld [vmem:[#allocation9 + $0xa28] ss:$24 sps:$4 sm:$0xff]   ;;  %v9661_v34 = vld [vmem:[#allocation9 + $0x638] ss:$24 sps:$4 sm:$0xff]  }
 0x279   : > { %v1800_v6 = vpop.f32.mrf.mxu0  ;;  %v9672_v44 = vld [vmem:[#allocation9 + $0x9cc] ss:$24 sps:$4 sm:$0xff]  }
 0x27a   : > { %1858 = vst [vmem:[#allocation2 + $0x8] sm:$0x1f] %v1850_v2  ;;  %v1851_v40 = vmax.f32 %v1703_v11, %v1800_v6  ;;  %v1740_v21 = vpop.f32.mrf.mxu1  ;;  %v9655_v11 = vld [vmem:[#allocation9 + $0x668] ss:$24 sps:$4 sm:$0xff]   ;;  %v9669_v2 = vld [vmem:[#allocation9 + $0x60c] ss:$24 sps:$4 sm:$0xff]  }
 0x27b   : > { %v9670_v6 = vld [vmem:[#allocation9 + $0x9c8] ss:$24 sps:$4 sm:$0xff]  }
 0x27c   : > { %1859 = vst [vmem:[#allocation2 + $0x20] sm:$0x1f] %v1851_v40  ;;  %v1742_v58 = vpop.f32.mrf.mxu1  ;;  %v9667_v40 = vld [vmem:[#allocation9 + $0x608] ss:$24 sps:$4 sm:$0xff]  }
 0x27d   : > { %v2066_v1 = vld [vmem:[#allocation2 + $0x30] sm:$0xfe] }
 0x27e   : > { %v1744_v23 = vpop.f32.mrf.mxu1 }
 0x27f   : > { %v2067_v22 = vld [vmem:[#allocation2] sm:$0xfe] }
 0x280   : > { %v1746_v4 = vpop.f32.mrf.mxu1 }
 0x281   : > { %v2070_v46 = vld [vmem:[#allocation2 + $0x8] sm:$0xf] }
 0x282   : > { %v1837_v10 = vpop.f32.mrf.mxu1  ;;  %v2074_v5 = vpack.c.bf16 %v2070_v46, %v2066_v1  ;;  %v9673_v1 = vld [vmem:[#allocation9 + $0x8d8] ss:$24 sps:$4 sm:$0xff]   ;;  %v9682_v46 = vld [vmem:[#allocation9 + $0x968] ss:$24 sps:$4 sm:$0xff]  }
 0x283   : > { %v1848_v39 = vmax.f32 %v1740_v21, %v1837_v10  ;;  %v2071_v8 = vld [vmem:[#allocation2 + $0x20] sm:$0xf]  ;;  %v9678_v21 = vld [vmem:[#allocation9 + $0x99c] ss:$24 sps:$4 sm:$0xff]  }
 0x284   : > { %v1839_v37 = vpop.f32.mrf.mxu1  ;;  %v2075_v15 = vpack.c.bf16 %v2071_v8, %v2067_v22  ;;  %v2274_v43 = vshll.u32 %v2074_v5, 16  ;;  %v2272_v26 = vshrl.u32 %v2074_v5, 16  ;;  %v9681_v22 = vld [vmem:[#allocation9 + $0x8ac] ss:$24 sps:$4 sm:$0xff]   ;;  %v9679_v10 = vld [vmem:[#allocation9 + $0x8a8] ss:$24 sps:$4 sm:$0xff]  }
 0x285   : > { %1856 = vst [vmem:[#allocation2 + $0x18] sm:$0xff] %v1848_v39  ;;  %v11358_v16 = vmax.f32 %v1742_v58, %v1839_v37  ;;  %v9675_v58 = vld [vmem:[#allocation9 + $0x8dc] ss:$24 sps:$4 sm:$0xff]   ;;  %v9688_v8 = vld [vmem:[#allocation9 + $0x938] ss:$24 sps:$4 sm:$0xff]  }
 0x286   : > { %v1841_v17 = vpop.f32.mrf.mxu1  ;;  %v2279_v19 = vshrl.u32 %v2075_v15, 16  ;;  %v2281_v20 = vshll.u32 %v2075_v15, 16  ;;  %v2276_v25 = vrot.slane %v2274_v43, 1  ;;  %v9690_v5 = vld [vmem:[#allocation9 + $0x93c] ss:$24 sps:$4 sm:$0xff]  }
 0x287   : > { %1857 = vst [vmem:[#allocation2 + $0x10] sm:$0xff] %v11358_v16  ;;  %v1852_v31 = vmax.f32 %v1744_v23, %v1841_v17  ;;  %v9676_v23 = vld [vmem:[#allocation9 + $0x998] ss:$24 sps:$4 sm:$0xff]   ;;  %v9687_v39 = vld [vmem:[#allocation9 + $0x87c] ss:$24 sps:$4 sm:$0xff]  }
 0x288   : > { %v1843_v14 = vpop.f32.mrf.mxu1  ;;  %v2283_v53 = vrot.slane %v2281_v20, 1  ;;  %v11361_v45 = vor.u32 %v2276_v25, %v2272_v26  ;;  %v9685_v37 = vld [vmem:[#allocation9 + $0x878] ss:$24 sps:$4 sm:$0xff]   ;;  %v9696_v15 = vld [vmem:[#allocation9 + $0x90c] ss:$24 sps:$4 sm:$0xff]  }
 0x289   : > { %1860 = vst [vmem:[#allocation2 + $0x28] sm:$0x1f] %v1852_v31  ;;  %v1853_v41 = vmax.f32 %v1746_v4, %v1843_v14  ;;  %v9684_v4 = vld [vmem:[#allocation9 + $0x96c] ss:$24 sps:$4 sm:$0xff]   ;;  %v9694_v26 = vld [vmem:[#allocation9 + $0x908] ss:$24 sps:$4 sm:$0xff]  }
 0x28a   : > { %v11363_v47 = vor.u32 %v2283_v53, %v2279_v19  ;;  %v9693_v43 = vld [vmem:[#allocation9 + $0x84c] ss:$24 sps:$4 sm:$0xff]   ;;  %v9691_v17 = vld [vmem:[#allocation9 + $0x848] ss:$24 sps:$4 sm:$0xff]   ;;  %v9702_v19 = vld [vmem:[#allocation9 + $0xbdc] ss:$24 sps:$4 sm:$0xff]  }
 0x28b   : > { %1861 = vst [vmem:[#allocation2 + $0x38] sm:$0x1f] %v1853_v41  ;;  %v9699_v20 = vld [vmem:[#allocation9 + $0x81c] ss:$24 sps:$4 sm:$0xff]   ;;  %v9700_v25 = vld [vmem:[#allocation9 + $0xbd8] ss:$24 sps:$4 sm:$0xff]  }
 0x28c   : > { %3295 = vmatprep.mubr.bf16.mxu0 %v11363_v47  ;;  %v2068_v42 = vld [vmem:[#allocation2 + $0x18] sm:$0xfe]  ;;  %v9708_v14 = vld [vmem:[#allocation9 + $0xbac] ss:$24 sps:$4 sm:$0xff]   ;;  %v9706_v41 = vld [vmem:[#allocation9 + $0xba8] ss:$24 sps:$4 sm:$0xff]  }
 0x28d   : > { %3296 = vmatmul.mubr.bf16.vlgmr.msra.gmra.mxu0 %v11361_v45  ;;  %v9697_v31 = vld [vmem:[#allocation9 + $0x818] ss:$24 sps:$4 sm:$0xff]   ;;  %v9705_v53 = vld [vmem:[#allocation9 + $0x7ec] ss:$24 sps:$4 sm:$0xff]  }
 0x28e   : > { %3350 = vmatpush1.bf16.msra.mxu0 %v9628_v52  ;;  %3381 = vmatprep.mubr.bf16.mxu0 %v11363_v47  ;;  %v2069_v28 = vld [vmem:[#allocation2 + $0x10] sm:$0xfe]  ;;  %v9703_v52 = vld [vmem:[#allocation9 + $0x7e8] ss:$24 sps:$4 sm:$0xff]  }
 0x28f   : > { %3351 = vmatprep.subr.bf16.mxu0 %v9636_v51  ;;  %v9714_v51 = vld [vmem:[#allocation9 + $0xb7c] ss:$24 sps:$4 sm:$0xff]  }
 0x290   : > { %v2072_v7 = vld [vmem:[#allocation2 + $0x28] sm:$0xf] }
 0x291   : > { %v2076_v50 = vpack.c.bf16 %v2072_v7, %v2068_v42  ;;  %v9709_v42 = vld [vmem:[#allocation9 + $0x7b8] ss:$24 sps:$4 sm:$0xff]   ;;  %v9720_v7 = vld [vmem:[#allocation9 + $0xb4c] ss:$24 sps:$4 sm:$0xff]  }
 0x292   : > { %3352 = vmatpush1.bf16.msra.mxu0 %v9634_v27  ;;  %v2073_v57 = vld [vmem:[#allocation2 + $0x38] sm:$0xf]  ;;  %v9711_v27 = vld [vmem:[#allocation9 + $0x7bc] ss:$24 sps:$4 sm:$0xff]  }
 0x293   : > { %3353 = vmatprep.subr.bf16.mxu0 %v9642_v12  ;;  %v2077_v60 = vpack.c.bf16 %v2073_v57, %v2069_v28  ;;  %v2288_v36 = vshll.u32 %v2076_v50, 16  ;;  %v2286_v61 = vshrl.u32 %v2076_v50, 16  ;;  %v9712_v12 = vld [vmem:[#allocation9 + $0xb78] ss:$24 sps:$4 sm:$0xff]   ;;  %v9717_v50 = vld [vmem:[#allocation9 + $0x78c] ss:$24 sps:$4 sm:$0xff]  }
 0x294   : > { %v9715_v28 = vld [vmem:[#allocation9 + $0x788] ss:$24 sps:$4 sm:$0xff]   ;;  %v9723_v57 = vld [vmem:[#allocation9 + $0xb1c] ss:$24 sps:$4 sm:$0xff]  }
 0x295   : > { %v2295_v30 = vshll.u32 %v2077_v60, 16  ;;  %v2290_v0 = vrot.slane %v2288_v36, 1  ;;  %v2293_v24 = vshrl.u32 %v2077_v60, 16  ;;  %v9721_v60 = vld [vmem:[#allocation9 + $0xb18] ss:$24 sps:$4 sm:$0xff]  }
 0x296   : > { %3354 = vmatpush1.bf16.msra.mxu0 %v9640_v49  ;;  %v9718_v49 = vld [vmem:[#allocation9 + $0xb48] ss:$24 sps:$4 sm:$0xff]  }
 0x297   : > { %3355 = vmatprep.subr.bf16.mxu0 %v9648_v59  ;;  %v2297_v56 = vrot.slane %v2295_v30, 1  ;;  %v11370_v63 = vor.u32 %v2290_v0, %v2286_v61  ;;  %v9726_v59 = vld [vmem:[#allocation9 + $0x764] ss:$24 sps:$4 sm:$0xff]   ;;  %v9724_v36 = vld [vmem:[#allocation9 + $0x760] ss:$24 sps:$4 sm:$0xff]  }
 0x298   : > { %v9729_v30 = vld [vmem:[#allocation9 + $0xaec] ss:$24 sps:$4 sm:$0xff]   ;;  %v9727_v0 = vld [vmem:[#allocation9 + $0xae8] ss:$24 sps:$4 sm:$0xff]   ;;  %v9733_v61 = vld [vmem:[#allocation9 + $0xab8] ss:$24 sps:$4 sm:$0xff]  }
 0x299   : > { %v11368_v48 = vor.u32 %v2297_v56, %v2293_v24  ;;  %v9730_v24 = vld [vmem:[#allocation9 + $0x730] ss:$24 sps:$4 sm:$0xff]   ;;  %v9735_v56 = vld [vmem:[#allocation9 + $0xabc] ss:$24 sps:$4 sm:$0xff]  }
 0x29a   : > { %3356 = vmatpush1.bf16.msra.mxu0 %v9646_v55  ;;  %v9732_v55 = vld [vmem:[#allocation9 + $0x734] ss:$24 sps:$4 sm:$0xff]  }
 0x29b   : > { %3338 = vmatprep.mubr.bf16.mxu1 %v11368_v48  ;;  %3357 = vmatprep.subr.bf16.mxu0 %v9651_v29  ;;  %v9738_v29 = vld [vmem:[#allocation9 + $0x704] ss:$24 sps:$4 sm:$0xff]  }
 0x29c   : > { %3339 = vmatmul.mubr.bf16.vlgmr.msra.gmra.mxu1 %v11370_v63 }
 0x29d   : > { %3393 = vmatpush1.bf16.msra.mxu1 %v9652_v62  ;;  %3424 = vmatprep.mubr.bf16.mxu1 %v11368_v48  ;;  %v9736_v62 = vld [vmem:[#allocation9 + $0x700] ss:$24 sps:$4 sm:$0xff]  }
 0x29e   : > { %3358 = vmatpush1.bf16.msra.mxu0 %v9649_v13  ;;  %3394 = vmatprep.subr.bf16.mxu1 %v9660_v38  ;;  %v9741_v13 = vld [vmem:[#allocation9 + $0xa8c] ss:$24 sps:$4 sm:$0xff]  }
 0x29f   : > { %3359 = vmatprep.subr.bf16.mxu0 %v9657_v35  ;;  %v9744_v38 = vld [vmem:[#allocation9 + $0x6d4] ss:$24 sps:$4 sm:$0xff]   ;;  %v9739_v35 = vld [vmem:[#allocation9 + $0xa88] ss:$24 sps:$4 sm:$0xff]  }
 0x2a1   : > { %3395 = vmatpush1.bf16.msra.mxu1 %v9658_v3  ;;  %v9742_v3 = vld [vmem:[#allocation9 + $0x6d0] ss:$24 sps:$4 sm:$0xff]  }
 0x2a2   : > { %3360 = vmatpush1.bf16.msra.mxu0 %v9655_v11  ;;  %3396 = vmatprep.subr.bf16.mxu1 %v9666_v9  ;;  %v9750_v11 = vld [vmem:[#allocation9 + $0xa64] ss:$24 sps:$4 sm:$0xff]   ;;  %v9748_v9 = vld [vmem:[#allocation9 + $0xa60] ss:$24 sps:$4 sm:$0xff]  }
 0x2a3   : > { %3361 = vmatprep.subr.bf16.mxu0 %v9663_v32  ;;  %v9745_v32 = vld [vmem:[#allocation9 + $0x6a0] ss:$24 sps:$4 sm:$0xff]  }
 0x2a5   : > { %3397 = vmatpush1.bf16.msra.mxu1 %v9664_v33  ;;  %v9756_v33 = vld [vmem:[#allocation9 + $0xa34] ss:$24 sps:$4 sm:$0xff]  }
 0x2a6   : > { %3362 = vmatpush1.bf16.msra.mxu0 %v9661_v34  ;;  %3398 = vmatprep.subr.bf16.mxu1 %v9672_v44  ;;  %v9753_v34 = vld [vmem:[#allocation9 + $0x674] ss:$24 sps:$4 sm:$0xff]   ;;  %v9754_v44 = vld [vmem:[#allocation9 + $0xa30] ss:$24 sps:$4 sm:$0xff]  }
 0x2a7   : > { %3363 = vmatprep.subr.bf16.mxu0 %v9669_v2  ;;  %v9751_v2 = vld [vmem:[#allocation9 + $0x670] ss:$24 sps:$4 sm:$0xff]  }
 0x2a9   : > { %3399 = vmatpush1.bf16.msra.mxu1 %v9670_v6  ;;  %v9762_v6 = vld [vmem:[#allocation9 + $0xa04] ss:$24 sps:$4 sm:$0xff]  }
 0x2aa   : > { %3364 = vmatpush1.bf16.msra.mxu0 %v9667_v40  ;;  %3400 = vmatprep.subr.bf16.mxu1 %v9678_v21  ;;  %v9759_v40 = vld [vmem:[#allocation9 + $0x644] ss:$24 sps:$4 sm:$0xff]   ;;  %v9760_v21 = vld [vmem:[#allocation9 + $0xa00] ss:$24 sps:$4 sm:$0xff]  }
 0x2ab   : > { %3365 = vmatprep.subr.bf16.mxu0 %v9675_v58  ;;  %v9757_v58 = vld [vmem:[#allocation9 + $0x640] ss:$24 sps:$4 sm:$0xff]  }
 0x2ad   : > { %3401 = vmatpush1.bf16.msra.mxu1 %v9676_v23  ;;  %v9768_v23 = vld [vmem:[#allocation9 + $0x9d4] ss:$24 sps:$4 sm:$0xff]  }
 0x2ae   : > { %3366 = vmatpush2.bf16.msra.mxu0 %v9673_v1  ;;  %3402 = vmatprep.subr.bf16.mxu1 %v9684_v4  ;;  %v9765_v1 = vld [vmem:[#allocation9 + $0x614] ss:$24 sps:$4 sm:$0xff]   ;;  %v9766_v4 = vld [vmem:[#allocation9 + $0x9d0] ss:$24 sps:$4 sm:$0xff]  }
 0x2af   : > { %3367 = vmatprep.subr.bf16.mxu0 %v9681_v22  ;;  %v9763_v22 = vld [vmem:[#allocation9 + $0x610] ss:$24 sps:$4 sm:$0xff]  }
 0x2b1   : > { %3403 = vmatpush1.bf16.msra.mxu1 %v9682_v46  ;;  %v9771_v46 = vld [vmem:[#allocation9 + $0x8e4] ss:$24 sps:$4 sm:$0xff]  }
 0x2b2   : > { %3368 = vmatpush2.bf16.msra.mxu0 %v9679_v10  ;;  %3404 = vmatprep.subr.bf16.mxu1 %v9690_v5  ;;  %v9772_v10 = vld [vmem:[#allocation9 + $0x9a0] ss:$24 sps:$4 sm:$0xff]  }
 0x2b3   : > { %3369 = vmatprep.subr.bf16.mxu0 %v9687_v39  ;;  %v9769_v5 = vld [vmem:[#allocation9 + $0x8e0] ss:$24 sps:$4 sm:$0xff]   ;;  %v9780_v39 = vld [vmem:[#allocation9 + $0x974] ss:$24 sps:$4 sm:$0xff]  }
 0x2b5   : > { %3405 = vmatpush1.bf16.msra.mxu1 %v9688_v8  ;;  %v9777_v8 = vld [vmem:[#allocation9 + $0x8b4] ss:$24 sps:$4 sm:$0xff]  }
 0x2b6   : > { %3370 = vmatpush2.bf16.msra.mxu0 %v9685_v37  ;;  %3406 = vmatprep.subr.bf16.mxu1 %v9696_v15  ;;  %v9778_v37 = vld [vmem:[#allocation9 + $0x970] ss:$24 sps:$4 sm:$0xff]  }
 0x2b7   : > { %3371 = vmatprep.subr.bf16.mxu0 %v9693_v43  ;;  %v9775_v15 = vld [vmem:[#allocation9 + $0x8b0] ss:$24 sps:$4 sm:$0xff]   ;;  %v9786_v43 = vld [vmem:[#allocation9 + $0x944] ss:$24 sps:$4 sm:$0xff]  }
 0x2b9   : > { %3407 = vmatpush1.bf16.msra.mxu1 %v9694_v26  ;;  %v9783_v26 = vld [vmem:[#allocation9 + $0x884] ss:$24 sps:$4 sm:$0xff]  }
 0x2ba   : > { %3372 = vmatpush2.bf16.msra.mxu0 %v9691_v17  ;;  %3408 = vmatprep.subr.bf16.mxu1 %v9702_v19  ;;  %v9784_v17 = vld [vmem:[#allocation9 + $0x940] ss:$24 sps:$4 sm:$0xff]  }
 0x2bb   : > { %3373 = vmatprep.subr.bf16.mxu0 %v9699_v20  ;;  %v9781_v19 = vld [vmem:[#allocation9 + $0x880] ss:$24 sps:$4 sm:$0xff]   ;;  %v9792_v20 = vld [vmem:[#allocation9 + $0x914] ss:$24 sps:$4 sm:$0xff]  }
 0x2bd   : > { %3409 = vmatpush2.bf16.msra.mxu1 %v9700_v25  ;;  %v9789_v25 = vld [vmem:[#allocation9 + $0x854] ss:$24 sps:$4 sm:$0xff]  }
 0x2be   : > { %3374 = vmatpush2.bf16.msra.mxu0 %v9697_v31  ;;  %3410 = vmatprep.subr.bf16.mxu1 %v9708_v14  ;;  %v9790_v31 = vld [vmem:[#allocation9 + $0x910] ss:$24 sps:$4 sm:$0xff]  }
 0x2bf   : > { %3375 = vmatprep.subr.bf16.mxu0 %v9705_v53  ;;  %v9787_v14 = vld [vmem:[#allocation9 + $0x850] ss:$24 sps:$4 sm:$0xff]   ;;  %v9798_v53 = vld [vmem:[#allocation9 + $0xbe4] ss:$24 sps:$4 sm:$0xff]  }
 0x2c1   : > { %3411 = vmatpush2.bf16.msra.mxu1 %v9706_v41  ;;  %v9795_v41 = vld [vmem:[#allocation9 + $0x824] ss:$24 sps:$4 sm:$0xff]  }
 0x2c2   : > { %3376 = vmatpush2.bf16.msra.mxu0 %v9703_v52  ;;  %3412 = vmatprep.subr.bf16.mxu1 %v9714_v51  ;;  %v9796_v52 = vld [vmem:[#allocation9 + $0xbe0] ss:$24 sps:$4 sm:$0xff]  }
 0x2c3   : > { %3377 = vmatprep.subr.bf16.mxu0 %v9711_v27  ;;  %v9793_v51 = vld [vmem:[#allocation9 + $0x820] ss:$24 sps:$4 sm:$0xff]   ;;  %v9804_v27 = vld [vmem:[#allocation9 + $0xbb4] ss:$24 sps:$4 sm:$0xff]  }
 0x2c5   : > { %3413 = vmatpush2.bf16.msra.mxu1 %v9712_v12  ;;  %v9801_v12 = vld [vmem:[#allocation9 + $0x7f4] ss:$24 sps:$4 sm:$0xff]  }
 0x2c6   : > { %3378 = vmatpush2.bf16.msra.mxu0 %v9709_v42  ;;  %3414 = vmatprep.subr.bf16.mxu1 %v9720_v7  ;;  %v9802_v42 = vld [vmem:[#allocation9 + $0xbb0] ss:$24 sps:$4 sm:$0xff]  }
 0x2c7   : > { %3379 = vmatprep.subr.bf16.mxu0 %v9717_v50  ;;  %v9799_v7 = vld [vmem:[#allocation9 + $0x7f0] ss:$24 sps:$4 sm:$0xff]   ;;  %v9810_v50 = vld [vmem:[#allocation9 + $0xb84] ss:$24 sps:$4 sm:$0xff]  }
 0x2c9   : > { %3415 = vmatpush2.bf16.msra.mxu1 %v9718_v49  ;;  %v9807_v49 = vld [vmem:[#allocation9 + $0x7c4] ss:$24 sps:$4 sm:$0xff]  }
 0x2ca   : > { %3380 = vmatpush2.bf16.msra.mxu0 %v9715_v28  ;;  %3416 = vmatprep.subr.bf16.mxu1 %v9723_v57  ;;  %v9808_v28 = vld [vmem:[#allocation9 + $0xb80] ss:$24 sps:$4 sm:$0xff]  }
 0x2cb   : > { %3435 = vmatprep.subr.bf16.mxu0 %v9726_v59  ;;  %v9805_v57 = vld [vmem:[#allocation9 + $0x7c0] ss:$24 sps:$4 sm:$0xff]   ;;  %v9816_v59 = vld [vmem:[#allocation9 + $0xb54] ss:$24 sps:$4 sm:$0xff]  }
 0x2cd   : > { %3382 = vmatmul.mubr.bf16.vlgmr.msra.gmra.mxu0 %v11361_v45  ;;  %3417 = vmatpush2.bf16.msra.mxu1 %v9721_v60  ;;  %v9813_v60 = vld [vmem:[#allocation9 + $0x794] ss:$24 sps:$4 sm:$0xff]  }
 0x2ce   : > { %3436 = vmatpush1.bf16.msra.mxu0 %v9724_v36  ;;  %3467 = vmatprep.mubr.bf16.mxu0 %v11363_v47  ;;  %v9747_v47 = vld [vmem:[#allocation9 + $0x6a4] ss:$24 sps:$4 sm:$0xff]   ;;  %v9814_v36 = vld [vmem:[#allocation9 + $0xb50] ss:$24 sps:$4 sm:$0xff]  }
 0x2cf   : > { %3418 = vmatprep.subr.bf16.mxu1 %v9729_v30  ;;  %3437 = vmatprep.subr.bf16.mxu0 %v9732_v55  ;;  %v9811_v30 = vld [vmem:[#allocation9 + $0x790] ss:$24 sps:$4 sm:$0xff]   ;;  %v9819_v55 = vld [vmem:[#allocation9 + $0xb24] ss:$24 sps:$4 sm:$0xff]  }
 0x2d1   : > { %3419 = vmatpush2.bf16.msra.mxu1 %v9727_v0  ;;  %v9822_v0 = vld [vmem:[#allocation9 + $0x154] ss:$24 sps:$4 sm:$0xff]  }
 0x2d2   : > { %3438 = vmatpush1.bf16.msra.mxu0 %v9730_v24  ;;  %3420 = vmatprep.subr.bf16.mxu1 %v9735_v56  ;;  %v9817_v24 = vld [vmem:[#allocation9 + $0xb20] ss:$24 sps:$4 sm:$0xff]  }
 0x2d3   : > { %3439 = vmatprep.subr.bf16.mxu0 %v9738_v29  ;;  %v1863_v56 = vld [vmem:[#allocation2] sm:$0xff] }
 0x2d4   : > { %v1867_v29 = vld [vmem:[#allocation2 + $0x20] sm:$0x7] }
 0x2d5   : > { %3421 = vmatpush2.bf16.msra.mxu1 %v9733_v61  ;;  %v9820_v61 = vld [vmem:[#allocation9 + $0x150] ss:$24 sps:$4 sm:$0xff]  }
 0x2d6   : > { %3440 = vmatpush1.bf16.msra.mxu0 %v9736_v62  ;;  %3422 = vmatprep.subr.bf16.mxu1 %v9741_v13  ;;  %v9825_v62 = vld [vmem:[#allocation9 + $0xaf4] ss:$24 sps:$4 sm:$0xff]   ;;  %v9828_v13 = vld [vmem:[#allocation9 + $0x124] ss:$24 sps:$4 sm:$0xff]  }
 0x2d7   : > { %3441 = vmatprep.subr.bf16.mxu0 %v9744_v38  ;;  %v11379_v38 = vpack.c.bf16 %v1867_v29, %v1863_v56  ;;  %v9912_v56 = vld [vmem:[#allocation9 + $0x544] ss:$24 sps:$4 sm:$0xff]  }
 0x2d8   : > { %v9909_v29 = vld [vmem:[#allocation9 + $0x184] ss:$24 sps:$4 sm:$0xff]  }
 0x2d9   : > { %3423 = vmatpush2.bf16.msra.mxu1 %v9739_v35  ;;  %v9823_v35 = vld [vmem:[#allocation9 + $0xaf0] ss:$24 sps:$4 sm:$0xff]  }
 0x2da   : > { %3442 = vmatpush1.bf16.msra.mxu0 %v9742_v3  ;;  %3478 = vmatprep.subr.bf16.mxu1 %v9750_v11  ;;  %v9826_v3 = vld [vmem:[#allocation9 + $0x120] ss:$24 sps:$4 sm:$0xff]   ;;  %v9831_v11 = vld [vmem:[#allocation9 + $0xac4] ss:$24 sps:$4 sm:$0xff]  }
 0x2db   : > { %3443 = vmatprep.subr.bf16.mxu0 %v9747_v47  ;;  %v9834_v47 = vld [vmem:[#allocation9 + $0xf4] ss:$24 sps:$4 sm:$0xff]  }
 0x2dc   : > { %3425 = vmatmul.mubr.bf16.vlgmr.msra.gmra.mxu1 %v11370_v63 }
 0x2dd   : > { %3479 = vmatpush1.bf16.msra.mxu1 %v9748_v9  ;;  %3510 = vmatprep.mubr.bf16.mxu1 %v11368_v48  ;;  %v9774_v48 = vld [vmem:[#allocation9 + $0x9a4] ss:$24 sps:$4 sm:$0xff]   ;;  %v9829_v9 = vld [vmem:[#allocation9 + $0xac0] ss:$24 sps:$4 sm:$0xff]  }
 0x2de   : > { %3444 = vmatpush1.bf16.msra.mxu0 %v9745_v32  ;;  %3480 = vmatprep.subr.bf16.mxu1 %v9756_v33  ;;  %v9832_v32 = vld [vmem:[#allocation9 + $0xf0] ss:$24 sps:$4 sm:$0xff]   ;;  %v9837_v33 = vld [vmem:[#allocation9 + $0xa94] ss:$24 sps:$4 sm:$0xff]  }
 0x2df   : > { %3445 = vmatprep.subr.bf16.mxu0 %v9753_v34  ;;  %v9840_v34 = vld [vmem:[#allocation9 + $0xc4] ss:$24 sps:$4 sm:$0xff]  }
 0x2e1   : > { %3481 = vmatpush1.bf16.msra.mxu1 %v9754_v44  ;;  %v9838_v44 = vld [vmem:[#allocation9 + $0xc0] ss:$24 sps:$4 sm:$0xff]  }
 0x2e2   : > { %3446 = vmatpush1.bf16.msra.mxu0 %v9751_v2  ;;  %3482 = vmatprep.subr.bf16.mxu1 %v9762_v6  ;;  %v9846_v2 = vld [vmem:[#allocation9 + $0x454] ss:$24 sps:$4 sm:$0xff]  }
 0x2e3   : > { %3447 = vmatprep.subr.bf16.mxu0 %v9759_v40  ;;  %v9843_v6 = vld [vmem:[#allocation9 + $0x94] ss:$24 sps:$4 sm:$0xff]   ;;  %v1869_v40 = vld [vmem:[#allocation2 + $0x38] sm:$0x7] }
 0x2e5   : > { %3483 = vmatpush1.bf16.msra.mxu1 %v9760_v21  ;;  %v9844_v21 = vld [vmem:[#allocation9 + $0x450] ss:$24 sps:$4 sm:$0xff]  }
 0x2e6   : > { %3448 = vmatpush1.bf16.msra.mxu0 %v9757_v58  ;;  %3484 = vmatprep.subr.bf16.mxu1 %v9768_v23  ;;  %v9841_v58 = vld [vmem:[#allocation9 + $0x90] ss:$24 sps:$4 sm:$0xff]   ;;  %v9852_v23 = vld [vmem:[#allocation9 + $0x424] ss:$24 sps:$4 sm:$0xff]  }
 0x2e7   : > { %3449 = vmatprep.subr.bf16.mxu0 %v9765_v1  ;;  %v11384_v1 = vpack.c.bf16 %v1869_v40, %v11358_v16  ;;  %v9864_v16 = vld [vmem:[#allocation9 + $0x3c4] ss:$24 sps:$4 sm:$0xff]   ;;  %v9925_v40 = vld [vmem:[#allocation9 + $0x4b0] ss:$24 sps:$4 sm:$0xff]  }
 0x2e9   : > { %3485 = vmatpush1.bf16.msra.mxu1 %v9766_v4  ;;  %v9849_v4 = vld [vmem:[#allocation9 + $0x64] ss:$24 sps:$4 sm:$0xff]  }
 0x2ea   : > { %3450 = vmatpush1.bf16.msra.mxu0 %v9763_v22  ;;  %3486 = vmatprep.subr.bf16.mxu1 %v9774_v48  ;;  %v9850_v22 = vld [vmem:[#allocation9 + $0x420] ss:$24 sps:$4 sm:$0xff]  }
 0x2eb   : > { %3451 = vmatprep.subr.bf16.mxu0 %v9771_v46  ;;  %v9847_v48 = vld [vmem:[#allocation9 + $0x60] ss:$24 sps:$4 sm:$0xff]   ;;  %v9858_v46 = vld [vmem:[#allocation9 + $0x3f4] ss:$24 sps:$4 sm:$0xff]  }
 0x2ed   : > { %3487 = vmatpush1.bf16.msra.mxu1 %v9772_v10  ;;  %v9855_v10 = vld [vmem:[#allocation9 + $0x34] ss:$24 sps:$4 sm:$0xff]  }
 0x2ee   : > { %3452 = vmatpush2.bf16.msra.mxu0 %v9769_v5  ;;  %3488 = vmatprep.subr.bf16.mxu1 %v9780_v39  ;;  %v9856_v5 = vld [vmem:[#allocation9 + $0x3f0] ss:$24 sps:$4 sm:$0xff]  }
 0x2ef   : > { %3453 = vmatprep.subr.bf16.mxu0 %v9777_v8  ;;  %v9853_v39 = vld [vmem:[#allocation9 + $0x30] ss:$24 sps:$4 sm:$0xff]   ;;  %v9861_v8 = vld [vmem:[#allocation9 + $0x4] ss:$24 sps:$4 sm:$0xff]  }
 0x2f1   : > { %3489 = vmatpush1.bf16.msra.mxu1 %v9778_v37  ;;  %v9859_v37 = vld [vmem:[#allocation9] ss:$24 sps:$4 sm:$0xff]  }
 0x2f2   : > { %3454 = vmatpush2.bf16.msra.mxu0 %v9775_v15  ;;  %3490 = vmatprep.subr.bf16.mxu1 %v9786_v43  ;;  %v9870_v15 = vld [vmem:[#allocation9 + $0x394] ss:$24 sps:$4 sm:$0xff]  }
 0x2f3   : > { %3455 = vmatprep.subr.bf16.mxu0 %v9783_v26  ;;  %v9867_v43 = vld [vmem:[#allocation9 + $0x2d4] ss:$24 sps:$4 sm:$0xff]   ;;  %v9868_v26 = vld [vmem:[#allocation9 + $0x390] ss:$24 sps:$4 sm:$0xff]  }
 0x2f5   : > { %3491 = vmatpush1.bf16.msra.mxu1 %v9784_v17  ;;  %v9865_v17 = vld [vmem:[#allocation9 + $0x2d0] ss:$24 sps:$4 sm:$0xff]  }
 0x2f6   : > { %3456 = vmatpush2.bf16.msra.mxu0 %v9781_v19  ;;  %3492 = vmatprep.subr.bf16.mxu1 %v9792_v20  ;;  %v9876_v19 = vld [vmem:[#allocation9 + $0x364] ss:$24 sps:$4 sm:$0xff]  }
 0x2f7   : > { %3457 = vmatprep.subr.bf16.mxu0 %v9789_v25  ;;  %v9873_v20 = vld [vmem:[#allocation9 + $0x2a4] ss:$24 sps:$4 sm:$0xff]   ;;  %v9874_v25 = vld [vmem:[#allocation9 + $0x360] ss:$24 sps:$4 sm:$0xff]  }
 0x2f9   : > { %3493 = vmatpush1.bf16.msra.mxu1 %v9790_v31  ;;  %v9871_v31 = vld [vmem:[#allocation9 + $0x2a0] ss:$24 sps:$4 sm:$0xff]  }
 0x2fa   : > { %3458 = vmatpush2.bf16.msra.mxu0 %v9787_v14  ;;  %3494 = vmatprep.subr.bf16.mxu1 %v9798_v53  ;;  %v9882_v14 = vld [vmem:[#allocation9 + $0x334] ss:$24 sps:$4 sm:$0xff]  }
 0x2fb   : > { %3459 = vmatprep.subr.bf16.mxu0 %v9795_v41  ;;  %v9879_v53 = vld [vmem:[#allocation9 + $0x274] ss:$24 sps:$4 sm:$0xff]   ;;  %v9880_v41 = vld [vmem:[#allocation9 + $0x330] ss:$24 sps:$4 sm:$0xff]  }
 0x2fd   : > { %3495 = vmatpush2.bf16.msra.mxu1 %v9796_v52  ;;  %v9877_v52 = vld [vmem:[#allocation9 + $0x270] ss:$24 sps:$4 sm:$0xff]  }
 0x2fe   : > { %3460 = vmatpush2.bf16.msra.mxu0 %v9793_v51  ;;  %3496 = vmatprep.subr.bf16.mxu1 %v9804_v27  ;;  %v9888_v51 = vld [vmem:[#allocation9 + $0x304] ss:$24 sps:$4 sm:$0xff]  }
 0x2ff   : > { %3461 = vmatprep.subr.bf16.mxu0 %v9801_v12  ;;  %v9885_v27 = vld [vmem:[#allocation9 + $0x244] ss:$24 sps:$4 sm:$0xff]   ;;  %v9886_v12 = vld [vmem:[#allocation9 + $0x300] ss:$24 sps:$4 sm:$0xff]  }
 0x301   : > { %3497 = vmatpush2.bf16.msra.mxu1 %v9802_v42  ;;  %v9883_v42 = vld [vmem:[#allocation9 + $0x240] ss:$24 sps:$4 sm:$0xff]  }
 0x302   : > { %3462 = vmatpush2.bf16.msra.mxu0 %v9799_v7  ;;  %3498 = vmatprep.subr.bf16.mxu1 %v9810_v50  ;;  %v9894_v7 = vld [vmem:[#allocation9 + $0x5d4] ss:$24 sps:$4 sm:$0xff]  }
 0x303   : > { %3463 = vmatprep.subr.bf16.mxu0 %v9807_v49  ;;  %v9891_v50 = vld [vmem:[#allocation9 + $0x214] ss:$24 sps:$4 sm:$0xff]   ;;  %v9892_v49 = vld [vmem:[#allocation9 + $0x5d0] ss:$24 sps:$4 sm:$0xff]  }
 0x305   : > { %3499 = vmatpush2.bf16.msra.mxu1 %v9808_v28  ;;  %v9889_v28 = vld [vmem:[#allocation9 + $0x210] ss:$24 sps:$4 sm:$0xff]  }
 0x306   : > { %3464 = vmatpush2.bf16.msra.mxu0 %v9805_v57  ;;  %3500 = vmatprep.subr.bf16.mxu1 %v9816_v59  ;;  %v9900_v57 = vld [vmem:[#allocation9 + $0x5a4] ss:$24 sps:$4 sm:$0xff]  }
 0x307   : > { %3465 = vmatprep.subr.bf16.mxu0 %v9813_v60  ;;  %v9897_v59 = vld [vmem:[#allocation9 + $0x1e4] ss:$24 sps:$4 sm:$0xff]   ;;  %v9898_v60 = vld [vmem:[#allocation9 + $0x5a0] ss:$24 sps:$4 sm:$0xff]  }
 0x309   : > { %3501 = vmatpush2.bf16.msra.mxu1 %v9814_v36  ;;  %v9895_v36 = vld [vmem:[#allocation9 + $0x1e0] ss:$24 sps:$4 sm:$0xff]  }
 0x30a   : > { %3466 = vmatpush2.bf16.msra.mxu0 %v9811_v30  ;;  %3502 = vmatprep.subr.bf16.mxu1 %v9819_v55  ;;  %v9906_v30 = vld [vmem:[#allocation9 + $0x574] ss:$24 sps:$4 sm:$0xff]  }
 0x30b   : > { %4481 = vmatprep.subr.bf16.mxu0 %v9822_v0  ;;  %v9903_v55 = vld [vmem:[#allocation9 + $0x1b4] ss:$24 sps:$4 sm:$0xff]   ;;  %v9904_v0 = vld [vmem:[#allocation9 + $0x570] ss:$24 sps:$4 sm:$0xff]  }
 0x30d   : > { %3468 = vmatmul.mubr.bf16.vlgmr.msra.gmra.mxu0 %v11361_v45  ;;  %3503 = vmatpush2.bf16.msra.mxu1 %v9817_v24  ;;  %v9835_v45 = vld [vmem:[#allocation9 + $0xa90] ss:$24 sps:$4 sm:$0xff]  }
 0x30e   : > { %4482 = vmatpush1.bf16.msra.mxu0 %v9820_v61  ;;  %4513 = vmatprep.mubr.bf16.mxu0 %v11379_v38  ;;  %v9901_v24 = vld [vmem:[#allocation9 + $0x1b0] ss:$24 sps:$4 sm:$0xff]   ;;  %v9910_v61 = vld [vmem:[#allocation9 + $0x540] ss:$24 sps:$4 sm:$0xff]  }
 0x30f   : > { %3504 = vmatprep.subr.bf16.mxu1 %v9825_v62  ;;  %4483 = vmatprep.subr.bf16.mxu0 %v9828_v13  ;;  %v9907_v62 = vld [vmem:[#allocation9 + $0x180] ss:$24 sps:$4 sm:$0xff]   ;;  %v9915_v13 = vld [vmem:[#allocation9 + $0x514] ss:$24 sps:$4 sm:$0xff]  }
 0x311   : > { %3505 = vmatpush2.bf16.msra.mxu1 %v9823_v35  ;;  %v9918_v35 = vld [vmem:[#allocation9 + $0x15c] ss:$24 sps:$4 sm:$0xff]  }
 0x312   : > { %4484 = vmatpush1.bf16.msra.mxu0 %v9826_v3  ;;  %3506 = vmatprep.subr.bf16.mxu1 %v9831_v11  ;;  %v1862_v3 = vld [vmem:[#allocation2 + $0x30] sm:$0xff]  ;;  %v1866_v11 = vld [vmem:[#allocation2 + $0x8] sm:$0x7] }
 0x313   : > { %4485 = vmatprep.subr.bf16.mxu0 %v9834_v47  ;;  %v9913_v47 = vld [vmem:[#allocation9 + $0x510] ss:$24 sps:$4 sm:$0xff]  }
 0x315   : > { %3507 = vmatpush2.bf16.msra.mxu1 %v9829_v9  ;;  %v9916_v9 = vld [vmem:[#allocation9 + $0x158] ss:$24 sps:$4 sm:$0xff]  }
 0x316   : > { %4486 = vmatpush1.bf16.msra.mxu0 %v9832_v32  ;;  %3508 = vmatprep.subr.bf16.mxu1 %v9837_v33  ;;  %v11388_v32 = vpack.c.bf16 %v1866_v11, %v1862_v3  ;;  %v9921_v33 = vld [vmem:[#allocation9 + $0x4e4] ss:$24 sps:$4 sm:$0xff]   ;;  %v9994_v11 = vld [vmem:[#allocation9 + $0x5a8] ss:$24 sps:$4 sm:$0xff]  }
 0x317   : > { %4487 = vmatprep.subr.bf16.mxu0 %v9840_v34  ;;  %v9924_v34 = vld [vmem:[#allocation9 + $0x12c] ss:$24 sps:$4 sm:$0xff]  }
 0x318   : > { %v9993_v3 = vld [vmem:[#allocation9 + $0x1ec] ss:$24 sps:$4 sm:$0xff]  }
 0x319   : > { %3509 = vmatpush2.bf16.msra.mxu1 %v9835_v45  ;;  %v9919_v45 = vld [vmem:[#allocation9 + $0x4e0] ss:$24 sps:$4 sm:$0xff]  }
 0x31a   : > { %4488 = vmatpush1.bf16.msra.mxu0 %v9838_v44  ;;  %4524 = vmatprep.subr.bf16.mxu1 %v9846_v2  ;;  %v9922_v44 = vld [vmem:[#allocation9 + $0x128] ss:$24 sps:$4 sm:$0xff]   ;;  %v9927_v2 = vld [vmem:[#allocation9 + $0x4b4] ss:$24 sps:$4 sm:$0xff]  }
 0x31b   : > { %4489 = vmatprep.subr.bf16.mxu0 %v9843_v6  ;;  %v9930_v6 = vld [vmem:[#allocation9 + $0xfc] ss:$24 sps:$4 sm:$0xff]  }
 0x31c   : > { %3511 = vmatmul.mubr.bf16.vlgmr.msra.gmra.mxu1 %v11370_v63  ;;  %v9862_v63 = vld [vmem:[#allocation9 + $0x3c0] ss:$24 sps:$4 sm:$0xff]  }
 0x31d   : > { %4525 = vmatpush1.bf16.msra.mxu1 %v9844_v21  ;;  %4556 = vmatprep.mubr.bf16.mxu1 %v11384_v1  ;;  %v9928_v21 = vld [vmem:[#allocation9 + $0xf8] ss:$24 sps:$4 sm:$0xff]  }
 0x31e   : > { %4490 = vmatpush1.bf16.msra.mxu0 %v9841_v58  ;;  %4526 = vmatprep.subr.bf16.mxu1 %v9852_v23  ;;  %v9933_v58 = vld [vmem:[#allocation9 + $0x484] ss:$24 sps:$4 sm:$0xff]  }
 0x31f   : > { %4491 = vmatprep.subr.bf16.mxu0 %v9849_v4  ;;  %v9936_v23 = vld [vmem:[#allocation9 + $0xcc] ss:$24 sps:$4 sm:$0xff]   ;;  %v9931_v4 = vld [vmem:[#allocation9 + $0x480] ss:$24 sps:$4 sm:$0xff]  }
 0x321   : > { %4527 = vmatpush1.bf16.msra.mxu1 %v9850_v22  ;;  %v9934_v22 = vld [vmem:[#allocation9 + $0xc8] ss:$24 sps:$4 sm:$0xff]  }
 0x322   : > { %4492 = vmatpush1.bf16.msra.mxu0 %v9847_v48  ;;  %4528 = vmatprep.subr.bf16.mxu1 %v9858_v46  ;;  %v9942_v48 = vld [vmem:[#allocation9 + $0x45c] ss:$24 sps:$4 sm:$0xff]   ;;  %v1868_v46 = vld [vmem:[#allocation2 + $0x28] sm:$0x7] }
 0x323   : > { %4493 = vmatprep.subr.bf16.mxu0 %v9855_v10  ;;  %v9939_v10 = vld [vmem:[#allocation9 + $0x9c] ss:$24 sps:$4 sm:$0xff]  }
 0x325   : > { %4529 = vmatpush1.bf16.msra.mxu1 %v9856_v5  ;;  %v1864_v5 = vld [vmem:[#allocation2 + $0x18] sm:$0xff] }
 0x326   : > { %4494 = vmatpush1.bf16.msra.mxu0 %v9853_v39  ;;  %4530 = vmatprep.subr.bf16.mxu1 %v9864_v16  ;;  %v9940_v39 = vld [vmem:[#allocation9 + $0x458] ss:$24 sps:$4 sm:$0xff]   ;;  %v11392_v16 = vpack.c.bf16 %v1868_v46, %v1864_v5  ;;  %v10015_v46 = vld [vmem:[#allocation9 + $0x4e8] ss:$24 sps:$4 sm:$0xff]   ;;  %v10023_v5 = vld [vmem:[#allocation9 + $0x4bc] ss:$24 sps:$4 sm:$0xff]  }
 0x327   : > { %4495 = vmatprep.subr.bf16.mxu0 %v9861_v8  ;;  %v9937_v8 = vld [vmem:[#allocation9 + $0x98] ss:$24 sps:$4 sm:$0xff]  }
 0x329   : > { %4531 = vmatpush1.bf16.msra.mxu1 %v9862_v63  ;;  %v9948_v63 = vld [vmem:[#allocation9 + $0x42c] ss:$24 sps:$4 sm:$0xff]  }
 0x32a   : > { %4496 = vmatpush1.bf16.msra.mxu0 %v9859_v37  ;;  %4532 = vmatprep.subr.bf16.mxu1 %v9870_v15  ;;  %v9945_v37 = vld [vmem:[#allocation9 + $0x6c] ss:$24 sps:$4 sm:$0xff]  }
 0x32b   : > { %4497 = vmatprep.subr.bf16.mxu0 %v9867_v43 }
 0x32d   : > { %4533 = vmatpush1.bf16.msra.mxu1 %v9868_v26 }
 0x32e   : > { %4498 = vmatpush2.bf16.msra.mxu0 %v9865_v17  ;;  %4534 = vmatprep.subr.bf16.mxu1 %v9876_v19  ;;  %v9946_v17 = vld [vmem:[#allocation9 + $0x428] ss:$24 sps:$4 sm:$0xff]  }
 0x32f   : > { %4499 = vmatprep.subr.bf16.mxu0 %v9873_v20  ;;  %v9943_v19 = vld [vmem:[#allocation9 + $0x68] ss:$24 sps:$4 sm:$0xff]   ;;  %v9954_v20 = vld [vmem:[#allocation9 + $0x3fc] ss:$24 sps:$4 sm:$0xff]  }
 0x331   : > { %4535 = vmatpush1.bf16.msra.mxu1 %v9874_v25  ;;  %v9951_v25 = vld [vmem:[#allocation9 + $0x3c] ss:$24 sps:$4 sm:$0xff]  }
 0x332   : > { %4500 = vmatpush2.bf16.msra.mxu0 %v9871_v31  ;;  %4536 = vmatprep.subr.bf16.mxu1 %v9882_v14  ;;  %v9952_v31 = vld [vmem:[#allocation9 + $0x3f8] ss:$24 sps:$4 sm:$0xff]  }
 0x333   : > { %4501 = vmatprep.subr.bf16.mxu0 %v9879_v53  ;;  %v9949_v14 = vld [vmem:[#allocation9 + $0x38] ss:$24 sps:$4 sm:$0xff]   ;;  %v9960_v53 = vld [vmem:[#allocation9 + $0x3cc] ss:$24 sps:$4 sm:$0xff]  }
 0x335   : > { %4537 = vmatpush1.bf16.msra.mxu1 %v9880_v41  ;;  %v9957_v41 = vld [vmem:[#allocation9 + $0xc] ss:$24 sps:$4 sm:$0xff]  }
 0x336   : > { %4502 = vmatpush2.bf16.msra.mxu0 %v9877_v52  ;;  %4538 = vmatprep.subr.bf16.mxu1 %v9888_v51  ;;  %v9958_v52 = vld [vmem:[#allocation9 + $0x3c8] ss:$24 sps:$4 sm:$0xff]  }
 0x337   : > { %4503 = vmatprep.subr.bf16.mxu0 %v9885_v27  ;;  %v9955_v51 = vld [vmem:[#allocation9 + $0x8] ss:$24 sps:$4 sm:$0xff]   ;;  %v9966_v27 = vld [vmem:[#allocation9 + $0x39c] ss:$24 sps:$4 sm:$0xff]  }
 0x339   : > { %4539 = vmatpush1.bf16.msra.mxu1 %v9886_v12  ;;  %v9963_v12 = vld [vmem:[#allocation9 + $0x2dc] ss:$24 sps:$4 sm:$0xff]  }
 0x33a   : > { %4504 = vmatpush2.bf16.msra.mxu0 %v9883_v42  ;;  %4540 = vmatprep.subr.bf16.mxu1 %v9894_v7  ;;  %v9964_v42 = vld [vmem:[#allocation9 + $0x398] ss:$24 sps:$4 sm:$0xff]  }
 0x33b   : > { %4505 = vmatprep.subr.bf16.mxu0 %v9891_v50  ;;  %v9961_v7 = vld [vmem:[#allocation9 + $0x2d8] ss:$24 sps:$4 sm:$0xff]   ;;  %v9972_v50 = vld [vmem:[#allocation9 + $0x36c] ss:$24 sps:$4 sm:$0xff]  }
 0x33d   : > { %4541 = vmatpush2.bf16.msra.mxu1 %v9892_v49  ;;  %v9969_v49 = vld [vmem:[#allocation9 + $0x2ac] ss:$24 sps:$4 sm:$0xff]  }
 0x33e   : > { %4506 = vmatpush2.bf16.msra.mxu0 %v9889_v28  ;;  %4542 = vmatprep.subr.bf16.mxu1 %v9900_v57  ;;  %v9970_v28 = vld [vmem:[#allocation9 + $0x368] ss:$24 sps:$4 sm:$0xff]  }
 0x33f   : > { %4507 = vmatprep.subr.bf16.mxu0 %v9897_v59  ;;  %v9967_v57 = vld [vmem:[#allocation9 + $0x2a8] ss:$24 sps:$4 sm:$0xff]   ;;  %v9978_v59 = vld [vmem:[#allocation9 + $0x33c] ss:$24 sps:$4 sm:$0xff]  }
 0x341   : > { %4543 = vmatpush2.bf16.msra.mxu1 %v9898_v60  ;;  %v9975_v60 = vld [vmem:[#allocation9 + $0x27c] ss:$24 sps:$4 sm:$0xff]  }
 0x342   : > { %4508 = vmatpush2.bf16.msra.mxu0 %v9895_v36  ;;  %4544 = vmatprep.subr.bf16.mxu1 %v9906_v30  ;;  %v9976_v36 = vld [vmem:[#allocation9 + $0x338] ss:$24 sps:$4 sm:$0xff]  }
 0x343   : > { %4509 = vmatprep.subr.bf16.mxu0 %v9903_v55  ;;  %v9973_v30 = vld [vmem:[#allocation9 + $0x278] ss:$24 sps:$4 sm:$0xff]   ;;  %v9984_v55 = vld [vmem:[#allocation9 + $0x30c] ss:$24 sps:$4 sm:$0xff]  }
 0x345   : > { %4545 = vmatpush2.bf16.msra.mxu1 %v9904_v0  ;;  %v9981_v0 = vld [vmem:[#allocation9 + $0x24c] ss:$24 sps:$4 sm:$0xff]  }
 0x346   : > { %4510 = vmatpush2.bf16.msra.mxu0 %v9901_v24  ;;  %4546 = vmatprep.subr.bf16.mxu1 %v9912_v56  ;;  %v9982_v24 = vld [vmem:[#allocation9 + $0x308] ss:$24 sps:$4 sm:$0xff]  }
 0x347   : > { %4511 = vmatprep.subr.bf16.mxu0 %v9909_v29  ;;  %v9979_v56 = vld [vmem:[#allocation9 + $0x248] ss:$24 sps:$4 sm:$0xff]   ;;  %v9990_v29 = vld [vmem:[#allocation9 + $0x5dc] ss:$24 sps:$4 sm:$0xff]  }
 0x349   : > { %4547 = vmatpush2.bf16.msra.mxu1 %v9910_v61  ;;  %v9987_v61 = vld [vmem:[#allocation9 + $0x21c] ss:$24 sps:$4 sm:$0xff]  }
 0x34a   : > { %4512 = vmatpush2.bf16.msra.mxu0 %v9907_v62  ;;  %4548 = vmatprep.subr.bf16.mxu1 %v9915_v13  ;;  %v9988_v62 = vld [vmem:[#allocation9 + $0x5d8] ss:$24 sps:$4 sm:$0xff]  }
 0x34b   : > { %4567 = vmatprep.subr.bf16.mxu0 %v9918_v35  ;;  %v9985_v13 = vld [vmem:[#allocation9 + $0x218] ss:$24 sps:$4 sm:$0xff]   ;;  %v9996_v35 = vld [vmem:[#allocation9 + $0x5ac] ss:$24 sps:$4 sm:$0xff]  }
 0x34d   : > { %4514 = vmatmul.mubr.bf16.vlgmr.msra.gmra.mxu0 %v11388_v32  ;;  %4549 = vmatpush2.bf16.msra.mxu1 %v9913_v47  ;;  %v3297_v15 = vpop.f32.mrf.mxu0  ;;  %v9991_v47 = vld [vmem:[#allocation9 + $0x1e8] ss:$24 sps:$4 sm:$0xff]  }
 0x34e   : > { %4568 = vmatpush1.bf16.msra.mxu0 %v9916_v9  ;;  %4599 = vmatprep.mubr.bf16.mxu0 %v11379_v38  ;;  %v10002_v9 = vld [vmem:[#allocation9 + $0x57c] ss:$24 sps:$4 sm:$0xff]  }
 0x34f   : > { %4550 = vmatprep.subr.bf16.mxu1 %v9921_v33  ;;  %4569 = vmatprep.subr.bf16.mxu0 %v9924_v34  ;;  %v9999_v33 = vld [vmem:[#allocation9 + $0x1bc] ss:$24 sps:$4 sm:$0xff]   ;;  %v10000_v34 = vld [vmem:[#allocation9 + $0x578] ss:$24 sps:$4 sm:$0xff]  }
 0x351   : > { %4551 = vmatpush2.bf16.msra.mxu1 %v9919_v45  ;;  %v9997_v45 = vld [vmem:[#allocation9 + $0x1b8] ss:$24 sps:$4 sm:$0xff]  }
 0x352   : > { %4570 = vmatpush1.bf16.msra.mxu0 %v9922_v44  ;;  %4552 = vmatprep.subr.bf16.mxu1 %v9927_v2  ;;  %v10008_v44 = vld [vmem:[#allocation9 + $0x54c] ss:$24 sps:$4 sm:$0xff]  }
 0x353   : > { %4571 = vmatprep.subr.bf16.mxu0 %v9930_v6  ;;  %v10005_v2 = vld [vmem:[#allocation9 + $0x18c] ss:$24 sps:$4 sm:$0xff]   ;;  %v10006_v6 = vld [vmem:[#allocation9 + $0x548] ss:$24 sps:$4 sm:$0xff]  }
 0x355   : > { %4553 = vmatpush2.bf16.msra.mxu1 %v9925_v40  ;;  %v10003_v40 = vld [vmem:[#allocation9 + $0x188] ss:$24 sps:$4 sm:$0xff]  }
 0x356   : > { %4572 = vmatpush1.bf16.msra.mxu0 %v9928_v21  ;;  %4554 = vmatprep.subr.bf16.mxu1 %v9933_v58  ;;  %v10011_v21 = vld [vmem:[#allocation9 + $0x51c] ss:$24 sps:$4 sm:$0xff]  }
 0x357   : > { %4573 = vmatprep.subr.bf16.mxu0 %v9936_v23  ;;  %v10014_v58 = vld [vmem:[#allocation9 + $0x164] ss:$24 sps:$4 sm:$0xff]   ;;  %v10009_v23 = vld [vmem:[#allocation9 + $0x518] ss:$24 sps:$4 sm:$0xff]  }
 0x359   : > { %4555 = vmatpush2.bf16.msra.mxu1 %v9931_v4  ;;  %v10012_v4 = vld [vmem:[#allocation9 + $0x160] ss:$24 sps:$4 sm:$0xff]  }
 0x35a   : > { %4574 = vmatpush1.bf16.msra.mxu0 %v9934_v22  ;;  %4610 = vmatprep.subr.bf16.mxu1 %v9942_v48  ;;  %v10017_v22 = vld [vmem:[#allocation9 + $0x4ec] ss:$24 sps:$4 sm:$0xff]  }
 0x35b   : > { %4575 = vmatprep.subr.bf16.mxu0 %v9939_v10  ;;  %v10020_v48 = vld [vmem:[#allocation9 + $0x134] ss:$24 sps:$4 sm:$0xff]   ;;  %v10018_v10 = vld [vmem:[#allocation9 + $0x130] ss:$24 sps:$4 sm:$0xff]  }
 0x35c   : > { %4557 = vmatmul.mubr.bf16.vlgmr.msra.gmra.mxu1 %v11392_v16  ;;  %v3340_v43 = vpop.f32.mrf.mxu1 }
 0x35d   : > { %v11395_v26 = vadd.f32 %v3340_v43, %v3297_v15  ;;  %4611 = vmatpush1.bf16.msra.mxu1 %v9940_v39  ;;  %4642 = vmatprep.mubr.bf16.mxu1 %v11384_v1  ;;  %v10026_v39 = vld [vmem:[#allocation9 + $0x104] ss:$24 sps:$4 sm:$0xff]   ;;  %v10032_v15 = vld [vmem:[#allocation9 + $0xd4] ss:$24 sps:$4 sm:$0xff]   ;;  %v10027_v43 = vld [vmem:[#allocation9 + $0x488] ss:$24 sps:$4 sm:$0xff]  }
 0x35e   : > { %4576 = vmatpush1.bf16.msra.mxu0 %v9937_v8  ;;  %4612 = vmatprep.subr.bf16.mxu1 %v9948_v63  ;;  %v10021_v8 = vld [vmem:[#allocation9 + $0x4b8] ss:$24 sps:$4 sm:$0xff]  }
 0x35f   : > { %12089 = vst [vmem:[#allocation26_spill] sm:$0xff] %v11395_v26  ;;  %4577 = vmatprep.subr.bf16.mxu0 %v9945_v37  ;;  %v10024_v63 = vld [vmem:[#allocation9 + $0x100] ss:$24 sps:$4 sm:$0xff]   ;;  %v10029_v37 = vld [vmem:[#allocation9 + $0x48c] ss:$24 sps:$4 sm:$0xff]  }
 0x361   : > { %4613 = vmatpush1.bf16.msra.mxu1 %v9946_v17  ;;  %v10030_v17 = vld [vmem:[#allocation9 + $0xd0] ss:$24 sps:$4 sm:$0xff]  }
 0x362   : > { %4578 = vmatpush1.bf16.msra.mxu0 %v9943_v19  ;;  %4614 = vmatprep.subr.bf16.mxu1 %v9954_v20  ;;  %v10038_v19 = vld [vmem:[#allocation9 + $0x464] ss:$24 sps:$4 sm:$0xff]   ;;  %v10036_v20 = vld [vmem:[#allocation9 + $0x460] ss:$24 sps:$4 sm:$0xff]  }
 0x363   : > { %4579 = vmatprep.subr.bf16.mxu0 %v9951_v25  ;;  %v10033_v25 = vld [vmem:[#allocation9 + $0xa0] ss:$24 sps:$4 sm:$0xff]  }
 0x365   : > { %4615 = vmatpush1.bf16.msra.mxu1 %v9952_v31  ;;  %v10044_v31 = vld [vmem:[#allocation9 + $0x434] ss:$24 sps:$4 sm:$0xff]  }
 0x366   : > { %4580 = vmatpush1.bf16.msra.mxu0 %v9949_v14  ;;  %4616 = vmatprep.subr.bf16.mxu1 %v9960_v53  ;;  %v10041_v14 = vld [vmem:[#allocation9 + $0x74] ss:$24 sps:$4 sm:$0xff]   ;;  %v10042_v53 = vld [vmem:[#allocation9 + $0x430] ss:$24 sps:$4 sm:$0xff]  }
 0x367   : > { %4581 = vmatprep.subr.bf16.mxu0 %v9957_v41  ;;  %v10039_v41 = vld [vmem:[#allocation9 + $0x70] ss:$24 sps:$4 sm:$0xff]  }
 0x369   : > { %4617 = vmatpush1.bf16.msra.mxu1 %v9958_v52  ;;  %v10050_v52 = vld [vmem:[#allocation9 + $0x404] ss:$24 sps:$4 sm:$0xff]  }
 0x36a   : > { %4582 = vmatpush1.bf16.msra.mxu0 %v9955_v51  ;;  %4618 = vmatprep.subr.bf16.mxu1 %v9966_v27  ;;  %v10047_v51 = vld [vmem:[#allocation9 + $0x44] ss:$24 sps:$4 sm:$0xff]   ;;  %v10048_v27 = vld [vmem:[#allocation9 + $0x400] ss:$24 sps:$4 sm:$0xff]  }
 0x36b   : > { %4583 = vmatprep.subr.bf16.mxu0 %v9963_v12  ;;  %v10045_v12 = vld [vmem:[#allocation9 + $0x40] ss:$24 sps:$4 sm:$0xff]  }
 0x36d   : > { %4619 = vmatpush1.bf16.msra.mxu1 %v9964_v42  ;;  %v10056_v42 = vld [vmem:[#allocation9 + $0x3d4] ss:$24 sps:$4 sm:$0xff]  }
 0x36e   : > { %4584 = vmatpush2.bf16.msra.mxu0 %v9961_v7  ;;  %4620 = vmatprep.subr.bf16.mxu1 %v9972_v50  ;;  %v10053_v7 = vld [vmem:[#allocation9 + $0x14] ss:$24 sps:$4 sm:$0xff]   ;;  %v10054_v50 = vld [vmem:[#allocation9 + $0x3d0] ss:$24 sps:$4 sm:$0xff]  }
 0x36f   : > { %4585 = vmatprep.subr.bf16.mxu0 %v9969_v49  ;;  %v10051_v49 = vld [vmem:[#allocation9 + $0x10] ss:$24 sps:$4 sm:$0xff]  }
 0x371   : > { %4621 = vmatpush1.bf16.msra.mxu1 %v9970_v28  ;;  %v10059_v28 = vld [vmem:[#allocation9 + $0x2e4] ss:$24 sps:$4 sm:$0xff]  }
 0x372   : > { %4586 = vmatpush2.bf16.msra.mxu0 %v9967_v57  ;;  %4622 = vmatprep.subr.bf16.mxu1 %v9978_v59  ;;  %v10060_v57 = vld [vmem:[#allocation9 + $0x3a0] ss:$24 sps:$4 sm:$0xff]  }
 0x373   : > { %4587 = vmatprep.subr.bf16.mxu0 %v9975_v60  ;;  %v10057_v59 = vld [vmem:[#allocation9 + $0x2e0] ss:$24 sps:$4 sm:$0xff]   ;;  %v10068_v60 = vld [vmem:[#allocation9 + $0x374] ss:$24 sps:$4 sm:$0xff]  }
 0x375   : > { %4623 = vmatpush1.bf16.msra.mxu1 %v9976_v36  ;;  %v10065_v36 = vld [vmem:[#allocation9 + $0x2b4] ss:$24 sps:$4 sm:$0xff]  }
 0x376   : > { %4588 = vmatpush2.bf16.msra.mxu0 %v9973_v30  ;;  %4624 = vmatprep.subr.bf16.mxu1 %v9984_v55  ;;  %v10066_v30 = vld [vmem:[#allocation9 + $0x370] ss:$24 sps:$4 sm:$0xff]  }
 0x377   : > { %4589 = vmatprep.subr.bf16.mxu0 %v9981_v0  ;;  %v10063_v55 = vld [vmem:[#allocation9 + $0x2b0] ss:$24 sps:$4 sm:$0xff]   ;;  %v10074_v0 = vld [vmem:[#allocation9 + $0x344] ss:$24 sps:$4 sm:$0xff]  }
 0x379   : > { %4625 = vmatpush1.bf16.msra.mxu1 %v9982_v24  ;;  %v10071_v24 = vld [vmem:[#allocation9 + $0x284] ss:$24 sps:$4 sm:$0xff]  }
 0x37a   : > { %4590 = vmatpush2.bf16.msra.mxu0 %v9979_v56  ;;  %4626 = vmatprep.subr.bf16.mxu1 %v9990_v29  ;;  %v10072_v56 = vld [vmem:[#allocation9 + $0x340] ss:$24 sps:$4 sm:$0xff]  }
 0x37b   : > { %4591 = vmatprep.subr.bf16.mxu0 %v9987_v61  ;;  %v10069_v29 = vld [vmem:[#allocation9 + $0x280] ss:$24 sps:$4 sm:$0xff]   ;;  %v10080_v61 = vld [vmem:[#allocation9 + $0x314] ss:$24 sps:$4 sm:$0xff]  }
 0x37d   : > { %4627 = vmatpush2.bf16.msra.mxu1 %v9988_v62  ;;  %v10077_v62 = vld [vmem:[#allocation9 + $0x254] ss:$24 sps:$4 sm:$0xff]  }
 0x37e   : > { %4592 = vmatpush2.bf16.msra.mxu0 %v9985_v13  ;;  %4628 = vmatprep.subr.bf16.mxu1 %v9996_v35  ;;  %v10078_v13 = vld [vmem:[#allocation9 + $0x310] ss:$24 sps:$4 sm:$0xff]  }
 0x37f   : > { %4593 = vmatprep.subr.bf16.mxu0 %v9993_v3  ;;  %v10075_v35 = vld [vmem:[#allocation9 + $0x250] ss:$24 sps:$4 sm:$0xff]   ;;  %v10086_v3 = vld [vmem:[#allocation9 + $0x5e4] ss:$24 sps:$4 sm:$0xff]  }
 0x381   : > { %4629 = vmatpush2.bf16.msra.mxu1 %v9994_v11  ;;  %v10083_v11 = vld [vmem:[#allocation9 + $0x224] ss:$24 sps:$4 sm:$0xff]  }
 0x382   : > { %4594 = vmatpush2.bf16.msra.mxu0 %v9991_v47  ;;  %4630 = vmatprep.subr.bf16.mxu1 %v10002_v9  ;;  %v10084_v47 = vld [vmem:[#allocation9 + $0x5e0] ss:$24 sps:$4 sm:$0xff]  }
 0x383   : > { %4595 = vmatprep.subr.bf16.mxu0 %v9999_v33  ;;  %v10081_v9 = vld [vmem:[#allocation9 + $0x220] ss:$24 sps:$4 sm:$0xff]   ;;  %v10092_v33 = vld [vmem:[#allocation9 + $0x5b4] ss:$24 sps:$4 sm:$0xff]  }
 0x385   : > { %4631 = vmatpush2.bf16.msra.mxu1 %v10000_v34  ;;  %v10089_v34 = vld [vmem:[#allocation9 + $0x1f4] ss:$24 sps:$4 sm:$0xff]  }
 0x386   : > { %4596 = vmatpush2.bf16.msra.mxu0 %v9997_v45  ;;  %4632 = vmatprep.subr.bf16.mxu1 %v10008_v44  ;;  %v10090_v45 = vld [vmem:[#allocation9 + $0x5b0] ss:$24 sps:$4 sm:$0xff]  }
 0x387   : > { %4597 = vmatprep.subr.bf16.mxu0 %v10005_v2  ;;  %v10087_v44 = vld [vmem:[#allocation9 + $0x1f0] ss:$24 sps:$4 sm:$0xff]   ;;  %v10098_v2 = vld [vmem:[#allocation9 + $0x584] ss:$24 sps:$4 sm:$0xff]  }
 0x389   : > { %4633 = vmatpush2.bf16.msra.mxu1 %v10006_v6  ;;  %v10095_v6 = vld [vmem:[#allocation9 + $0x1c4] ss:$24 sps:$4 sm:$0xff]  }
 0x38a   : > { %4598 = vmatpush2.bf16.msra.mxu0 %v10003_v40  ;;  %4634 = vmatprep.subr.bf16.mxu1 %v10011_v21  ;;  %v10096_v40 = vld [vmem:[#allocation9 + $0x580] ss:$24 sps:$4 sm:$0xff]  }
 0x38b   : > { %4653 = vmatprep.subr.bf16.mxu0 %v10014_v58  ;;  %v10093_v21 = vld [vmem:[#allocation9 + $0x1c0] ss:$24 sps:$4 sm:$0xff]   ;;  %v10104_v58 = vld [vmem:[#allocation9 + $0x554] ss:$24 sps:$4 sm:$0xff]  }
 0x38d   : > { %4600 = vmatmul.mubr.bf16.vlgmr.msra.gmra.mxu0 %v11388_v32  ;;  %4635 = vmatpush2.bf16.msra.mxu1 %v10009_v23  ;;  %v10101_v23 = vld [vmem:[#allocation9 + $0x194] ss:$24 sps:$4 sm:$0xff]  }
 0x38e   : > { %4654 = vmatpush1.bf16.msra.mxu0 %v10012_v4  ;;  %4685 = vmatprep.mubr.bf16.mxu0 %v11379_v38  ;;  %v10035_v38 = vld [vmem:[#allocation9 + $0xa4] ss:$24 sps:$4 sm:$0xff]   ;;  %v10102_v4 = vld [vmem:[#allocation9 + $0x550] ss:$24 sps:$4 sm:$0xff]  }
 0x38f   : > { %4636 = vmatprep.subr.bf16.mxu1 %v10017_v22  ;;  %4655 = vmatprep.subr.bf16.mxu0 %v10020_v48  ;;  %v4740_v22 = vld [vmem:[#allocation2] sm:$0xfc] }
 0x390   : > { %v4744_v48 = vld [vmem:[#allocation2 + $0x20] sm:$0x1f] }
 0x391   : > { %4637 = vmatpush2.bf16.msra.mxu1 %v10015_v46  ;;  %v10099_v46 = vld [vmem:[#allocation9 + $0x190] ss:$24 sps:$4 sm:$0xff]  }
 0x392   : > { %4656 = vmatpush1.bf16.msra.mxu0 %v10018_v10  ;;  %4638 = vmatprep.subr.bf16.mxu1 %v10023_v5  ;;  %v10107_v10 = vld [vmem:[#allocation9 + $0x524] ss:$24 sps:$4 sm:$0xff]   ;;  %v10110_v5 = vld [vmem:[#allocation9 + $0xd54] ss:$24 sps:$4 sm:$0xff]  }
 0x393   : > { %4657 = vmatprep.subr.bf16.mxu0 %v10026_v39  ;;  %v4748_v39 = vpack.c.bf16 %v4744_v48, %v4740_v22  ;;  %v10188_v22 = vld [vmem:[#allocation9 + $0x11a4] ss:$24 sps:$4 sm:$0xff]  }
 0x394   : > { %v10185_v48 = vld [vmem:[#allocation9 + $0xde4] ss:$24 sps:$4 sm:$0xff]  }
 0x395   : > { %4639 = vmatpush2.bf16.msra.mxu1 %v10021_v8  ;;  %v10105_v8 = vld [vmem:[#allocation9 + $0x520] ss:$24 sps:$4 sm:$0xff]  }
 0x396   : > { %4658 = vmatpush1.bf16.msra.mxu0 %v10024_v63  ;;  %4640 = vmatprep.subr.bf16.mxu1 %v10029_v37  ;;  %v10108_v63 = vld [vmem:[#allocation9 + $0xd50] ss:$24 sps:$4 sm:$0xff]   ;;  %v10113_v37 = vld [vmem:[#allocation9 + $0x4f4] ss:$24 sps:$4 sm:$0xff]  }
 0x397   : > { %4659 = vmatprep.subr.bf16.mxu0 %v10032_v15  ;;  %v10116_v15 = vld [vmem:[#allocation9 + $0xd24] ss:$24 sps:$4 sm:$0xff]  }
 0x399   : > { %4641 = vmatpush2.bf16.msra.mxu1 %v10027_v43  ;;  %v11402_v43 = vrot.slane %v4748_v39, 1  ;;  %v10191_v39 = vld [vmem:[#allocation9 + $0xdb4] ss:$24 sps:$4 sm:$0xff]  }
 0x39a   : > { %4660 = vmatpush1.bf16.msra.mxu0 %v10030_v17  ;;  %4696 = vmatprep.subr.bf16.mxu1 %v10038_v19  ;;  %v10111_v17 = vld [vmem:[#allocation9 + $0x4f0] ss:$24 sps:$4 sm:$0xff]   ;;  %v10114_v19 = vld [vmem:[#allocation9 + $0xd20] ss:$24 sps:$4 sm:$0xff]  }
 0x39b   : > { %4661 = vmatprep.subr.bf16.mxu0 %v10035_v38  ;;  %v10119_v38 = vld [vmem:[#allocation9 + $0x4c4] ss:$24 sps:$4 sm:$0xff]  }
 0x39c   : > { %4643 = vmatmul.mubr.bf16.vlgmr.msra.gmra.mxu1 %v11392_v16 }
 0x39d   : > { %4697 = vmatpush1.bf16.msra.mxu1 %v10036_v20  ;;  %4728 = vmatprep.mubr.bf16.mxu1 %v11384_v1  ;;  %v10062_v1 = vld [vmem:[#allocation9 + $0x3a4] ss:$24 sps:$4 sm:$0xff]   ;;  %v10122_v20 = vld [vmem:[#allocation9 + $0xcf4] ss:$24 sps:$4 sm:$0xff]  }
 0x39e   : > { %4662 = vmatpush1.bf16.msra.mxu0 %v10033_v25  ;;  %4698 = vmatprep.subr.bf16.mxu1 %v10044_v31  ;;  %v10117_v25 = vld [vmem:[#allocation9 + $0x4c0] ss:$24 sps:$4 sm:$0xff]   ;;  %v10120_v31 = vld [vmem:[#allocation9 + $0xcf0] ss:$24 sps:$4 sm:$0xff]  }
 0x39f   : > { %4663 = vmatprep.subr.bf16.mxu0 %v10041_v14  ;;  %v10125_v14 = vld [vmem:[#allocation9 + $0x494] ss:$24 sps:$4 sm:$0xff]  }
 0x3a1   : > { %4699 = vmatpush1.bf16.msra.mxu1 %v10042_v53  ;;  %v10128_v53 = vld [vmem:[#allocation9 + $0xcc4] ss:$24 sps:$4 sm:$0xff]  }
 0x3a2   : > { %4664 = vmatpush1.bf16.msra.mxu0 %v10039_v41  ;;  %4700 = vmatprep.subr.bf16.mxu1 %v10050_v52  ;;  %v4746_v41 = vld [vmem:[#allocation2 + $0x38] sm:$0x1f] }
 0x3a3   : > { %4665 = vmatprep.subr.bf16.mxu0 %v10047_v51  ;;  %v10126_v52 = vld [vmem:[#allocation9 + $0xcc0] ss:$24 sps:$4 sm:$0xff]   ;;  %v10134_v51 = vld [vmem:[#allocation9 + $0x1054] ss:$24 sps:$4 sm:$0xff]  }
 0x3a5   : > { %4701 = vmatpush1.bf16.msra.mxu1 %v10048_v27  ;;  %v4742_v27 = vld [vmem:[#allocation2 + $0x10] sm:$0xfc] }
 0x3a6   : > { %4666 = vmatpush1.bf16.msra.mxu0 %v10045_v12  ;;  %4702 = vmatprep.subr.bf16.mxu1 %v10056_v42  ;;  %v10131_v12 = vld [vmem:[#allocation9 + $0xc94] ss:$24 sps:$4 sm:$0xff]   ;;  %v4750_v42 = vpack.c.bf16 %v4746_v41, %v4742_v27  ;;  %v10204_v41 = vld [vmem:[#allocation9 + $0xd58] ss:$24 sps:$4 sm:$0xff]  }
 0x3a7   : > { %4667 = vmatprep.subr.bf16.mxu0 %v10053_v7  ;;  %v10132_v7 = vld [vmem:[#allocation9 + $0x1050] ss:$24 sps:$4 sm:$0xff]   ;;  %v10207_v27 = vld [vmem:[#allocation9 + $0x10e0] ss:$24 sps:$4 sm:$0xff]  }
 0x3a9   : > { %4703 = vmatpush1.bf16.msra.mxu1 %v10054_v50  ;;  %v10129_v50 = vld [vmem:[#allocation9 + $0xc90] ss:$24 sps:$4 sm:$0xff]  }
 0x3aa   : > { %4668 = vmatpush1.bf16.msra.mxu0 %v10051_v49  ;;  %4704 = vmatprep.subr.bf16.mxu1 %v10062_v1  ;;  %v10140_v49 = vld [vmem:[#allocation9 + $0x1024] ss:$24 sps:$4 sm:$0xff]   ;;  %v11406_v1 = vrot.slane %v4750_v42, 1  ;;  %v10215_v42 = vld [vmem:[#allocation9 + $0x10b4] ss:$24 sps:$4 sm:$0xff]  }
 0x3ab   : > { %4669 = vmatprep.subr.bf16.mxu0 %v10059_v28  ;;  %v10137_v28 = vld [vmem:[#allocation9 + $0xc64] ss:$24 sps:$4 sm:$0xff]  }
 0x3ad   : > { %4705 = vmatpush1.bf16.msra.mxu1 %v10060_v57  ;;  %v10138_v57 = vld [vmem:[#allocation9 + $0x1020] ss:$24 sps:$4 sm:$0xff]  }
 0x3ae   : > { %4670 = vmatpush2.bf16.msra.mxu0 %v10057_v59  ;;  %4706 = vmatprep.subr.bf16.mxu1 %v10068_v60  ;;  %v10135_v59 = vld [vmem:[#allocation9 + $0xc60] ss:$24 sps:$4 sm:$0xff]   ;;  %v10146_v60 = vld [vmem:[#allocation9 + $0xff4] ss:$24 sps:$4 sm:$0xff]  }
 0x3af   : > { %4671 = vmatprep.subr.bf16.mxu0 %v10065_v36  ;;  %v10143_v36 = vld [vmem:[#allocation9 + $0xc34] ss:$24 sps:$4 sm:$0xff]  }
 0x3b1   : > { %4707 = vmatpush1.bf16.msra.mxu1 %v10066_v30  ;;  %v10144_v30 = vld [vmem:[#allocation9 + $0xff0] ss:$24 sps:$4 sm:$0xff]  }
 0x3b2   : > { %4672 = vmatpush2.bf16.msra.mxu0 %v10063_v55  ;;  %4708 = vmatprep.subr.bf16.mxu1 %v10074_v0  ;;  %v10141_v55 = vld [vmem:[#allocation9 + $0xc30] ss:$24 sps:$4 sm:$0xff]   ;;  %v10152_v0 = vld [vmem:[#allocation9 + $0xfc4] ss:$24 sps:$4 sm:$0xff]  }
 0x3b3   : > { %4673 = vmatprep.subr.bf16.mxu0 %v10071_v24  ;;  %v10149_v24 = vld [vmem:[#allocation9 + $0xc04] ss:$24 sps:$4 sm:$0xff]  }
 0x3b5   : > { %4709 = vmatpush1.bf16.msra.mxu1 %v10072_v56  ;;  %v10147_v56 = vld [vmem:[#allocation9 + $0xc00] ss:$24 sps:$4 sm:$0xff]  }
 0x3b6   : > { %4674 = vmatpush2.bf16.msra.mxu0 %v10069_v29  ;;  %4710 = vmatprep.subr.bf16.mxu1 %v10080_v61  ;;  %v10158_v29 = vld [vmem:[#allocation9 + $0xf94] ss:$24 sps:$4 sm:$0xff]  }
 0x3b7   : > { %4675 = vmatprep.subr.bf16.mxu0 %v10077_v62  ;;  %v10155_v61 = vld [vmem:[#allocation9 + $0xed4] ss:$24 sps:$4 sm:$0xff]   ;;  %v10156_v62 = vld [vmem:[#allocation9 + $0xf90] ss:$24 sps:$4 sm:$0xff]  }
 0x3b9   : > { %4711 = vmatpush1.bf16.msra.mxu1 %v10078_v13  ;;  %v10153_v13 = vld [vmem:[#allocation9 + $0xed0] ss:$24 sps:$4 sm:$0xff]  }
 0x3ba   : > { %4676 = vmatpush2.bf16.msra.mxu0 %v10075_v35  ;;  %4712 = vmatprep.subr.bf16.mxu1 %v10086_v3  ;;  %v10164_v35 = vld [vmem:[#allocation9 + $0xf64] ss:$24 sps:$4 sm:$0xff]  }
 0x3bb   : > { %4677 = vmatprep.subr.bf16.mxu0 %v10083_v11  ;;  %v10161_v3 = vld [vmem:[#allocation9 + $0xea4] ss:$24 sps:$4 sm:$0xff]   ;;  %v10162_v11 = vld [vmem:[#allocation9 + $0xf60] ss:$24 sps:$4 sm:$0xff]  }
 0x3bd   : > { %4713 = vmatpush2.bf16.msra.mxu1 %v10084_v47  ;;  %v10159_v47 = vld [vmem:[#allocation9 + $0xea0] ss:$24 sps:$4 sm:$0xff]  }
 0x3be   : > { %4678 = vmatpush2.bf16.msra.mxu0 %v10081_v9  ;;  %4714 = vmatprep.subr.bf16.mxu1 %v10092_v33  ;;  %v10170_v9 = vld [vmem:[#allocation9 + $0xf34] ss:$24 sps:$4 sm:$0xff]  }
 0x3bf   : > { %4679 = vmatprep.subr.bf16.mxu0 %v10089_v34  ;;  %v10167_v33 = vld [vmem:[#allocation9 + $0xe74] ss:$24 sps:$4 sm:$0xff]   ;;  %v10168_v34 = vld [vmem:[#allocation9 + $0xf30] ss:$24 sps:$4 sm:$0xff]  }
 0x3c1   : > { %4715 = vmatpush2.bf16.msra.mxu1 %v10090_v45  ;;  %v10165_v45 = vld [vmem:[#allocation9 + $0xe70] ss:$24 sps:$4 sm:$0xff]  }
 0x3c2   : > { %4680 = vmatpush2.bf16.msra.mxu0 %v10087_v44  ;;  %4716 = vmatprep.subr.bf16.mxu1 %v10098_v2  ;;  %v10176_v44 = vld [vmem:[#allocation9 + $0xf04] ss:$24 sps:$4 sm:$0xff]  }
 0x3c3   : > { %4681 = vmatprep.subr.bf16.mxu0 %v10095_v6  ;;  %v10173_v2 = vld [vmem:[#allocation9 + $0xe44] ss:$24 sps:$4 sm:$0xff]   ;;  %v10174_v6 = vld [vmem:[#allocation9 + $0xf00] ss:$24 sps:$4 sm:$0xff]  }
 0x3c5   : > { %4717 = vmatpush2.bf16.msra.mxu1 %v10096_v40  ;;  %v10171_v40 = vld [vmem:[#allocation9 + $0xe40] ss:$24 sps:$4 sm:$0xff]  }
 0x3c6   : > { %4682 = vmatpush2.bf16.msra.mxu0 %v10093_v21  ;;  %4718 = vmatprep.subr.bf16.mxu1 %v10104_v58  ;;  %v10182_v21 = vld [vmem:[#allocation9 + $0x11d4] ss:$24 sps:$4 sm:$0xff]  }
 0x3c7   : > { %4683 = vmatprep.subr.bf16.mxu0 %v10101_v23  ;;  %v10179_v58 = vld [vmem:[#allocation9 + $0xe14] ss:$24 sps:$4 sm:$0xff]   ;;  %v10180_v23 = vld [vmem:[#allocation9 + $0x11d0] ss:$24 sps:$4 sm:$0xff]  }
 0x3c9   : > { %4719 = vmatpush2.bf16.msra.mxu1 %v10102_v4  ;;  %v10177_v4 = vld [vmem:[#allocation9 + $0xe10] ss:$24 sps:$4 sm:$0xff]  }
 0x3ca   : > { %4684 = vmatpush2.bf16.msra.mxu0 %v10099_v46  ;;  %4720 = vmatprep.subr.bf16.mxu1 %v10107_v10  ;;  %v10186_v46 = vld [vmem:[#allocation9 + $0x11a0] ss:$24 sps:$4 sm:$0xff]  }
 0x3cb   : > { %5916 = vmatprep.subr.bf16.mxu0 %v10110_v5  ;;  %v10183_v10 = vld [vmem:[#allocation9 + $0xde0] ss:$24 sps:$4 sm:$0xff]   ;;  %v10194_v5 = vld [vmem:[#allocation9 + $0x1174] ss:$24 sps:$4 sm:$0xff]  }
 0x3cd   : > { %4686 = vmatmul.mubr.bf16.vlgmr.msra.gmra.mxu0 %v11388_v32  ;;  %4721 = vmatpush2.bf16.msra.mxu1 %v10105_v8  ;;  %v10123_v32 = vld [vmem:[#allocation9 + $0x490] ss:$24 sps:$4 sm:$0xff]  }
 0x3ce   : > { %5917 = vmatpush1.bf16.msra.mxu0 %v10108_v63  ;;  %5948 = vmatprep.mubr.bf16.mxu0 %v11402_v43  ;;  %v10192_v8 = vld [vmem:[#allocation9 + $0x1170] ss:$24 sps:$4 sm:$0xff]  }
 0x3cf   : > { %4722 = vmatprep.subr.bf16.mxu1 %v10113_v37  ;;  %5918 = vmatprep.subr.bf16.mxu0 %v10116_v15  ;;  %v10189_v63 = vld [vmem:[#allocation9 + $0xdb0] ss:$24 sps:$4 sm:$0xff]   ;;  %v10200_v37 = vld [vmem:[#allocation9 + $0x1144] ss:$24 sps:$4 sm:$0xff]  }
 0x3d0   : > { %v10197_v15 = vld [vmem:[#allocation9 + $0xd84] ss:$24 sps:$4 sm:$0xff]  }
 0x3d1   : > { %4723 = vmatpush2.bf16.msra.mxu1 %v10111_v17  ;;  %v4739_v17 = vld [vmem:[#allocation2 + $0x30] sm:$0xfc] }
 0x3d2   : > { %5919 = vmatpush1.bf16.msra.mxu0 %v10114_v19  ;;  %4724 = vmatprep.subr.bf16.mxu1 %v10119_v38  ;;  %v4743_v19 = vld [vmem:[#allocation2 + $0x8] sm:$0x1f]  ;;  %v10198_v38 = vld [vmem:[#allocation9 + $0x1140] ss:$24 sps:$4 sm:$0xff]  }
 0x3d3   : > { %5920 = vmatprep.subr.bf16.mxu0 %v10122_v20  ;;  %v10195_v20 = vld [vmem:[#allocation9 + $0xd80] ss:$24 sps:$4 sm:$0xff]  }
 0x3d5   : > { %4725 = vmatpush2.bf16.msra.mxu1 %v10117_v25  ;;  %v10203_v25 = vld [vmem:[#allocation9 + $0x1114] ss:$24 sps:$4 sm:$0xff]  }
 0x3d6   : > { %5921 = vmatpush1.bf16.msra.mxu0 %v10120_v31  ;;  %4726 = vmatprep.subr.bf16.mxu1 %v10125_v14  ;;  %v4747_v31 = vpack.c.bf16 %v4743_v19, %v4739_v17  ;;  %v10206_v14 = vld [vmem:[#allocation9 + $0xd5c] ss:$24 sps:$4 sm:$0xff]   ;;  %v10276_v19 = vld [vmem:[#allocation9 + $0x11d8] ss:$24 sps:$4 sm:$0xff]  }
 0x3d7   : > { %5922 = vmatprep.subr.bf16.mxu0 %v10128_v53  ;;  %v10201_v53 = vld [vmem:[#allocation9 + $0x1110] ss:$24 sps:$4 sm:$0xff]   ;;  %v10275_v17 = vld [vmem:[#allocation9 + $0xe1c] ss:$24 sps:$4 sm:$0xff]  }
 0x3d9   : > { %4727 = vmatpush2.bf16.msra.mxu1 %v10123_v32  ;;  %v11410_v32 = vrot.slane %v4747_v31, 1  ;;  %v10282_v31 = vld [vmem:[#allocation9 + $0x11a8] ss:$24 sps:$4 sm:$0xff]  }
 0x3da   : > { %5923 = vmatpush1.bf16.msra.mxu0 %v10126_v52  ;;  %5959 = vmatprep.subr.bf16.mxu1 %v10134_v51  ;;  %v10209_v52 = vld [vmem:[#allocation9 + $0x10e4] ss:$24 sps:$4 sm:$0xff]  }
 0x3db   : > { %5924 = vmatprep.subr.bf16.mxu0 %v10131_v12  ;;  %v10212_v51 = vld [vmem:[#allocation9 + $0xd2c] ss:$24 sps:$4 sm:$0xff]   ;;  %v10210_v12 = vld [vmem:[#allocation9 + $0xd28] ss:$24 sps:$4 sm:$0xff]  }
 0x3dc   : > { %4729 = vmatmul.mubr.bf16.vlgmr.msra.gmra.mxu1 %v11392_v16  ;;  %v10150_v16 = vld [vmem:[#allocation9 + $0xfc0] ss:$24 sps:$4 sm:$0xff]  }
 0x3dd   : > { %5960 = vmatpush1.bf16.msra.mxu1 %v10132_v7  ;;  %5991 = vmatprep.mubr.bf16.mxu1 %v11406_v1  ;;  %v10218_v7 = vld [vmem:[#allocation9 + $0xcfc] ss:$24 sps:$4 sm:$0xff]  }
 0x3de   : > { %5925 = vmatpush1.bf16.msra.mxu0 %v10129_v50  ;;  %5961 = vmatprep.subr.bf16.mxu1 %v10140_v49  ;;  %v10213_v50 = vld [vmem:[#allocation9 + $0x10b0] ss:$24 sps:$4 sm:$0xff]  }
 0x3df   : > { %5926 = vmatprep.subr.bf16.mxu0 %v10137_v28  ;;  %v10216_v49 = vld [vmem:[#allocation9 + $0xcf8] ss:$24 sps:$4 sm:$0xff]   ;;  %v10221_v28 = vld [vmem:[#allocation9 + $0x1084] ss:$24 sps:$4 sm:$0xff]  }
 0x3e1   : > { %5962 = vmatpush1.bf16.msra.mxu1 %v10138_v57  ;;  %v10224_v57 = vld [vmem:[#allocation9 + $0xccc] ss:$24 sps:$4 sm:$0xff]  }
 0x3e2   : > { %5927 = vmatpush1.bf16.msra.mxu0 %v10135_v59  ;;  %5963 = vmatprep.subr.bf16.mxu1 %v10146_v60  ;;  %v4745_v59 = vld [vmem:[#allocation2 + $0x28] sm:$0x1f]  ;;  %v10219_v60 = vld [vmem:[#allocation9 + $0x1080] ss:$24 sps:$4 sm:$0xff]  }
 0x3e3   : > { %5928 = vmatprep.subr.bf16.mxu0 %v10143_v36  ;;  %v4741_v36 = vld [vmem:[#allocation2 + $0x18] sm:$0xfc] }
 0x3e5   : > { %5964 = vmatpush1.bf16.msra.mxu1 %v10144_v30  ;;  %v10222_v30 = vld [vmem:[#allocation9 + $0xcc8] ss:$24 sps:$4 sm:$0xff]  }
 0x3e6   : > { %5929 = vmatpush1.bf16.msra.mxu0 %v10141_v55  ;;  %5965 = vmatprep.subr.bf16.mxu1 %v10152_v0  ;;  %v4749_v55 = vpack.c.bf16 %v4745_v59, %v4741_v36  ;;  %v10230_v0 = vld [vmem:[#allocation9 + $0x105c] ss:$24 sps:$4 sm:$0xff]   ;;  %v10305_v59 = vld [vmem:[#allocation9 + $0x10ec] ss:$24 sps:$4 sm:$0xff]   ;;  %v10303_v36 = vld [vmem:[#allocation9 + $0x10e8] ss:$24 sps:$4 sm:$0xff]  }
 0x3e7   : > { %5930 = vmatprep.subr.bf16.mxu0 %v10149_v24  ;;  %v10227_v24 = vld [vmem:[#allocation9 + $0xc9c] ss:$24 sps:$4 sm:$0xff]  }
 0x3e9   : > { %5966 = vmatpush1.bf16.msra.mxu1 %v10150_v16  ;;  %v10228_v16 = vld [vmem:[#allocation9 + $0x1058] ss:$24 sps:$4 sm:$0xff]  }
 0x3ea   : > { %5931 = vmatpush1.bf16.msra.mxu0 %v10147_v56  ;;  %5967 = vmatprep.subr.bf16.mxu1 %v10158_v29  ;;  %v11414_v56 = vrot.slane %v4749_v55, 1  ;;  %v10225_v29 = vld [vmem:[#allocation9 + $0xc98] ss:$24 sps:$4 sm:$0xff]   ;;  %v10311_v55 = vld [vmem:[#allocation9 + $0x10bc] ss:$24 sps:$4 sm:$0xff]  }
 0x3eb   : > { %5932 = vmatprep.subr.bf16.mxu0 %v10155_v61  ;;  %v10236_v61 = vld [vmem:[#allocation9 + $0x102c] ss:$24 sps:$4 sm:$0xff]  }
 0x3ed   : > { %5968 = vmatpush1.bf16.msra.mxu1 %v10156_v62  ;;  %v10233_v62 = vld [vmem:[#allocation9 + $0xc6c] ss:$24 sps:$4 sm:$0xff]  }
 0x3ee   : > { %5933 = vmatpush2.bf16.msra.mxu0 %v10153_v13  ;;  %5969 = vmatprep.subr.bf16.mxu1 %v10164_v35  ;;  %v10234_v13 = vld [vmem:[#allocation9 + $0x1028] ss:$24 sps:$4 sm:$0xff]  }
 0x3ef   : > { %5934 = vmatprep.subr.bf16.mxu0 %v10161_v3  ;;  %v10231_v35 = vld [vmem:[#allocation9 + $0xc68] ss:$24 sps:$4 sm:$0xff]   ;;  %v10242_v3 = vld [vmem:[#allocation9 + $0xffc] ss:$24 sps:$4 sm:$0xff]  }
 0x3f1   : > { %5970 = vmatpush1.bf16.msra.mxu1 %v10162_v11  ;;  %v10239_v11 = vld [vmem:[#allocation9 + $0xc3c] ss:$24 sps:$4 sm:$0xff]  }
 0x3f2   : > { %5935 = vmatpush2.bf16.msra.mxu0 %v10159_v47  ;;  %5971 = vmatprep.subr.bf16.mxu1 %v10170_v9  ;;  %v10240_v47 = vld [vmem:[#allocation9 + $0xff8] ss:$24 sps:$4 sm:$0xff]  }
 0x3f3   : > { %5936 = vmatprep.subr.bf16.mxu0 %v10167_v33  ;;  %v10237_v9 = vld [vmem:[#allocation9 + $0xc38] ss:$24 sps:$4 sm:$0xff]   ;;  %v10248_v33 = vld [vmem:[#allocation9 + $0xfcc] ss:$24 sps:$4 sm:$0xff]  }
 0x3f5   : > { %5972 = vmatpush1.bf16.msra.mxu1 %v10168_v34  ;;  %v10245_v34 = vld [vmem:[#allocation9 + $0xc0c] ss:$24 sps:$4 sm:$0xff]  }
 0x3f6   : > { %5937 = vmatpush2.bf16.msra.mxu0 %v10165_v45  ;;  %5973 = vmatprep.subr.bf16.mxu1 %v10176_v44  ;;  %v10246_v45 = vld [vmem:[#allocation9 + $0xfc8] ss:$24 sps:$4 sm:$0xff]  }
 0x3f7   : > { %5938 = vmatprep.subr.bf16.mxu0 %v10173_v2  ;;  %v10243_v44 = vld [vmem:[#allocation9 + $0xc08] ss:$24 sps:$4 sm:$0xff]   ;;  %v10254_v2 = vld [vmem:[#allocation9 + $0xf9c] ss:$24 sps:$4 sm:$0xff]  }
 0x3f9   : > { %5974 = vmatpush1.bf16.msra.mxu1 %v10174_v6  ;;  %v10251_v6 = vld [vmem:[#allocation9 + $0xedc] ss:$24 sps:$4 sm:$0xff]  }
 0x3fa   : > { %5939 = vmatpush2.bf16.msra.mxu0 %v10171_v40  ;;  %5975 = vmatprep.subr.bf16.mxu1 %v10182_v21  ;;  %v10252_v40 = vld [vmem:[#allocation9 + $0xf98] ss:$24 sps:$4 sm:$0xff]  }
 0x3fb   : > { %5940 = vmatprep.subr.bf16.mxu0 %v10179_v58  ;;  %v10249_v21 = vld [vmem:[#allocation9 + $0xed8] ss:$24 sps:$4 sm:$0xff]   ;;  %v10260_v58 = vld [vmem:[#allocation9 + $0xf6c] ss:$24 sps:$4 sm:$0xff]  }
 0x3fd   : > { %5976 = vmatpush2.bf16.msra.mxu1 %v10180_v23  ;;  %v10257_v23 = vld [vmem:[#allocation9 + $0xeac] ss:$24 sps:$4 sm:$0xff]  }
 0x3fe   : > { %5941 = vmatpush2.bf16.msra.mxu0 %v10177_v4  ;;  %5977 = vmatprep.subr.bf16.mxu1 %v10188_v22  ;;  %v10258_v4 = vld [vmem:[#allocation9 + $0xf68] ss:$24 sps:$4 sm:$0xff]  }
 0x3ff   : > { %5942 = vmatprep.subr.bf16.mxu0 %v10185_v48  ;;  %v10255_v22 = vld [vmem:[#allocation9 + $0xea8] ss:$24 sps:$4 sm:$0xff]   ;;  %v10266_v48 = vld [vmem:[#allocation9 + $0xf3c] ss:$24 sps:$4 sm:$0xff]  }
 0x401   : > { %5978 = vmatpush2.bf16.msra.mxu1 %v10186_v46  ;;  %v10263_v46 = vld [vmem:[#allocation9 + $0xe7c] ss:$24 sps:$4 sm:$0xff]  }
 0x402   : > { %5943 = vmatpush2.bf16.msra.mxu0 %v10183_v10  ;;  %5979 = vmatprep.subr.bf16.mxu1 %v10194_v5  ;;  %v10264_v10 = vld [vmem:[#allocation9 + $0xf38] ss:$24 sps:$4 sm:$0xff]  }
 0x403   : > { %5944 = vmatprep.subr.bf16.mxu0 %v10191_v39  ;;  %v10261_v5 = vld [vmem:[#allocation9 + $0xe78] ss:$24 sps:$4 sm:$0xff]   ;;  %v10272_v39 = vld [vmem:[#allocation9 + $0xf0c] ss:$24 sps:$4 sm:$0xff]  }
 0x405   : > { %5980 = vmatpush2.bf16.msra.mxu1 %v10192_v8  ;;  %v10269_v8 = vld [vmem:[#allocation9 + $0xe4c] ss:$24 sps:$4 sm:$0xff]  }
 0x406   : > { %5945 = vmatpush2.bf16.msra.mxu0 %v10189_v63  ;;  %5981 = vmatprep.subr.bf16.mxu1 %v10200_v37  ;;  %v10270_v63 = vld [vmem:[#allocation9 + $0xf08] ss:$24 sps:$4 sm:$0xff]  }
 0x407   : > { %5946 = vmatprep.subr.bf16.mxu0 %v10197_v15  ;;  %v10267_v37 = vld [vmem:[#allocation9 + $0xe48] ss:$24 sps:$4 sm:$0xff]   ;;  %v10278_v15 = vld [vmem:[#allocation9 + $0x11dc] ss:$24 sps:$4 sm:$0xff]  }
 0x409   : > { %5982 = vmatpush2.bf16.msra.mxu1 %v10198_v38  ;;  %v10273_v38 = vld [vmem:[#allocation9 + $0xe18] ss:$24 sps:$4 sm:$0xff]  }
 0x40a   : > { %5947 = vmatpush2.bf16.msra.mxu0 %v10195_v20  ;;  %5983 = vmatprep.subr.bf16.mxu1 %v10203_v25  ;;  %v10284_v20 = vld [vmem:[#allocation9 + $0x11ac] ss:$24 sps:$4 sm:$0xff]  }
 0x40b   : > { %6002 = vmatprep.subr.bf16.mxu0 %v10206_v14  ;;  %v10281_v25 = vld [vmem:[#allocation9 + $0xdec] ss:$24 sps:$4 sm:$0xff]   ;;  %v10279_v14 = vld [vmem:[#allocation9 + $0xde8] ss:$24 sps:$4 sm:$0xff]  }
 0x40d   : > { %5949 = vmatmul.mubr.bf16.vlgmr.msra.gmra.mxu0 %v11410_v32  ;;  %5984 = vmatpush2.bf16.msra.mxu1 %v10201_v53  ;;  %v10290_v53 = vld [vmem:[#allocation9 + $0x117c] ss:$24 sps:$4 sm:$0xff]  }
 0x40e   : > { %6003 = vmatpush1.bf16.msra.mxu0 %v10204_v41  ;;  %6034 = vmatprep.mubr.bf16.mxu0 %v11402_v43  ;;  %v10287_v41 = vld [vmem:[#allocation9 + $0xdbc] ss:$24 sps:$4 sm:$0xff]  }
 0x40f   : > { %5985 = vmatprep.subr.bf16.mxu1 %v10209_v52  ;;  %6004 = vmatprep.subr.bf16.mxu0 %v10212_v51  ;;  %v10288_v52 = vld [vmem:[#allocation9 + $0x1178] ss:$24 sps:$4 sm:$0xff]  }
 0x410   : > { %v10285_v51 = vld [vmem:[#allocation9 + $0xdb8] ss:$24 sps:$4 sm:$0xff]  }
 0x411   : > { %5986 = vmatpush2.bf16.msra.mxu1 %v10207_v27  ;;  %v10296_v27 = vld [vmem:[#allocation9 + $0x114c] ss:$24 sps:$4 sm:$0xff]  }
 0x412   : > { %6005 = vmatpush1.bf16.msra.mxu0 %v10210_v12  ;;  %5987 = vmatprep.subr.bf16.mxu1 %v10215_v42  ;;  %v10293_v12 = vld [vmem:[#allocation9 + $0xd8c] ss:$24 sps:$4 sm:$0xff]   ;;  %v10294_v42 = vld [vmem:[#allocation9 + $0x1148] ss:$24 sps:$4 sm:$0xff]  }
 0x413   : > { %6006 = vmatprep.subr.bf16.mxu0 %v10218_v7  ;;  %v10291_v7 = vld [vmem:[#allocation9 + $0xd88] ss:$24 sps:$4 sm:$0xff]  }
 0x415   : > { %5988 = vmatpush2.bf16.msra.mxu1 %v10213_v50  ;;  %v10299_v50 = vld [vmem:[#allocation9 + $0x111c] ss:$24 sps:$4 sm:$0xff]  }
 0x416   : > { %6007 = vmatpush1.bf16.msra.mxu0 %v10216_v49  ;;  %5989 = vmatprep.subr.bf16.mxu1 %v10221_v28  ;;  %v10302_v49 = vld [vmem:[#allocation9 + $0xd64] ss:$24 sps:$4 sm:$0xff]   ;;  %v10297_v28 = vld [vmem:[#allocation9 + $0x1118] ss:$24 sps:$4 sm:$0xff]  }
 0x417   : > { %6008 = vmatprep.subr.bf16.mxu0 %v10224_v57  ;;  %v10300_v57 = vld [vmem:[#allocation9 + $0xd60] ss:$24 sps:$4 sm:$0xff]  }
 0x419   : > { %5990 = vmatpush2.bf16.msra.mxu1 %v10219_v60  ;;  %v10308_v60 = vld [vmem:[#allocation9 + $0xd34] ss:$24 sps:$4 sm:$0xff]  }
 0x41a   : > { %6009 = vmatpush1.bf16.msra.mxu0 %v10222_v30  ;;  %6045 = vmatprep.subr.bf16.mxu1 %v10230_v0  ;;  %v10306_v30 = vld [vmem:[#allocation9 + $0xd30] ss:$24 sps:$4 sm:$0xff]   ;;  %v10314_v0 = vld [vmem:[#allocation9 + $0xd04] ss:$24 sps:$4 sm:$0xff]  }
 0x41b   : > { %6010 = vmatprep.subr.bf16.mxu0 %v10227_v24  ;;  %v10309_v24 = vld [vmem:[#allocation9 + $0x10b8] ss:$24 sps:$4 sm:$0xff]  }
 0x41c   : > { %5992 = vmatmul.mubr.bf16.vlgmr.msra.gmra.mxu1 %v11414_v56 }
 0x41d   : > { %6046 = vmatpush1.bf16.msra.mxu1 %v10228_v16  ;;  %6077 = vmatprep.mubr.bf16.mxu1 %v11406_v1  ;;  %v10312_v16 = vld [vmem:[#allocation9 + $0xd00] ss:$24 sps:$4 sm:$0xff]  }
 0x41e   : > { %6011 = vmatpush1.bf16.msra.mxu0 %v10225_v29  ;;  %6047 = vmatprep.subr.bf16.mxu1 %v10236_v61  ;;  %v10317_v29 = vld [vmem:[#allocation9 + $0x108c] ss:$24 sps:$4 sm:$0xff]  }
 0x41f   : > { %6012 = vmatprep.subr.bf16.mxu0 %v10233_v62  ;;  %v10320_v61 = vld [vmem:[#allocation9 + $0xcd4] ss:$24 sps:$4 sm:$0xff]   ;;  %v10315_v62 = vld [vmem:[#allocation9 + $0x1088] ss:$24 sps:$4 sm:$0xff]  }
 0x421   : > { %6048 = vmatpush1.bf16.msra.mxu1 %v10234_v13  ;;  %v10318_v13 = vld [vmem:[#allocation9 + $0xcd0] ss:$24 sps:$4 sm:$0xff]  }
 0x422   : > { %6013 = vmatpush1.bf16.msra.mxu0 %v10231_v35  ;;  %6049 = vmatprep.subr.bf16.mxu1 %v10242_v3  ;;  %v10326_v35 = vld [vmem:[#allocation9 + $0x1064] ss:$24 sps:$4 sm:$0xff]   ;;  %v10324_v3 = vld [vmem:[#allocation9 + $0x1060] ss:$24 sps:$4 sm:$0xff]  }
 0x423   : > { %6014 = vmatprep.subr.bf16.mxu0 %v10239_v11  ;;  %v10321_v11 = vld [vmem:[#allocation9 + $0xca0] ss:$24 sps:$4 sm:$0xff]  }
 0x425   : > { %6050 = vmatpush1.bf16.msra.mxu1 %v10240_v47  ;;  %v10332_v47 = vld [vmem:[#allocation9 + $0x1034] ss:$24 sps:$4 sm:$0xff]  }
 0x426   : > { %6015 = vmatpush1.bf16.msra.mxu0 %v10237_v9  ;;  %6051 = vmatprep.subr.bf16.mxu1 %v10248_v33  ;;  %v10329_v9 = vld [vmem:[#allocation9 + $0xc74] ss:$24 sps:$4 sm:$0xff]   ;;  %v10330_v33 = vld [vmem:[#allocation9 + $0x1030] ss:$24 sps:$4 sm:$0xff]  }
 0x427   : > { %6016 = vmatprep.subr.bf16.mxu0 %v10245_v34  ;;  %v10327_v34 = vld [vmem:[#allocation9 + $0xc70] ss:$24 sps:$4 sm:$0xff]  }
 0x429   : > { %6052 = vmatpush1.bf16.msra.mxu1 %v10246_v45  ;;  %v10338_v45 = vld [vmem:[#allocation9 + $0x1004] ss:$24 sps:$4 sm:$0xff]  }
 0x42a   : > { %6017 = vmatpush1.bf16.msra.mxu0 %v10243_v44  ;;  %6053 = vmatprep.subr.bf16.mxu1 %v10254_v2  ;;  %v10335_v44 = vld [vmem:[#allocation9 + $0xc44] ss:$24 sps:$4 sm:$0xff]   ;;  %v10336_v2 = vld [vmem:[#allocation9 + $0x1000] ss:$24 sps:$4 sm:$0xff]  }
 0x42b   : > { %6018 = vmatprep.subr.bf16.mxu0 %v10251_v6  ;;  %v10333_v6 = vld [vmem:[#allocation9 + $0xc40] ss:$24 sps:$4 sm:$0xff]  }
 0x42d   : > { %6054 = vmatpush1.bf16.msra.mxu1 %v10252_v40  ;;  %v10344_v40 = vld [vmem:[#allocation9 + $0xfd4] ss:$24 sps:$4 sm:$0xff]  }
 0x42e   : > { %6019 = vmatpush2.bf16.msra.mxu0 %v10249_v21  ;;  %6055 = vmatprep.subr.bf16.mxu1 %v10260_v58  ;;  %v10341_v21 = vld [vmem:[#allocation9 + $0xc14] ss:$24 sps:$4 sm:$0xff]   ;;  %v10342_v58 = vld [vmem:[#allocation9 + $0xfd0] ss:$24 sps:$4 sm:$0xff]  }
 0x42f   : > { %6020 = vmatprep.subr.bf16.mxu0 %v10257_v23  ;;  %v10339_v23 = vld [vmem:[#allocation9 + $0xc10] ss:$24 sps:$4 sm:$0xff]  }
 0x431   : > { %6056 = vmatpush1.bf16.msra.mxu1 %v10258_v4  ;;  %v10347_v4 = vld [vmem:[#allocation9 + $0xee4] ss:$24 sps:$4 sm:$0xff]  }
 0x432   : > { %6021 = vmatpush2.bf16.msra.mxu0 %v10255_v22  ;;  %6057 = vmatprep.subr.bf16.mxu1 %v10266_v48  ;;  %v10348_v22 = vld [vmem:[#allocation9 + $0xfa0] ss:$24 sps:$4 sm:$0xff]  }
 0x433   : > { %6022 = vmatprep.subr.bf16.mxu0 %v10263_v46  ;;  %v10345_v48 = vld [vmem:[#allocation9 + $0xee0] ss:$24 sps:$4 sm:$0xff]   ;;  %v10356_v46 = vld [vmem:[#allocation9 + $0xf74] ss:$24 sps:$4 sm:$0xff]  }
 0x435   : > { %6058 = vmatpush1.bf16.msra.mxu1 %v10264_v10  ;;  %v10353_v10 = vld [vmem:[#allocation9 + $0xeb4] ss:$24 sps:$4 sm:$0xff]  }
 0x436   : > { %6023 = vmatpush2.bf16.msra.mxu0 %v10261_v5  ;;  %6059 = vmatprep.subr.bf16.mxu1 %v10272_v39  ;;  %v10354_v5 = vld [vmem:[#allocation9 + $0xf70] ss:$24 sps:$4 sm:$0xff]  }
 0x437   : > { %6024 = vmatprep.subr.bf16.mxu0 %v10269_v8  ;;  %v10351_v39 = vld [vmem:[#allocation9 + $0xeb0] ss:$24 sps:$4 sm:$0xff]   ;;  %v10362_v8 = vld [vmem:[#allocation9 + $0xf44] ss:$24 sps:$4 sm:$0xff]  }
 0x439   : > { %6060 = vmatpush1.bf16.msra.mxu1 %v10270_v63  ;;  %v10359_v63 = vld [vmem:[#allocation9 + $0xe84] ss:$24 sps:$4 sm:$0xff]  }
 0x43a   : > { %6025 = vmatpush2.bf16.msra.mxu0 %v10267_v37  ;;  %6061 = vmatprep.subr.bf16.mxu1 %v10278_v15  ;;  %v10360_v37 = vld [vmem:[#allocation9 + $0xf40] ss:$24 sps:$4 sm:$0xff]  }
 0x43b   : > { %6026 = vmatprep.subr.bf16.mxu0 %v10275_v17  ;;  %v10357_v15 = vld [vmem:[#allocation9 + $0xe80] ss:$24 sps:$4 sm:$0xff]   ;;  %v10368_v17 = vld [vmem:[#allocation9 + $0xf14] ss:$24 sps:$4 sm:$0xff]  }
 0x43d   : > { %6062 = vmatpush2.bf16.msra.mxu1 %v10276_v19  ;;  %v10365_v19 = vld [vmem:[#allocation9 + $0xe54] ss:$24 sps:$4 sm:$0xff]  }
 0x43e   : > { %6027 = vmatpush2.bf16.msra.mxu0 %v10273_v38  ;;  %6063 = vmatprep.subr.bf16.mxu1 %v10284_v20  ;;  %v10366_v38 = vld [vmem:[#allocation9 + $0xf10] ss:$24 sps:$4 sm:$0xff]  }
 0x43f   : > { %6028 = vmatprep.subr.bf16.mxu0 %v10281_v25  ;;  %v10363_v20 = vld [vmem:[#allocation9 + $0xe50] ss:$24 sps:$4 sm:$0xff]   ;;  %v10374_v25 = vld [vmem:[#allocation9 + $0x11e4] ss:$24 sps:$4 sm:$0xff]  }
 0x441   : > { %6064 = vmatpush2.bf16.msra.mxu1 %v10282_v31  ;;  %v10371_v31 = vld [vmem:[#allocation9 + $0xe24] ss:$24 sps:$4 sm:$0xff]  }
 0x442   : > { %6029 = vmatpush2.bf16.msra.mxu0 %v10279_v14  ;;  %6065 = vmatprep.subr.bf16.mxu1 %v10290_v53  ;;  %v10372_v14 = vld [vmem:[#allocation9 + $0x11e0] ss:$24 sps:$4 sm:$0xff]  }
 0x443   : > { %6030 = vmatprep.subr.bf16.mxu0 %v10287_v41  ;;  %v10369_v53 = vld [vmem:[#allocation9 + $0xe20] ss:$24 sps:$4 sm:$0xff]   ;;  %v10380_v41 = vld [vmem:[#allocation9 + $0x11b4] ss:$24 sps:$4 sm:$0xff]  }
 0x445   : > { %6066 = vmatpush2.bf16.msra.mxu1 %v10288_v52  ;;  %v10377_v52 = vld [vmem:[#allocation9 + $0xdf4] ss:$24 sps:$4 sm:$0xff]  }
 0x446   : > { %6031 = vmatpush2.bf16.msra.mxu0 %v10285_v51  ;;  %6067 = vmatprep.subr.bf16.mxu1 %v10296_v27  ;;  %v10378_v51 = vld [vmem:[#allocation9 + $0x11b0] ss:$24 sps:$4 sm:$0xff]  }
 0x447   : > { %6032 = vmatprep.subr.bf16.mxu0 %v10293_v12  ;;  %v10375_v27 = vld [vmem:[#allocation9 + $0xdf0] ss:$24 sps:$4 sm:$0xff]   ;;  %v10386_v12 = vld [vmem:[#allocation9 + $0x1184] ss:$24 sps:$4 sm:$0xff]  }
 0x449   : > { %6068 = vmatpush2.bf16.msra.mxu1 %v10294_v42  ;;  %v10383_v42 = vld [vmem:[#allocation9 + $0xdc4] ss:$24 sps:$4 sm:$0xff]  }
 0x44a   : > { %6033 = vmatpush2.bf16.msra.mxu0 %v10291_v7  ;;  %6069 = vmatprep.subr.bf16.mxu1 %v10299_v50  ;;  %v10384_v7 = vld [vmem:[#allocation9 + $0x1180] ss:$24 sps:$4 sm:$0xff]  }
 0x44b   : > { %6088 = vmatprep.subr.bf16.mxu0 %v10302_v49  ;;  %v10381_v50 = vld [vmem:[#allocation9 + $0xdc0] ss:$24 sps:$4 sm:$0xff]   ;;  %v10392_v49 = vld [vmem:[#allocation9 + $0x1154] ss:$24 sps:$4 sm:$0xff]  }
 0x44d   : > { %6035 = vmatmul.mubr.bf16.vlgmr.msra.gmra.mxu0 %v11410_v32  ;;  %6070 = vmatpush2.bf16.msra.mxu1 %v10297_v28  ;;  %v10389_v28 = vld [vmem:[#allocation9 + $0xd94] ss:$24 sps:$4 sm:$0xff]  }
 0x44e   : > { %6089 = vmatpush1.bf16.msra.mxu0 %v10300_v57  ;;  %6120 = vmatprep.mubr.bf16.mxu0 %v11402_v43  ;;  %v10323_v43 = vld [vmem:[#allocation9 + $0xca4] ss:$24 sps:$4 sm:$0xff]   ;;  %v10390_v57 = vld [vmem:[#allocation9 + $0x1150] ss:$24 sps:$4 sm:$0xff]  }
 0x44f   : > { %6071 = vmatprep.subr.bf16.mxu1 %v10305_v59  ;;  %6090 = vmatprep.subr.bf16.mxu0 %v10308_v60  ;;  %v10387_v59 = vld [vmem:[#allocation9 + $0xd90] ss:$24 sps:$4 sm:$0xff]   ;;  %v10395_v60 = vld [vmem:[#allocation9 + $0x1124] ss:$24 sps:$4 sm:$0xff]  }
 0x451   : > { %6072 = vmatpush2.bf16.msra.mxu1 %v10303_v36  ;;  %v10393_v36 = vld [vmem:[#allocation9 + $0x1120] ss:$24 sps:$4 sm:$0xff]  }
 0x452   : > { %6091 = vmatpush1.bf16.msra.mxu0 %v10306_v30  ;;  %6073 = vmatprep.subr.bf16.mxu1 %v10311_v55  ;;  %v10398_v30 = vld [vmem:[#allocation9 + $0x10f4] ss:$24 sps:$4 sm:$0xff]   ;;  %v10396_v55 = vld [vmem:[#allocation9 + $0x10f0] ss:$24 sps:$4 sm:$0xff]  }
 0x453   : > { %6092 = vmatprep.subr.bf16.mxu0 %v10314_v0  ;;  %v10401_v0 = vld [vmem:[#allocation9 + $0x10c4] ss:$24 sps:$4 sm:$0xff]  }
 0x455   : > { %6074 = vmatpush2.bf16.msra.mxu1 %v10309_v24  ;;  %v10399_v24 = vld [vmem:[#allocation9 + $0x10c0] ss:$24 sps:$4 sm:$0xff]  }
 0x456   : > { %6093 = vmatpush1.bf16.msra.mxu0 %v10312_v16  ;;  %6075 = vmatprep.subr.bf16.mxu1 %v10317_v29  ;;  %v10404_v16 = vld [vmem:[#allocation9 + $0x1094] ss:$24 sps:$4 sm:$0xff]   ;;  %v10402_v29 = vld [vmem:[#allocation9 + $0x1090] ss:$24 sps:$4 sm:$0xff]  }
 0x457   : > { %6094 = vmatprep.subr.bf16.mxu0 %v10320_v61  ;;  %v11425_v61 = vpop.f32.mrf.mxu1 }
 0x459   : > { %6076 = vmatpush2.bf16.msra.mxu1 %v10315_v62  ;;  %v11427_v62 = vpop.f32.mrf.mxu0 }
 0x45a   : > { %6095 = vmatpush1.bf16.msra.mxu0 %v10318_v13  ;;  %6131 = vmatprep.subr.bf16.mxu1 %v10326_v35 }
 0x45b   : > { %6096 = vmatprep.subr.bf16.mxu0 %v10323_v43  ;;  %v3301_v13 = vpop.f32.mrf.mxu0  ;;  %v12011_v43 = vmov 0.0  }
 0x45c   : > { %6078 = vmatmul.mubr.bf16.vlgmr.msra.gmra.mxu1 %v11414_v56 }
 0x45d   : > { %6132 = vmatpush1.bf16.msra.mxu1 %v10324_v3  ;;  %6163 = vmatprep.mubr.bf16.mxu1 %v11406_v1  ;;  %v10350_v1 = vld [vmem:[#allocation9 + $0xfa4] ss:$24 sps:$4 sm:$0xff]   ;;  %v3303_v3 = vpop.f32.mrf.mxu0 }
 0x45e   : > { %6097 = vmatpush1.bf16.msra.mxu0 %v10321_v11  ;;  %6133 = vmatprep.subr.bf16.mxu1 %v10332_v47 }
 0x45f   : > { %6098 = vmatprep.subr.bf16.mxu0 %v10329_v9  ;;  %v3383_v47 = vpop.f32.mrf.mxu0 }
 0x461   : > { %6134 = vmatpush1.bf16.msra.mxu1 %v10330_v33 }
 0x462   : > { %6099 = vmatpush1.bf16.msra.mxu0 %v10327_v34  ;;  %6135 = vmatprep.subr.bf16.mxu1 %v10338_v45 }
 0x463   : > { %6100 = vmatprep.subr.bf16.mxu0 %v10335_v44 }
 0x465   : > { %6136 = vmatpush1.bf16.msra.mxu1 %v10336_v2 }
 0x466   : > { %6101 = vmatpush1.bf16.msra.mxu0 %v10333_v6  ;;  %6137 = vmatprep.subr.bf16.mxu1 %v10344_v40 }
 0x467   : > { %6102 = vmatprep.subr.bf16.mxu0 %v10341_v21 }
 0x469   : > { %6138 = vmatpush1.bf16.msra.mxu1 %v10342_v58 }
 0x46a   : > { %6103 = vmatpush1.bf16.msra.mxu0 %v10339_v23  ;;  %6139 = vmatprep.subr.bf16.mxu1 %v10350_v1 }
 0x46b   : > { %6104 = vmatprep.subr.bf16.mxu0 %v10347_v4 }
 0x46d   : > { %6140 = vmatpush1.bf16.msra.mxu1 %v10348_v22 }
 0x46e   : > { %6105 = vmatpush2.bf16.msra.mxu0 %v10345_v48  ;;  %6141 = vmatprep.subr.bf16.mxu1 %v10356_v46 }
 0x46f   : > { %6106 = vmatprep.subr.bf16.mxu0 %v10353_v10 }
 0x471   : > { %6142 = vmatpush1.bf16.msra.mxu1 %v10354_v5 }
 0x472   : > { %6107 = vmatpush2.bf16.msra.mxu0 %v10351_v39  ;;  %6143 = vmatprep.subr.bf16.mxu1 %v10362_v8 }
 0x473   : > { %6108 = vmatprep.subr.bf16.mxu0 %v10359_v63 }
 0x475   : > { %6144 = vmatpush1.bf16.msra.mxu1 %v10360_v37 }
 0x476   : > { %6109 = vmatpush2.bf16.msra.mxu0 %v10357_v15  ;;  %6145 = vmatprep.subr.bf16.mxu1 %v10368_v17 }
 0x477   : > { %6110 = vmatprep.subr.bf16.mxu0 %v10365_v19 }
 0x479   : > { %6146 = vmatpush1.bf16.msra.mxu1 %v10366_v38 }
 0x47a   : > { %6111 = vmatpush2.bf16.msra.mxu0 %v10363_v20  ;;  %6147 = vmatprep.subr.bf16.mxu1 %v10374_v25 }
 0x47b   : > { %6112 = vmatprep.subr.bf16.mxu0 %v10371_v31 }
 0x47d   : > { %6148 = vmatpush2.bf16.msra.mxu1 %v10372_v14 }
 0x47e   : > { %6113 = vmatpush2.bf16.msra.mxu0 %v10369_v53  ;;  %6149 = vmatprep.subr.bf16.mxu1 %v10380_v41 }
 0x47f   : > { %6114 = vmatprep.subr.bf16.mxu0 %v10377_v52 }
 0x481   : > { %6150 = vmatpush2.bf16.msra.mxu1 %v10378_v51 }
 0x482   : > { %6115 = vmatpush2.bf16.msra.mxu0 %v10375_v27  ;;  %6151 = vmatprep.subr.bf16.mxu1 %v10386_v12 }
 0x483   : > { %6116 = vmatprep.subr.bf16.mxu0 %v10383_v42 }
 0x485   : > { %6152 = vmatpush2.bf16.msra.mxu1 %v10384_v7 }
 0x486   : > { %6117 = vmatpush2.bf16.msra.mxu0 %v10381_v50  ;;  %6153 = vmatprep.subr.bf16.mxu1 %v10392_v49 }
 0x487   : > { %6118 = vmatprep.subr.bf16.mxu0 %v10389_v28 }
 0x489   : > { %6154 = vmatpush2.bf16.msra.mxu1 %v10390_v57 }
 0x48a   : > { %6119 = vmatpush2.bf16.msra.mxu0 %v10387_v59  ;;  %6155 = vmatprep.subr.bf16.mxu1 %v10395_v60 }
 0x48d   : > { %6121 = vmatmul.mubr.bf16.vlgmr.msra.gmra.mxu0 %v11410_v32  ;;  %6156 = vmatpush2.bf16.msra.mxu1 %v10393_v36  ;;  %v11429_v32 = vpop.f32.mrf.mxu1 }
 0x48e   : > { %6157 = vmatprep.subr.bf16.mxu1 %v10398_v30  ;;  %6299 = vmatprep.mubr.bf16.mxu0 %v12088_v54  ;;  %v3345_v54 = vadd.f32 %v11429_v32, %v3301_v13 }
 0x48f   : > { %v3346_v35 = vpop.f32.mrf.mxu1 }
 0x491   : > { %6158 = vmatpush2.bf16.msra.mxu1 %v10396_v55  ;;  %v3426_v11 = vpop.f32.mrf.mxu1 }
 0x492   : > { %6159 = vmatprep.subr.bf16.mxu1 %v10401_v0 }
 0x493   : > { %v3428_v9 = vpop.f32.mrf.mxu1 }
 0x495   : > { %6160 = vmatpush2.bf16.msra.mxu1 %v10399_v24  ;;  %v3430_v33 = vpop.f32.mrf.mxu1 }
 0x496   : > { %6161 = vmatprep.subr.bf16.mxu1 %v10404_v16 }
 0x497   : > { %v3432_v45 = vpop.f32.mrf.mxu1 }
 0x499   : > { %6162 = vmatpush2.bf16.msra.mxu1 %v10402_v29  ;;  %v3512_v2 = vpop.f32.mrf.mxu1 }
 0x49a   : > { %9303 = vmatprep.subr.bf16.mxu1 %v12011_v43 }
 0x49b   : > { %v3514_v40 = vpop.f32.mrf.mxu1 }
 0x49c   : > { %6164 = vmatmul.mubr.bf16.vlgmr.msra.gmra.mxu1 %v11414_v56  ;;  %v3385_v56 = vpop.f32.mrf.mxu0 }
 0x49d   : > { %9305 = vmatprep.mubr.msk.bf16.mxu1 %vm10775_vm4, %v12011_v43  ;;  %v3516_v58 = vpop.f32.mrf.mxu1  ;;  %v3343_v43 = vadd.f32 %v11425_v61, %v11427_v62  ;;  %v12094_v61 = vld [vmem:[#allocation26_spill] sm:$0xff] }
 0x49e   : > { %v3387_v34 = vpop.f32.mrf.mxu0 }
 0x49f   : > { %v3518_v1 = vpop.f32.mrf.mxu1  ;;  %v3431_v18 = vadd.f32 %v3430_v33, %v3387_v34 }
 0x4a0   : > { %v3389_v44 = vpop.f32.mrf.mxu0 }
 0x4a1   : > { %v4558_v22 = vpop.f32.mrf.mxu1 }
 0x4a2   : > { %v3469_v6 = vpop.f32.mrf.mxu0 }
 0x4a3   : > { %v4560_v46 = vpop.f32.mrf.mxu1  ;;  %v3513_v26 = vadd.f32 %v3512_v2, %v3469_v6  ;;  %v6186_v6 = vld [vmem:[#allocation10] sm:$0x3f] }
 0x4a4   : > { %v3471_v21 = vpop.f32.mrf.mxu0 }
 0x4a5   : > { %v4562_v5 = vpop.f32.mrf.mxu1  ;;  %v3515_v32 = vadd.f32 %v3514_v40, %v3471_v21 }
 0x4a6   : > { %v3473_v23 = vpop.f32.mrf.mxu0 }
 0x4a7   : > { %v4564_v8 = vpop.f32.mrf.mxu1 }
 0x4a8   : > { %v3475_v4 = vpop.f32.mrf.mxu0 }
 0x4a9   : > { %v4644_v37 = vpop.f32.mrf.mxu1 }
 0x4aa   : > { %v4515_v48 = vpop.f32.mrf.mxu0 }
 0x4ab   : > { %v4646_v17 = vpop.f32.mrf.mxu1  ;;  %v4516_v62 = vadd.f32 %v4515_v48, %v12094_v61 }
 0x4ac   : > { %v4517_v10 = vpop.f32.mrf.mxu0 }
 0x4ad   : > { %v4648_v38 = vpop.f32.mrf.mxu1  ;;  %v4559_v33 = vadd.f32 %v4558_v22, %v4516_v62  ;;  %v12096_v22 = vld [vmem:[#allocation24_spill] sm:$0xff] }
 0x4ae   : > { %v4519_v39 = vpop.f32.mrf.mxu0 }
 0x4af   : > { %v4650_v25 = vpop.f32.mrf.mxu1 }
 0x4b0   : > { %v4521_v63 = vpop.f32.mrf.mxu0 }
 0x4b1   : > { %v11434_v14 = vpop.f32.mrf.mxu1 }
 0x4b2   : > { %v4601_v15 = vpop.f32.mrf.mxu0  ;;  %12090 = vst [vmem:[#allocation27_spill] sm:$0xff] %v11434_v14  ;;  %v3433_v14 = vadd.f32 %v3432_v45, %v3389_v44 }
 0x4b3   : > { %v11436_v41 = vpop.f32.mrf.mxu1 }
 0x4b4   : > { %v4603_v19 = vpop.f32.mrf.mxu0  ;;  %12091 = vst [vmem:[#allocation28_spill] sm:$0xff] %v11436_v41  ;;  %v3429_v41 = vadd.f32 %v3428_v9, %v3385_v56  ;;  %v4520_v9 = vadd.f32 %v4519_v39, %v3345_v54 }
 0x4b5   : > { %v11438_v51 = vpop.f32.mrf.mxu1 }
 0x4b6   : > { %v4605_v20 = vpop.f32.mrf.mxu0  ;;  %12092 = vst [vmem:[#allocation43_spill] sm:$0xff] %v11438_v51  ;;  %v3427_v51 = vadd.f32 %v3426_v11, %v3383_v47  ;;  %v4518_v11 = vadd.f32 %v4517_v10, %v3343_v43  ;;  %v4604_v45 = vadd.f32 %v4603_v19, %v3429_v41  ;;  %v4563_v21 = vadd.f32 %v4562_v5, %v4520_v9 }
 0x4b7   : > { %v11440_v12 = vpop.f32.mrf.mxu1 }
 0x4b8   : > { %v4607_v31 = vpop.f32.mrf.mxu0  ;;  %12093 = vst [vmem:[#allocation46_spill] sm:$0xff] %v11440_v12  ;;  %v3347_v12 = vadd.f32 %v3346_v35, %v3303_v3  ;;  %v3517_v3 = vadd.f32 %v3516_v58, %v3473_v23  ;;  %v3519_v35 = vadd.f32 %v3518_v1, %v3475_v4  ;;  %v4602_v34 = vadd.f32 %v4601_v15, %v3427_v51 }
 0x4b9   : > { %v4561_v44 = vadd.f32 %v4560_v46, %v4518_v11  ;;  %v4608_v2 = vadd.f32 %v4607_v31, %v3433_v14  ;;  %v4606_v23 = vadd.f32 %v4605_v20, %v3431_v18  ;;  %v4647_v1 = vadd.f32 %v4646_v17, %v4604_v45 }
 0x4ba   : > { %v4687_v53 = vpop.f32.mrf.mxu0  ;;  %v4522_v56 = vadd.f32 %v4521_v63, %v3347_v12  ;;  %v4645_v58 = vadd.f32 %v4644_v37, %v4602_v34  ;;  %v12095_v12 = vld [vmem:[#allocation23_spill] sm:$0xff]  ;;  %v6195_v15 = vrot.slane %v6186_v6, %v12096_v22 }
 0x4bb   : > { %v4651_v4 = vadd.f32 %v4650_v25, %v4608_v2  ;;  %v4649_v39 = vadd.f32 %v4648_v38, %v4606_v23  ;;  %v4688_v54 = vadd.f32 %v4687_v53, %v3513_v26  ;;  %v6191_v63 = vrot.slane %v6186_v6, %v12095_v12 }
 0x4bc   : > { %v4689_v52 = vpop.f32.mrf.mxu0  ;;  %v4565_v40 = vadd.f32 %v4564_v8, %v4522_v56  ;;  %v12097_v8 = vld [vmem:[#allocation27_spill] sm:$0xff] }
 0x4bd   : > { %v4690_v46 = vadd.f32 %v4689_v52, %v3515_v32  ;;  %v4731_v18 = vadd.f32 %v12097_v8, %v4688_v54 }
 0x4be   : > { %v4691_v27 = vpop.f32.mrf.mxu0 }
 0x4bf   : > { %v4692_v51 = vadd.f32 %v4691_v27, %v3517_v3  ;;  %v12105_v45 = vld [vmem:[#allocation46_spill] sm:$0xff] }
 0x4c0   : > { %v4693_v42 = vpop.f32.mrf.mxu0 }
 0x4c1   : > { %v4694_v5 = vadd.f32 %v4693_v42, %v3519_v35  ;;  %v12102_v42 = vld [vmem:[#allocation25_spill] sm:$0xff]  ;;  %v12104_v35 = vld [vmem:[#allocation43_spill] sm:$0xff] }
 0x4c2   : > { %v4735_v11 = vadd.f32 %v12104_v35, %v4692_v51  ;;  %v10409_v35 = vld [vmem:[%s11991_s7 + $0xb0] sm:$0xff]  }
 0x4c3   : > { %v4737_v2 = vadd.f32 %v12105_v45, %v4694_v5  ;;  %v10420_v45 = vld [vmem:[%s11991_s7 + $0x50] sm:$0xff]  }
 0x4cd   : > { %v5950_v50 = vpop.f32.mrf.mxu0 }
 0x4cf   : > { %v5952_v28 = vpop.f32.mrf.mxu0 }
 0x4d1   : > { %v5954_v59 = vpop.f32.mrf.mxu0 }
 0x4d3   : > { %v5956_v36 = vpop.f32.mrf.mxu0 }
 0x4dc   : > { %v5993_v7 = vpop.f32.mrf.mxu1 }
 0x4dd   : > { %v5994_v19 = vadd.f32 %v5993_v7, %v5950_v50 }
 0x4de   : > { %v5995_v49 = vpop.f32.mrf.mxu1 }
 0x4df   : > { %v5996_v31 = vadd.f32 %v5995_v49, %v5952_v28  ;;  %v6174_v49 = vadd.f32 %v5994_v19, %v4559_v33  ;;  %v6199_v28 = vrot.slane %v6186_v6, %v12102_v42 }
 0x4e0   : > { %v5997_v57 = vpop.f32.mrf.mxu1 }
 0x4e1   : > { %v5998_v10 = vadd.f32 %v5997_v57, %v5954_v59  ;;  %v12098_v57 = vld [vmem:[#allocation22_spill] sm:$0xff]  ;;  %v12100_v59 = vld [vmem:[#allocation28_spill] sm:$0xff]  ;;  %v6175_v27 = vadd.f32 %v5996_v31, %v4561_v44 }
 0x4e2   : > { %v5999_v60 = vpop.f32.mrf.mxu1  ;;  %v12099_v38 = vsub.s32 3, %v12098_v57  ;;  %v12101_v7 = vsub.s32 4, %v12098_v57  ;;  %v12103_v32 = vsub.s32 5, %v12098_v57 }
 0x4e3   : > { %v6000_v37 = vadd.f32 %v5999_v60, %v5956_v36  ;;  %v6180_v17 = vadd.f32 %v5998_v10, %v4563_v21 }
 0x4e4   : > { %v6203_v26 = vrot.slane %v6186_v6, %v12099_v38  ;;  %v6207_v50 = vrot.slane %v6186_v6, %v12101_v7  ;;  %v6211_v3 = vrot.slane %v6186_v6, %v12103_v32  ;;  %v10408_v32 = vld [vmem:[%s11991_s7 + $0x70] sm:$0xff]  }
 0x50d   : > { %v6036_v55 = vpop.f32.mrf.mxu0 }
 0x50f   : > { %v6038_v24 = vpop.f32.mrf.mxu0 }
 0x511   : > { %v6040_v29 = vpop.f32.mrf.mxu0 }
 0x513   : > { %v6042_v47 = vpop.f32.mrf.mxu0 }
 0x51c   : > { %v6079_v30 = vpop.f32.mrf.mxu1 }
 0x51d   : > { %v6080_v20 = vadd.f32 %v6079_v30, %v6036_v55  ;;  %v6181_v30 = vadd.f32 %v6000_v37, %v4565_v40 }
 0x51e   : > { %v6081_v0 = vpop.f32.mrf.mxu1 }
 0x51f   : > { %v6082_v43 = vadd.f32 %v6081_v0, %v6038_v24  ;;  %v4733_v0 = vadd.f32 %v12100_v59, %v4690_v46 }
 0x520   : > { %v6083_v16 = vpop.f32.mrf.mxu1 }
 0x521   : > { %v6177_v25 = vadd.f32 %v6082_v43, %v4647_v1  ;;  %v6084_v24 = vadd.f32 %v6083_v16, %v6040_v29  ;;  %v6224_v16 = vadd.f32 %v6191_v63, %v6180_v17  ;;  %v6176_v29 = vadd.f32 %v6080_v20, %v4645_v58 }
 0x522   : > { %v6085_v13 = vpop.f32.mrf.mxu1  ;;  %v6225_v1 = vadd.f32 %v6195_v15, %v6181_v30  ;;  %v8815_v30 = vld [vmem:[%s11990_s6 + $0x4] sm:$0x7] }
 0x523   : > { %v6086_v48 = vadd.f32 %v6085_v13, %v6042_v47  ;;  %v6221_v47 = vadd.f32 %v6203_v26, %v6177_v25  ;;  %v6182_v56 = vadd.f32 %v6084_v24, %v4649_v39  ;;  %v6236_v43 = vmax.f32 %v6224_v16, 0.0  ;;  %v10412_v16 = vld [vmem:[%s11991_s7 + $0xa8] sm:$0xff]  }
 0x524   : > { %v6220_v54 = vadd.f32 %v6199_v28, %v6176_v29  ;;  %v6237_v5 = vmax.f32 %v6225_v1, 0.0  ;;  %v10413_v29 = vld [vmem:[%s11991_s7 + $0x28] sm:$0xff]   ;;  %v10427_v1 = vld [vmem:[%s11991_s7 + $0x80] sm:$0xff]  }
 0x525   : > { %v6183_v14 = vadd.f32 %v6086_v48, %v4651_v4  ;;  %v6218_v48 = vadd.f32 %v6191_v63, %v6174_v49  ;;  %v6233_v58 = vmax.f32 %v6221_v47, 0.0  ;;  %v6226_v46 = vadd.f32 %v6199_v28, %v6182_v56  ;;  %v6251_v28 = vld [vmem:[%s11990_s6] sm:$0x7] }
 0x526   : > { %v6232_v37 = vmax.f32 %v6220_v54, 0.0  ;;  %v10414_v47 = vld [vmem:[%s11991_s7 + $0x60] sm:$0xff]  }
 0x527   : > { %v6227_v62 = vadd.f32 %v6203_v26, %v6183_v14  ;;  %v6230_v14 = vmax.f32 %v6218_v48, 0.0  ;;  %v6238_v25 = vmax.f32 %v6226_v46, 0.0  ;;  %v10416_v56 = vld [vmem:[%s11991_s7 + $0x20] sm:$0xff]   ;;  %v10422_v48 = vld [vmem:[%s11991_s7 + $0x10] sm:$0xff]  }
 0x529   : > { %v6239_v21 = vmax.f32 %v6227_v62, 0.0  ;;  %v6242_v17 = vmax.f32 %v6230_v14, %v6233_v58  ;;  %v12106_v62 = vmov 0.0  }
 0x52b   : > { %v6245_v51 = vmax.f32 %v6236_v43, %v6239_v21  ;;  %v10424_v21 = vld [vmem:[%s11991_s7 + $0x88] sm:$0xff]  }
 0x54d   : > { %v6122_v61 = vpop.f32.mrf.mxu0 }
 0x54f   : > { %v6124_v41 = vpop.f32.mrf.mxu0 }
 0x551   : > { %v6126_v60 = vpop.f32.mrf.mxu0 }
 0x553   : > { %v6128_v40 = vpop.f32.mrf.mxu0 }
 0x55c   : > { %v6165_v53 = vpop.f32.mrf.mxu1 }
 0x55d   : > { %v6166_v52 = vadd.f32 %v6165_v53, %v6122_v61  ;;  %v6219_v61 = vadd.f32 %v6195_v15, %v6175_v27  ;;  %v10776_v15 = vmov 65535   ;;  %v6248_v53 = vpack.c.bf16 %v6245_v51, %v6242_v17 }
 0x55e   : > { %v6167_v36 = vpop.f32.mrf.mxu1  ;;  %v6256_v20 = vsel %vm1650_vm2, 4294967295, %v10776_v15 }
 0x55f   : > { %v6178_v55 = vadd.f32 %v6166_v52, %v4731_v18  ;;  %v6168_v13 = vadd.f32 %v6167_v36, %v6124_v41  ;;  %v6231_v41 = vmax.f32 %v6219_v61, 0.0  ;;  %v6257_v52 = vsel %vm589_vm0, %v6256_v20, 0  ;;  %v10423_v61 = vld [vmem:[%s11991_s7 + $0x48] sm:$0xff]  }
 0x560   : > { %v6169_v9 = vpop.f32.mrf.mxu1  ;;  %v6259_v49 = vand.u32 %v6257_v52, %v6248_v53  ;;  %v12107_v36 = vmov 0  }
 0x561   : > { %v6222_v33 = vadd.f32 %v6207_v50, %v6178_v55  ;;  %v6179_v34 = vadd.f32 %v6168_v13, %v4733_v0  ;;  %v6170_v44 = vadd.f32 %v6169_v9, %v6126_v60  ;;  %v10405_v60 = vld [vmem:[%s11991_s7 + $0x78] sm:$0xff]   ;;  %v10415_v9 = vld [vmem:[%s11991_s7 + $0xa0] sm:$0xff]  }
 0x562   : > { %v6171_v23 = vpop.f32.mrf.mxu1  ;;  %v10407_v55 = vld [vmem:[%s11991_s7 + $0x38] sm:$0xff]  }
 0x563   : > { %v6223_v4 = vadd.f32 %v6211_v3, %v6179_v34  ;;  %v6184_v6 = vadd.f32 %v6170_v44, %v4735_v11  ;;  %v6172_v10 = vadd.f32 %v6171_v23, %v6128_v40  ;;  %v6234_v19 = vmax.f32 %v6222_v33, 0.0  ;;  %v10406_v13 = vld [vmem:[%s11991_s7 + $0xb8] sm:$0xff]   ;;  %v10411_v11 = vld [vmem:[%s11991_s7 + $0x68] sm:$0xff]   ;;  %v10426_v23 = vld [vmem:[%s11991_s7 + $0x40] sm:$0xff]  }
 0x564   : > { %v10417_v33 = vld [vmem:[%s11991_s7 + $0x58] sm:$0xff]   ;;  %v10425_v40 = vld [vmem:[%s11991_s7 + $0x8] sm:$0xff]  }
 0x565   : > { %v6228_v39 = vadd.f32 %v6207_v50, %v6184_v6  ;;  %v6185_v31 = vadd.f32 %v6172_v10, %v4737_v2  ;;  %v6235_v63 = vmax.f32 %v6223_v4, 0.0  ;;  %v6243_v57 = vmax.f32 %v6231_v41, %v6234_v19  ;;  %v10418_v34 = vld [vmem:[%s11991_s7 + $0x98] sm:$0xff]   ;;  %v10421_v2 = vld [vmem:[%s11991_s7 + $0x90] sm:$0xff]   ;;  %v10428_v4 = vld [vmem:[%s11991_s7] sm:$0xff]  }
 0x566   : > { %v10419_v44 = vld [vmem:[%s11991_s7 + $0x18] sm:$0xff]  }
 0x567   : > { %v6240_v8 = vmax.f32 %v6228_v39, 0.0  ;;  %v6229_v18 = vadd.f32 %v6211_v3, %v6185_v31  ;;  %v6244_v59 = vmax.f32 %v6232_v37, %v6235_v63  ;;  %v10410_v3 = vld [vmem:[%s11991_s7 + $0x30] sm:$0xff]   ;;  %v10429_v6 = vld [vmem:[%s11991_s7 + $0x138] sm:$0xff]  }
 0x569   : > { %v6246_v38 = vmax.f32 %v6237_v5, %v6240_v8  ;;  %v6241_v26 = vmax.f32 %v6229_v18, 0.0 }
 0x56b   : > { %v6247_v0 = vmax.f32 %v6238_v25, %v6241_v26  ;;  %v6249_v24 = vpack.c.bf16 %v6246_v38, %v6243_v57 }
 0x56d   : > { %v6250_v7 = vpack.c.bf16 %v6247_v0, %v6244_v59  ;;  %v6262_v50 = vand.u32 %v6257_v52, %v6249_v24  ;;  %v10430_v0 = vld [vmem:[%s11991_s7 + $0x178] sm:$0xff]  }
 0x56f   : > { %6281 = vmatprep.subr.bf16.mxu0 %v6262_v50  ;;  %v6265_v27 = vand.u32 %v6257_v52, %v6250_v7 }
 0x570   : > { %6282 = vmatpush1.bf16.msra.mxu0 %v6259_v49 }
 0x571   : > { %9304 = vmatpush3.bf16.msra.mxu1 %v6265_v27  ;;  %6367 = vmatprep.subr.bf16.mxu0 %v6262_v50  ;;  %v10431_v50 = vld [vmem:[%s11991_s7 + $0xf8] sm:$0xff]  }
 0x572   : > { %9309 = vmatprep.subr.bf16.mxu1 %v12106_v62 }
 0x573   : > { %8813 = vmatmul.mubr.msk.bf16.vlgmr.msra.gmra.mxu0 %vm6252_vm5, %v6251_v28 }
 0x574   : > { %6368 = vmatpush1.bf16.msra.mxu0 %v6259_v49  ;;  %9306 = vmatmul.mubr.msk.bf16.vlgmr.msra.gmra.mxu1 %vm6252_vm5, %v6251_v28  ;;  %v10432_v49 = vld [vmem:[%s11991_s7 + $0x130] sm:$0xff]  }
 0x575   : > { %9310 = vmatpush3.bf16.msra.mxu1 %v6265_v27  ;;  %6385 = vmatprep.mubr.bf16.mxu0 %v12107_v36  ;;  %v10433_v28 = vld [vmem:[%s11991_s7 + $0x170] sm:$0xff]   ;;  %v10435_v36 = vld [vmem:[%s11991_s7 + $0x128] sm:$0xff]  }
 0x576   : > { %9311 = vmatprep.mubr.msk.bf16.mxu1 %vm10775_vm4, %v12106_v62  ;;  %9315 = vmatprep.subr.bf16.mxu1 %v12106_v62 }
 0x577   : > { %9143 = vmatprep.subr.bf16.mxu0 %v10405_v60  ;;  %v10434_v60 = vld [vmem:[%s11991_s7 + $0xf0] sm:$0xff]  }
 0x57b   : > { %8816 = vmatmul.mubr.msk.bf16.vlgmr.msra.gmra.mxu0 %vm6252_vm5, %v8815_v30 }
 0x57c   : > { %9312 = vmatmul.mubr.msk.bf16.vlgmr.msra.gmra.mxu1 %vm6252_vm5, %v8815_v30  ;;  %9144 = vmatpush3.bf16.msra.mxu0 %v10407_v55  ;;  %v10436_v30 = vld [vmem:[%s11991_s7 + $0x168] sm:$0xff]  }
 0x57d   : > { %9316 = vmatpush3.bf16.msra.mxu1 %v10406_v13  ;;  %9145 = vmatprep.subr.bf16.mxu0 %v10408_v32  ;;  %v10437_v55 = vld [vmem:[%s11991_s7 + $0xe8] sm:$0xff]   ;;  %v10438_v13 = vld [vmem:[%s11991_s7 + $0x120] sm:$0xff]  }
 0x57e   : > { %9317 = vmatprep.subr.bf16.mxu1 %v12106_v62  ;;  %9331 = vmatprep.mubr.msk.bf16.mxu1 %vm10775_vm4, %v12106_v62  ;;  %v10439_v32 = vld [vmem:[%s11991_s7 + $0x160] sm:$0xff]  }
 0x580   : > { %9146 = vmatpush3.bf16.msra.mxu0 %v10410_v3  ;;  %v10440_v3 = vld [vmem:[%s11991_s7 + $0xe0] sm:$0xff]  }
 0x581   : > { %9318 = vmatpush3.bf16.msra.mxu1 %v10409_v35  ;;  %9147 = vmatprep.subr.bf16.mxu0 %v10411_v11  ;;  %v10441_v35 = vld [vmem:[%s11991_s7 + $0x118] sm:$0xff]  }
 0x582   : > { %9319 = vmatprep.subr.bf16.mxu1 %v12106_v62  ;;  %v10442_v11 = vld [vmem:[%s11991_s7 + $0x158] sm:$0xff]  }
 0x584   : > { %9148 = vmatpush3.bf16.msra.mxu0 %v10413_v29  ;;  %v10444_v29 = vld [vmem:[%s11991_s7 + $0x110] sm:$0xff]  }
 0x585   : > { %9320 = vmatpush3.bf16.msra.mxu1 %v10412_v16  ;;  %9149 = vmatprep.subr.bf16.mxu0 %v10414_v47  ;;  %v10443_v16 = vld [vmem:[%s11991_s7 + $0xd8] sm:$0xff]   ;;  %v10445_v47 = vld [vmem:[%s11991_s7 + $0x150] sm:$0xff]  }
 0x586   : > { %9321 = vmatprep.subr.bf16.mxu1 %v12106_v62 }
 0x588   : > { %9150 = vmatpush3.bf16.msra.mxu0 %v10416_v56  ;;  %v10447_v56 = vld [vmem:[%s11991_s7 + $0x108] sm:$0xff]  }
 0x589   : > { %9322 = vmatpush3.bf16.msra.mxu1 %v10415_v9  ;;  %9151 = vmatprep.subr.bf16.mxu0 %v10417_v33  ;;  %v10446_v9 = vld [vmem:[%s11991_s7 + $0xd0] sm:$0xff]   ;;  %v10448_v33 = vld [vmem:[%s11991_s7 + $0x148] sm:$0xff]  }
 0x58a   : > { %9323 = vmatprep.subr.bf16.mxu1 %v12106_v62 }
 0x58c   : > { %9152 = vmatpush3.bf16.msra.mxu0 %v10419_v44  ;;  %v10450_v44 = vld [vmem:[%s11991_s7 + $0x100] sm:$0xff]  }
 0x58d   : > { %9324 = vmatpush3.bf16.msra.mxu1 %v10418_v34  ;;  %9153 = vmatprep.subr.bf16.mxu0 %v10420_v45  ;;  %v10449_v34 = vld [vmem:[%s11991_s7 + $0xc8] sm:$0xff]   ;;  %v10451_v45 = vld [vmem:[%s11991_s7 + $0x140] sm:$0xff]  }
 0x58e   : > { %9325 = vmatprep.subr.bf16.mxu1 %v12106_v62 }
 0x590   : > { %9154 = vmatpush3.bf16.msra.mxu0 %v10422_v48  ;;  %v10452_v48 = vld [vmem:[%s11991_s7 + $0xc0] sm:$0xff]  }
 0x591   : > { %9326 = vmatpush3.bf16.msra.mxu1 %v10421_v2  ;;  %9155 = vmatprep.subr.bf16.mxu0 %v10423_v61 }
 0x592   : > { %9327 = vmatprep.subr.bf16.mxu1 %v12106_v62 }
 0x594   : > { %9156 = vmatpush3.bf16.msra.mxu0 %v10425_v40  ;;  %v10453_v40 = vld [vmem:[%s11991_s7 + $0x1f8] sm:$0xff]  }
 0x595   : > { %9328 = vmatpush3.bf16.msra.mxu1 %v10424_v21  ;;  %9157 = vmatprep.subr.bf16.mxu0 %v10426_v23 }
 0x596   : > { %9329 = vmatprep.subr.bf16.mxu1 %v12106_v62 }
 0x598   : > { %9158 = vmatpush3.bf16.msra.mxu0 %v10428_v4 }
 0x599   : > { %9330 = vmatpush3.bf16.msra.mxu1 %v10427_v1  ;;  %9174 = vmatprep.subr.bf16.mxu0 %v10429_v6  ;;  %v10454_v1 = vld [vmem:[%s11991_s7 + $0x238] sm:$0xff]  }
 0x59a   : > { %9335 = vmatprep.subr.bf16.mxu1 %v12106_v62  ;;  %v10455_v6 = vld [vmem:[%s11991_s7 + $0x1b8] sm:$0xff]  }
 0x633   : > { %v6301_v10 = vpop.f32.mrf.mxu0 }
 0x634   : > { %v6342_v43 = vpop.f32.mrf.mxu1 }
 0x635   : > { %v6303_v54 = vpop.f32.mrf.mxu0 }
 0x636   : > { %v9307_v58 = vpop.f32.mrf.mxu1 }
 0x637   : > { %v6305_v46 = vpop.f32.mrf.mxu0  ;;  %v10457_v58 = vld [vmem:[%s11991_s7 + $0x230] sm:$0xff]  }
 0x638   : > { %v6345_v19 = vpop.f32.mrf.mxu1  ;;  %v10458_v46 = vld [vmem:[%s11991_s7 + $0x1b0] sm:$0xff]  }
 0x639   : > { %v6306_v39 = vpop.f32.mrf.mxu0  ;;  %v10459_v19 = vld [vmem:[%s11991_s7 + $0x1e8] sm:$0xff]  }
 0x63a   : > { %v9308_v31 = vpop.f32.mrf.mxu1  ;;  %v10460_v39 = vld [vmem:[%s11991_s7 + $0x228] sm:$0xff]  }
 0x63b   : > { %v6387_v14 = vpop.f32.mrf.mxu0  ;;  %v10461_v31 = vld [vmem:[%s11991_s7 + $0x1a8] sm:$0xff]  }
 0x63c   : > { %v6434_v41 = vmax.f32 %v6301_v10, %v6387_v14  ;;  %v6428_v51 = vpop.f32.mrf.mxu1  ;;  %v10462_v14 = vld [vmem:[%s11991_s7 + $0x1e0] sm:$0xff]  }
 0x63d   : > { %v6389_v5 = vpop.f32.mrf.mxu0  ;;  %v6436_v63 = vmax.f32 %v6342_v43, %v6428_v51  ;;  %v10456_v43 = vld [vmem:[%s11991_s7 + $0x1f0] sm:$0xff]   ;;  %v10464_v51 = vld [vmem:[%s11991_s7 + $0x1a0] sm:$0xff]  }
 0x63e   : > { %6437 = vst [vmem:[#allocation3] sm:$0x1f] %v6434_v41  ;;  %v6435_v8 = vmax.f32 %v6303_v54, %v6389_v5  ;;  %v9313_v18 = vpop.f32.mrf.mxu1  ;;  %v10463_v41 = vld [vmem:[%s11991_s7 + $0x220] sm:$0xff]   ;;  %v10465_v5 = vld [vmem:[%s11991_s7 + $0x1d8] sm:$0xff]  }
 0x63f   : > { %6439 = vst [vmem:[#allocation3 + $0x10] sm:$0x1f] %v6436_v63  ;;  %v6391_v37 = vpop.f32.mrf.mxu0  ;;  %v10466_v63 = vld [vmem:[%s11991_s7 + $0x218] sm:$0xff]   ;;  %v10468_v18 = vld [vmem:[%s11991_s7 + $0x1d0] sm:$0xff]  }
 0x640   : > { %6438 = vst [vmem:[#allocation3 + $0x8] sm:$0x1f] %v6435_v8  ;;  %v6431_v17 = vpop.f32.mrf.mxu1  ;;  %v10467_v8 = vld [vmem:[%s11991_s7 + $0x198] sm:$0xff]   ;;  %v10469_v37 = vld [vmem:[%s11991_s7 + $0x210] sm:$0xff]  }
 0x641   : > { %v6392_v15 = vpop.f32.mrf.mxu0  ;;  %v10470_v17 = vld [vmem:[%s11991_s7 + $0x190] sm:$0xff]  }
 0x642   : > { %v9314_v20 = vpop.f32.mrf.mxu1  ;;  %v10471_v15 = vld [vmem:[%s11991_s7 + $0x1c8] sm:$0xff]  }
 0x643   : > { %v10472_v20 = vld [vmem:[%s11991_s7 + $0x208] sm:$0xff]  }
 0x647   : > { %v6441_v25 = vld [vmem:[#allocation3] ss:$8 sm:$0x7]  ;;  %v11561_v57 = vld [vmem:[#allocation3 + $0x1] ss:$8 sm:$0x7] }
 0x648   : > { %v6450_v38 = vrot.slane %v6441_v25, %v12096_v22  ;;  %v6454_v26 = vrot.slane %v6441_v25, %v12102_v42  ;;  %v6446_v53 = vrot.slane %v6441_v25, %v12095_v12  ;;  %v6744_v59 = vrot.slane %v11561_v57, %v12096_v22  ;;  %v11642_v2 = vld [vmem:[#allocation3 + $0x2] ss:$8 sm:$0x7] }
 0x649   : > { %v6748_v61 = vrot.slane %v11561_v57, %v12102_v42  ;;  %v6740_v21 = vrot.slane %v11561_v57, %v12095_v12  ;;  %v7039_v23 = vrot.slane %v11642_v2, %v12096_v22  ;;  %v10473_v25 = vld [vmem:[%s11991_s7 + $0x188] sm:$0xff]   ;;  %v10474_v57 = vld [vmem:[%s11991_s7 + $0x1c0] sm:$0xff]  }
 0x64a   : > { %v6459_v24 = vpack.c.bf16 %v6450_v38, %v6450_v38  ;;  %v6460_v52 = vpack.c.bf16 %v6454_v26, %v6454_v26  ;;  %v6458_v7 = vpack.c.bf16 %v6446_v53, %v6446_v53  ;;  %v6753_v27 = vpack.c.bf16 %v6744_v59, %v6744_v59  ;;  %v10475_v38 = vld [vmem:[%s11991_s7 + $0x200] sm:$0xff]  }
 0x64b   : > { %v6754_v4 = vpack.c.bf16 %v6748_v61, %v6748_v61  ;;  %v6752_v10 = vpack.c.bf16 %v6740_v21, %v6740_v21  ;;  %v7048_v54 = vpack.c.bf16 %v7039_v23, %v7039_v23  ;;  %v11732_v26 = vld [vmem:[#allocation3 + $0x3] ss:$8 sm:$0x7]  ;;  %v7043_v53 = vrot.slane %v11642_v2, %v12102_v42  ;;  %v11822_v61 = vld [vmem:[#allocation3 + $0x4] ss:$8 sm:$0x7] }
 0x64c   : > { %6685 = vmatprep.mubr.bf16.mxu0 %v6459_v24  ;;  %9332 = vmatmul.mubr.bf16.vlgmr.msra.gmra.mxu1 %v6460_v52  ;;  %v10476_v59 = vld [vmem:[%s11991_s7 + $0x180] sm:$0xff]   ;;  %v10477_v24 = vld [vmem:[%s11991_s7 + $0x2b8] sm:$0xff]   ;;  %v7334_v52 = vrot.slane %v11732_v26, %v12096_v22  ;;  %v7338_v21 = vrot.slane %v11732_v26, %v12102_v42  ;;  %v7330_v23 = vrot.slane %v11732_v26, %v12095_v12 }
 0x64d   : > { %9336 = vmatpush3.bf16.msra.mxu1 %v10430_v0  ;;  %6686 = vmatmul.mubr.bf16.vlgmr.msra.gmra.mxu0 %v6458_v7  ;;  %v7035_v0 = vrot.slane %v11642_v2, %v12095_v12  ;;  %v10478_v7 = vld [vmem:[%s11991_s7 + $0x2f8] sm:$0xff]   ;;  %v10498_v2 = vld [vmem:[%s11991_s7 + $0x280] sm:$0xff]  }
 0x64e   : > { %9175 = vmatpush3.bf16.msra.mxu0 %v10431_v50  ;;  %6980 = vmatprep.mubr.bf16.mxu0 %v6753_v27  ;;  %v7049_v50 = vpack.c.bf16 %v7043_v53, %v7043_v53  ;;  %v10523_v26 = vld [vmem:[%s11991_s7 + $0x380] sm:$0xff]   ;;  %v7633_v53 = vrot.slane %v11822_v61, %v12102_v42  ;;  %v10525_v42 = vld [vmem:[%s11993_s9 + $0x18] sm:$0xff]  }
 0x64f   : > { %9337 = vmatprep.subr.bf16.mxu1 %v12106_v62  ;;  %9176 = vmatprep.subr.bf16.mxu0 %v10432_v49  ;;  %v10479_v49 = vld [vmem:[%s11991_s7 + $0x278] sm:$0xff]   ;;  %v7047_v27 = vpack.c.bf16 %v7035_v0, %v7035_v0  ;;  %v7625_v0 = vrot.slane %v11822_v61, %v12095_v12 }
 0x650   : > { %9351 = vmatprep.mubr.msk.bf16.mxu1 %vm10775_vm4, %v12106_v62 }
 0x651   : > { %9338 = vmatpush3.bf16.msra.mxu1 %v10433_v28  ;;  %v10480_v28 = vld [vmem:[%s11991_s7 + $0x2b0] sm:$0xff]  }
 0x652   : > { %9177 = vmatpush3.bf16.msra.mxu0 %v10434_v60  ;;  %9339 = vmatprep.subr.bf16.mxu1 %v12106_v62  ;;  %v7343_v60 = vpack.c.bf16 %v7334_v52, %v7334_v52  ;;  %v7637_v52 = vpack.c.bf16 %v7625_v0, %v7625_v0 }
 0x653   : > { %9178 = vmatprep.subr.bf16.mxu0 %v10435_v36  ;;  %v10481_v36 = vld [vmem:[%s11991_s7 + $0x2f0] sm:$0xff]  }
 0x655   : > { %9340 = vmatpush3.bf16.msra.mxu1 %v10436_v30  ;;  %v10482_v30 = vld [vmem:[%s11991_s7 + $0x270] sm:$0xff]  }
 0x656   : > { %9179 = vmatpush3.bf16.msra.mxu0 %v10437_v55  ;;  %9341 = vmatprep.subr.bf16.mxu1 %v12106_v62  ;;  %v10483_v55 = vld [vmem:[%s11991_s7 + $0x2a8] sm:$0xff]  }
 0x657   : > { %9180 = vmatprep.subr.bf16.mxu0 %v10438_v13  ;;  %v10484_v13 = vld [vmem:[%s11991_s7 + $0x2e8] sm:$0xff]  }
 0x659   : > { %9342 = vmatpush3.bf16.msra.mxu1 %v10439_v32  ;;  %v10485_v32 = vld [vmem:[%s11991_s7 + $0x268] sm:$0xff]  }
 0x65a   : > { %9181 = vmatpush3.bf16.msra.mxu0 %v10440_v3  ;;  %9343 = vmatprep.subr.bf16.mxu1 %v12106_v62  ;;  %v10486_v3 = vld [vmem:[%s11991_s7 + $0x2a0] sm:$0xff]  }
 0x65b   : > { %9182 = vmatprep.subr.bf16.mxu0 %v10441_v35  ;;  %v10487_v35 = vld [vmem:[%s11991_s7 + $0x2e0] sm:$0xff]  }
 0x65d   : > { %9344 = vmatpush3.bf16.msra.mxu1 %v10442_v11  ;;  %v10488_v11 = vld [vmem:[%s11991_s7 + $0x260] sm:$0xff]  }
 0x65e   : > { %9183 = vmatpush3.bf16.msra.mxu0 %v10443_v16  ;;  %9345 = vmatprep.subr.bf16.mxu1 %v12106_v62  ;;  %v10489_v16 = vld [vmem:[%s11991_s7 + $0x298] sm:$0xff]  }
 0x65f   : > { %9184 = vmatprep.subr.bf16.mxu0 %v10444_v29  ;;  %v10490_v29 = vld [vmem:[%s11991_s7 + $0x2d8] sm:$0xff]  }
 0x661   : > { %9346 = vmatpush3.bf16.msra.mxu1 %v10445_v47  ;;  %v10491_v47 = vld [vmem:[%s11991_s7 + $0x258] sm:$0xff]  }
 0x662   : > { %9185 = vmatpush3.bf16.msra.mxu0 %v10446_v9  ;;  %9347 = vmatprep.subr.bf16.mxu1 %v12106_v62  ;;  %v10492_v9 = vld [vmem:[%s11991_s7 + $0x290] sm:$0xff]  }
 0x663   : > { %9186 = vmatprep.subr.bf16.mxu0 %v10447_v56  ;;  %v10493_v56 = vld [vmem:[%s11991_s7 + $0x2d0] sm:$0xff]  }
 0x665   : > { %9348 = vmatpush3.bf16.msra.mxu1 %v10448_v33  ;;  %v10494_v33 = vld [vmem:[%s11991_s7 + $0x250] sm:$0xff]  }
 0x666   : > { %9187 = vmatpush3.bf16.msra.mxu0 %v10449_v34  ;;  %9349 = vmatprep.subr.bf16.mxu1 %v12106_v62  ;;  %v10495_v34 = vld [vmem:[%s11991_s7 + $0x288] sm:$0xff]  }
 0x667   : > { %9188 = vmatprep.subr.bf16.mxu0 %v10450_v44  ;;  %v10496_v44 = vld [vmem:[%s11991_s7 + $0x2c8] sm:$0xff]  }
 0x669   : > { %9350 = vmatpush3.bf16.msra.mxu1 %v10451_v45  ;;  %v10497_v45 = vld [vmem:[%s11991_s7 + $0x248] sm:$0xff]  }
 0x66a   : > { %9189 = vmatpush3.bf16.msra.mxu0 %v10452_v48  ;;  %9355 = vmatprep.subr.bf16.mxu1 %v12106_v62  ;;  %v10499_v48 = vld [vmem:[%s11991_s7 + $0x2c0] sm:$0xff]  }
 0x66b   : > { %9205 = vmatprep.subr.bf16.mxu0 %v10453_v40  ;;  %v10500_v40 = vld [vmem:[%s11991_s7 + $0x240] sm:$0xff]  }
 0x66c   : > { %9352 = vmatmul.mubr.bf16.vlgmr.msra.gmra.mxu1 %v6754_v4  ;;  %v7629_v4 = vrot.slane %v11822_v61, %v12096_v22 }
 0x66d   : > { %6981 = vmatmul.mubr.bf16.vlgmr.msra.gmra.mxu0 %v6752_v10  ;;  %9356 = vmatpush3.bf16.msra.mxu1 %v10454_v1  ;;  %v10501_v1 = vld [vmem:[%s11991_s7 + $0x378] sm:$0xff]   ;;  %v7344_v10 = vpack.c.bf16 %v7338_v21, %v7338_v21 }
 0x66e   : > { %9206 = vmatpush3.bf16.msra.mxu0 %v10455_v6  ;;  %7275 = vmatprep.mubr.bf16.mxu0 %v7048_v54  ;;  %v10502_v6 = vld [vmem:[%s11991_s7 + $0x3b8] sm:$0xff]   ;;  %v7342_v54 = vpack.c.bf16 %v7330_v23, %v7330_v23  ;;  %v7638_v22 = vpack.c.bf16 %v7629_v4, %v7629_v4 }
 0x66f   : > { %9357 = vmatprep.subr.bf16.mxu1 %v12106_v62  ;;  %9207 = vmatprep.subr.bf16.mxu0 %v10456_v43  ;;  %v10503_v43 = vld [vmem:[%s11991_s7 + $0x338] sm:$0xff]  }
 0x670   : > { %9371 = vmatprep.mubr.msk.bf16.mxu1 %vm10775_vm4, %v12106_v62 }
 0x671   : > { %9358 = vmatpush3.bf16.msra.mxu1 %v10457_v58  ;;  %v10504_v58 = vld [vmem:[%s11991_s7 + $0x370] sm:$0xff]  }
 0x672   : > { %9208 = vmatpush3.bf16.msra.mxu0 %v10458_v46  ;;  %9359 = vmatprep.subr.bf16.mxu1 %v12106_v62  ;;  %v10505_v46 = vld [vmem:[%s11991_s7 + $0x3b0] sm:$0xff]  }
 0x673   : > { %9209 = vmatprep.subr.bf16.mxu0 %v10459_v19  ;;  %v10506_v19 = vld [vmem:[%s11991_s7 + $0x330] sm:$0xff]  }
 0x675   : > { %9360 = vmatpush3.bf16.msra.mxu1 %v10460_v39  ;;  %v10507_v39 = vld [vmem:[%s11991_s7 + $0x368] sm:$0xff]  }
 0x676   : > { %9210 = vmatpush3.bf16.msra.mxu0 %v10461_v31  ;;  %9361 = vmatprep.subr.bf16.mxu1 %v12106_v62  ;;  %v10508_v31 = vld [vmem:[%s11991_s7 + $0x3a8] sm:$0xff]  }
 0x677   : > { %9211 = vmatprep.subr.bf16.mxu0 %v10462_v14  ;;  %v10509_v14 = vld [vmem:[%s11991_s7 + $0x328] sm:$0xff]  }
 0x679   : > { %9362 = vmatpush3.bf16.msra.mxu1 %v10463_v41  ;;  %v10510_v41 = vld [vmem:[%s11991_s7 + $0x360] sm:$0xff]  }
 0x67a   : > { %9212 = vmatpush3.bf16.msra.mxu0 %v10464_v51  ;;  %9363 = vmatprep.subr.bf16.mxu1 %v12106_v62  ;;  %v10511_v51 = vld [vmem:[%s11991_s7 + $0x3a0] sm:$0xff]  }
 0x67b   : > { %9213 = vmatprep.subr.bf16.mxu0 %v10465_v5  ;;  %v10512_v5 = vld [vmem:[%s11991_s7 + $0x320] sm:$0xff]  }
 0x67d   : > { %9364 = vmatpush3.bf16.msra.mxu1 %v10466_v63  ;;  %v10513_v63 = vld [vmem:[%s11991_s7 + $0x358] sm:$0xff]  }
 0x67e   : > { %9214 = vmatpush3.bf16.msra.mxu0 %v10467_v8  ;;  %9365 = vmatprep.subr.bf16.mxu1 %v12106_v62  ;;  %v10514_v8 = vld [vmem:[%s11991_s7 + $0x398] sm:$0xff]  }
 0x67f   : > { %9215 = vmatprep.subr.bf16.mxu0 %v10468_v18  ;;  %v10515_v18 = vld [vmem:[%s11991_s7 + $0x318] sm:$0xff]  }
 0x681   : > { %9366 = vmatpush3.bf16.msra.mxu1 %v10469_v37  ;;  %v10516_v37 = vld [vmem:[%s11991_s7 + $0x350] sm:$0xff]  }
 0x682   : > { %9216 = vmatpush3.bf16.msra.mxu0 %v10470_v17  ;;  %9367 = vmatprep.subr.bf16.mxu1 %v12106_v62  ;;  %v10517_v17 = vld [vmem:[%s11991_s7 + $0x390] sm:$0xff]  }
 0x683   : > { %9217 = vmatprep.subr.bf16.mxu0 %v10471_v15  ;;  %v10518_v15 = vld [vmem:[%s11991_s7 + $0x310] sm:$0xff]  }
 0x685   : > { %9368 = vmatpush3.bf16.msra.mxu1 %v10472_v20  ;;  %v10519_v20 = vld [vmem:[%s11991_s7 + $0x348] sm:$0xff]  }
 0x686   : > { %9218 = vmatpush3.bf16.msra.mxu0 %v10473_v25  ;;  %9369 = vmatprep.subr.bf16.mxu1 %v12106_v62  ;;  %v10520_v25 = vld [vmem:[%s11991_s7 + $0x388] sm:$0xff]  }
 0x687   : > { %9219 = vmatprep.subr.bf16.mxu0 %v10474_v57  ;;  %v10521_v57 = vld [vmem:[%s11991_s7 + $0x308] sm:$0xff]  }
 0x689   : > { %9370 = vmatpush3.bf16.msra.mxu1 %v10475_v38  ;;  %v10522_v38 = vld [vmem:[%s11991_s7 + $0x340] sm:$0xff]  }
 0x68a   : > { %9220 = vmatpush3.bf16.msra.mxu0 %v10476_v59  ;;  %9375 = vmatprep.subr.bf16.mxu1 %v12106_v62  ;;  %v10524_v59 = vld [vmem:[%s11991_s7 + $0x300] sm:$0xff]  }
 0x68b   : > { %9236 = vmatprep.subr.bf16.mxu0 %v10477_v24  ;;  %v7639_v24 = vpack.c.bf16 %v7633_v53, %v7633_v53 }
 0x68c   : > { %9372 = vmatmul.mubr.bf16.vlgmr.msra.gmra.mxu1 %v7049_v50 }
 0x68d   : > { %7276 = vmatmul.mubr.bf16.vlgmr.msra.gmra.mxu0 %v7047_v27  ;;  %9376 = vmatpush3.bf16.msra.mxu1 %v10478_v7 }
 0x68e   : > { %9237 = vmatpush3.bf16.msra.mxu0 %v10479_v49  ;;  %7570 = vmatprep.mubr.bf16.mxu0 %v7343_v60 }
 0x68f   : > { %9377 = vmatprep.subr.bf16.mxu1 %v12106_v62  ;;  %9238 = vmatprep.subr.bf16.mxu0 %v10480_v28 }
 0x690   : > { %9391 = vmatprep.mubr.msk.bf16.mxu1 %vm10775_vm4, %v12106_v62 }
 0x691   : > { %9378 = vmatpush3.bf16.msra.mxu1 %v10481_v36 }
 0x692   : > { %9239 = vmatpush3.bf16.msra.mxu0 %v10482_v30  ;;  %9379 = vmatprep.subr.bf16.mxu1 %v12106_v62 }
 0x693   : > { %9240 = vmatprep.subr.bf16.mxu0 %v10483_v55 }
 0x695   : > { %9380 = vmatpush3.bf16.msra.mxu1 %v10484_v13  ;;  %v10526_v13 = vld [vmem:[%s11993_s9 + $0x10] sm:$0xff]  }
 0x696   : > { %9241 = vmatpush3.bf16.msra.mxu0 %v10485_v32  ;;  %9381 = vmatprep.subr.bf16.mxu1 %v12106_v62  ;;  %v10527_v32 = vld [vmem:[%s11993_s9 + $0x8] sm:$0xff]  }
 0x697   : > { %9242 = vmatprep.subr.bf16.mxu0 %v10486_v3  ;;  %v10528_v3 = vld [vmem:[%s11993_s9] sm:$0xff]  }
 0x699   : > { %9382 = vmatpush3.bf16.msra.mxu1 %v10487_v35 }
 0x69a   : > { %9243 = vmatpush3.bf16.msra.mxu0 %v10488_v11  ;;  %9383 = vmatprep.subr.bf16.mxu1 %v12106_v62 }
 0x69b   : > { %9244 = vmatprep.subr.bf16.mxu0 %v10489_v16 }
 0x69d   : > { %9384 = vmatpush3.bf16.msra.mxu1 %v10490_v29  ;;  %v6440_v29 = vld [vmem:[#allocation12] sm:$0x1] }
 0x69e   : > { %9245 = vmatpush3.bf16.msra.mxu0 %v10491_v47  ;;  %9385 = vmatprep.subr.bf16.mxu1 %v12106_v62 }
 0x69f   : > { %9246 = vmatprep.subr.bf16.mxu0 %v10492_v9 }
 0x6a1   : > { %9386 = vmatpush3.bf16.msra.mxu1 %v10493_v56 }
 0x6a2   : > { %9247 = vmatpush3.bf16.msra.mxu0 %v10494_v33  ;;  %9387 = vmatprep.subr.bf16.mxu1 %v12106_v62 }
 0x6a3   : > { %9248 = vmatprep.subr.bf16.mxu0 %v10495_v34 }
 0x6a5   : > { %9388 = vmatpush3.bf16.msra.mxu1 %v10496_v44 }
 0x6a6   : > { %9249 = vmatpush3.bf16.msra.mxu0 %v10497_v45  ;;  %9389 = vmatprep.subr.bf16.mxu1 %v12106_v62 }
 0x6a7   : > { %9250 = vmatprep.subr.bf16.mxu0 %v10498_v2 }
 0x6a9   : > { %9390 = vmatpush3.bf16.msra.mxu1 %v10499_v48 }
 0x6aa   : > { %9251 = vmatpush3.bf16.msra.mxu0 %v10500_v40  ;;  %9395 = vmatprep.subr.bf16.mxu1 %v12106_v62 }
 0x6ab   : > { %9267 = vmatprep.subr.bf16.mxu0 %v10501_v1 }
 0x6ac   : > { %9392 = vmatmul.mubr.bf16.vlgmr.msra.gmra.mxu1 %v7344_v10 }
 0x6ad   : > { %7571 = vmatmul.mubr.bf16.vlgmr.msra.gmra.mxu0 %v7342_v54  ;;  %9396 = vmatpush3.bf16.msra.mxu1 %v10502_v6 }
 0x6ae   : > { %9268 = vmatpush3.bf16.msra.mxu0 %v10503_v43  ;;  %7865 = vmatprep.mubr.bf16.mxu0 %v7638_v22 }
 0x6af   : > { %9397 = vmatprep.subr.bf16.mxu1 %v12106_v62  ;;  %9269 = vmatprep.subr.bf16.mxu0 %v10504_v58 }
 0x6b0   : > { %9411 = vmatprep.mubr.msk.bf16.mxu1 %vm10775_vm4, %v12106_v62 }
 0x6b1   : > { %9398 = vmatpush3.bf16.msra.mxu1 %v10505_v46 }
 0x6b2   : > { %9270 = vmatpush3.bf16.msra.mxu0 %v10506_v19  ;;  %9399 = vmatprep.subr.bf16.mxu1 %v12106_v62 }
 0x6b3   : > { %9271 = vmatprep.subr.bf16.mxu0 %v10507_v39 }
 0x6b5   : > { %9400 = vmatpush3.bf16.msra.mxu1 %v10508_v31 }
 0x6b6   : > { %9272 = vmatpush3.bf16.msra.mxu0 %v10509_v14  ;;  %9401 = vmatprep.subr.bf16.mxu1 %v12106_v62 }
 0x6b7   : > { %9273 = vmatprep.subr.bf16.mxu0 %v10510_v41 }
 0x6b9   : > { %9402 = vmatpush3.bf16.msra.mxu1 %v10511_v51 }
 0x6ba   : > { %9274 = vmatpush3.bf16.msra.mxu0 %v10512_v5  ;;  %9403 = vmatprep.subr.bf16.mxu1 %v12106_v62 }
 0x6bb   : > { %9275 = vmatprep.subr.bf16.mxu0 %v10513_v63 }
 0x6bd   : > { %9404 = vmatpush3.bf16.msra.mxu1 %v10514_v8 }
 0x6be   : > { %9276 = vmatpush3.bf16.msra.mxu0 %v10515_v18  ;;  %9405 = vmatprep.subr.bf16.mxu1 %v12106_v62 }
 0x6bf   : > { %9277 = vmatprep.subr.bf16.mxu0 %v10516_v37 }
 0x6c1   : > { %9406 = vmatpush3.bf16.msra.mxu1 %v10517_v17 }
 0x6c2   : > { %9278 = vmatpush3.bf16.msra.mxu0 %v10518_v15  ;;  %9407 = vmatprep.subr.bf16.mxu1 %v12106_v62 }
 0x6c3   : > { %9279 = vmatprep.subr.bf16.mxu0 %v10519_v20 }
 0x6c5   : > { %9408 = vmatpush3.bf16.msra.mxu1 %v10520_v25 }
 0x6c6   : > { %9280 = vmatpush3.bf16.msra.mxu0 %v10521_v57  ;;  %9409 = vmatprep.subr.bf16.mxu1 %v12106_v62 }
 0x6c7   : > { %9281 = vmatprep.subr.bf16.mxu0 %v10522_v38 }
 0x6c9   : > { %9410 = vmatpush3.bf16.msra.mxu1 %v10523_v26 }
 0x6ca   : > { %9282 = vmatpush3.bf16.msra.mxu0 %v10524_v59 }
 0x6cb   : > { %9415 = vmatprep.subr.bf16.mxu0 %v12106_v62 }
 0x6cc   : > { %9412 = vmatmul.mubr.bf16.vlgmr.msra.gmra.mxu1 %v7639_v24  ;;  %v7924_v24 = vld [vmem:[#allocation13] sm:$0x1] }
 0x6cd   : > { %7866 = vmatmul.mubr.bf16.vlgmr.msra.gmra.mxu0 %v7637_v52 }
 0x6ce   : > { %9423 = vmatprep.mubr.msk.bf16.mxu0 %vm10775_vm4, %v12106_v62  ;;  %9416 = vmatpush3.bf16.msra.mxu0 %v10525_v42 }
 0x6cf   : > { %9417 = vmatprep.subr.bf16.mxu0 %v12106_v62 }
 0x6d2   : > { %9418 = vmatpush3.bf16.msra.mxu0 %v10526_v13 }
 0x6d3   : > { %9419 = vmatprep.subr.bf16.mxu0 %v12106_v62 }
 0x6d6   : > { %9420 = vmatpush3.bf16.msra.mxu0 %v10527_v32 }
 0x6d7   : > { %9421 = vmatprep.subr.bf16.mxu0 %v12106_v62 }
 0x6da   : > { %9422 = vmatpush3.bf16.msra.mxu0 %v10528_v3 }
 0x70c   : > { %v6727_v12 = vpop.f32.mrf.mxu1 }
 0x70d   : > { %v9159_v7 = vpop.f32.mrf.mxu0 }
 0x70e   : > { %v9333_v50 = vpop.f32.mrf.mxu1 }
 0x70f   : > { %v9160_v49 = vpop.f32.mrf.mxu0 }
 0x710   : > { %v9161_v27 = vadd.f32 %v9160_v49, %v9159_v7  ;;  %v6730_v28 = vpop.f32.mrf.mxu1 }
 0x711   : > { %v9162_v60 = vpop.f32.mrf.mxu0 }
 0x712   : > { %v6728_v36 = vadd.f32 %v9161_v27, %v6727_v12  ;;  %v9334_v30 = vpop.f32.mrf.mxu1 }
 0x713   : > { %v9163_v55 = vpop.f32.mrf.mxu0 }
 0x714   : > { %v6733_v34 = vadd.f32 %v6728_v36, %v6440_v29 }
 0x72c   : > { %v7022_v35 = vpop.f32.mrf.mxu1 }
 0x72d   : > { %v9190_v11 = vpop.f32.mrf.mxu0 }
 0x72e   : > { %v9353_v16 = vpop.f32.mrf.mxu1 }
 0x72f   : > { %v9191_v47 = vpop.f32.mrf.mxu0 }
 0x730   : > { %v9192_v9 = vadd.f32 %v9191_v47, %v9190_v11  ;;  %v7025_v56 = vpop.f32.mrf.mxu1 }
 0x731   : > { %v9193_v33 = vpop.f32.mrf.mxu0 }
 0x732   : > { %v7023_v44 = vadd.f32 %v9192_v9, %v7022_v35  ;;  %v9354_v45 = vpop.f32.mrf.mxu1 }
 0x733   : > { %v9194_v2 = vpop.f32.mrf.mxu0 }
 0x734   : > { %v7028_v48 = vadd.f32 %v7023_v44, %v6733_v34 }
 0x74c   : > { %v7317_v61 = vpop.f32.mrf.mxu1 }
 0x74d   : > { %v9221_v21 = vpop.f32.mrf.mxu0 }
 0x74e   : > { %v9373_v40 = vpop.f32.mrf.mxu1 }
 0x74f   : > { %v9222_v23 = vpop.f32.mrf.mxu0 }
 0x750   : > { %v9223_v1 = vadd.f32 %v9222_v23, %v9221_v21  ;;  %v7320_v62 = vpop.f32.mrf.mxu1 }
 0x751   : > { %v9224_v4 = vpop.f32.mrf.mxu0 }
 0x752   : > { %v7318_v6 = vadd.f32 %v9223_v1, %v7317_v61  ;;  %v9374_v10 = vpop.f32.mrf.mxu1 }
 0x753   : > { %v9225_v43 = vpop.f32.mrf.mxu0 }
 0x754   : > { %v7323_v54 = vadd.f32 %v7318_v6, %v7028_v48 }
 0x76c   : > { %v7612_v58 = vpop.f32.mrf.mxu1 }
 0x76d   : > { %v9252_v22 = vpop.f32.mrf.mxu0 }
 0x76e   : > { %v9393_v46 = vpop.f32.mrf.mxu1 }
 0x76f   : > { %v9253_v19 = vpop.f32.mrf.mxu0 }
 0x770   : > { %v7615_v39 = vpop.f32.mrf.mxu1  ;;  %v9254_v51 = vadd.f32 %v9253_v19, %v9252_v22 }
 0x771   : > { %v9255_v31 = vpop.f32.mrf.mxu0 }
 0x772   : > { %v9394_v14 = vpop.f32.mrf.mxu1  ;;  %v7613_v8 = vadd.f32 %v9254_v51, %v7612_v58 }
 0x773   : > { %v9256_v41 = vpop.f32.mrf.mxu0 }
 0x774   : > { %v7618_v25 = vadd.f32 %v7613_v8, %v7323_v54 }
 0x78c   : > { %v7907_v5 = vpop.f32.mrf.mxu1 }
 0x78d   : > { %v9283_v63 = vpop.f32.mrf.mxu0 }
 0x78e   : > { %v9413_v18 = vpop.f32.mrf.mxu1 }
 0x78f   : > { %v9284_v37 = vpop.f32.mrf.mxu0 }
 0x790   : > { %v9285_v17 = vadd.f32 %v9284_v37, %v9283_v63  ;;  %v7910_v15 = vpop.f32.mrf.mxu1 }
 0x791   : > { %v9286_v20 = vpop.f32.mrf.mxu0 }
 0x792   : > { %v7908_v57 = vadd.f32 %v9285_v17, %v7907_v5  ;;  %v9414_v38 = vpop.f32.mrf.mxu1 }
 0x793   : > { %v9287_v26 = vpop.f32.mrf.mxu0 }
 0x794   : > { %v7913_v53 = vadd.f32 %v7908_v57, %v7618_v25 }
 0x796   : > { %v7914_v59 = vmax.f32 %v7913_v53, 0.0 }
 0x798   : > { %v7915_v0 = vpack.c.bf16 %v7914_v59, %v7914_v59 }
 0x79a   : > { %9424 = vmatmul.mubr.msk.bf16.vlgmr.msra.gmra.mxu0 %vm7949_vm6, %v7915_v0 }
 0x85a   : > { %v7987_v52 = vpop.f32.mrf.mxu0 }
 0x85b   : > { %v7988_v42 = vadd.f32 %v7987_v52, %v7924_v24 }
 0x85c   : > { %v9425_v12 = vpop.f32.mrf.mxu0 }
 0x85d   : > { %7994 = vst.msk [vmem:[%s458_s13] sm:$0x1] %vm7993_vm7, %v7988_v42 }
 0x85e   : > { %v7990_v7 = vpop.f32.mrf.mxu0 }
 0x85f   : > { %10698 = shalt.err (!%p10695_p10)
}
 0x860   : > { %s10699_s14 = scalar_lea.hbm %s11943_s15, 16  ;;  %s10703_s25 = scalar_lea.hbm %s11995_s11, 32 }
 0x861   : > { %p10700_p7 = scmp.ne.s32.totalorder %s11943_s15, %s10699_s14  ;;  %p10704_p11 = scmp.lt.s32.totalorder %s11943_s15, %s11995_s11 }
 0x862   : > { %p10705_p0 = scmp.lt.s32.totalorder %s10703_s25, %s10699_s14 }
 0x863   : > { %p10701_p8 = pnand %p10700_p7, %p12108_p3 }
 0x864   : > { %p10706_p1 = por %p10705_p0, %p10704_p11 }
 0x865   : > { %p10702_p12 = pneg %p10701_p8 }
 0x867   : > { %p10707_p2 = pnand %p10706_p1, %p10702_p12 }
 0x869   : > { %10710 = shalt.err (!%p10707_p2)
}
 0x86a   : > { %9455 = dma.vmem_to_hbm [thread:$0]  (%p12108_p3), %s11945_s1, 16, %s11943_s15, %s7996_s24   ;;  %v9426_v50 = vpop.f32.mrf.mxu0 }
 0x86b PF: > { %p9492_p9 = scmp.ge.s32.totalorder %s10761_s20, 2  ;;  %s8020_s22 = sand.u32 1, %s10749_s17  }
 0x86c   : > { %p12109_p4 = scmp.ne.s32.totalorder %s12021_s28, 0  ;;  %s8021_s29 = scalar_lea.sflag [#allocation6], %s8020_s22 }
 0x86e   : > { %p9477_p5 = pnand %p9492_p9, %p12109_p4 }
 0x870   : > { %p9478_p6 = pneg %p9477_p5 }
 0x872   : > { %10744 = dma.done.wait (%p9478_p6), %s8021_s29, 16  }
 0x873   : > { %10746 = vsyncadd (%p9478_p6), %s8021_s29, 4294967280  ;;  %s12110_s27 = sld [smem:[#allocation21_spill]]  ;;  %p25_p13 = scmp.ge.s32.totalorder %s10863_s23, 4  }
 0x874   : > { %s12111_s17 = smov %s10753_s18  ;;  %s12112_s18 = smov %s10757_s19 }
 0x875   : > { %s12114_s20 = smov %s10863_s23  ;;  %27 = sbr.rel (!%p25_p13) target bundleno = 11 (0xb), region = 138 }
 0x879   : > { %s12113_s19 = smov %s12110_s27 }
 0x87a   :  { %8025 = vsyncpa [#allocation5], 1 }
 0x87b   :  { %8027 = vsyncpa [#allocation5 + $0x1], 1 }
 0x87c   :  { %8028 = vsyncpa [#allocation8], 1 }
 0x87d   :  { %8029 = vsyncpa [#allocation11], 1 }
 0x87e   :  { %8030 = vsyncpa [#allocation14], 1 }
 0x87f   :  { %8031 = vsyncpa [#allocation6], 1 }
 0x880   :  { %8033 = vsyncpa [#allocation6 + $0x1], 1 }

</bundles_post_ra>
